<compile_context>
chip_gen: v6e
topology: v6e:2x2x1
jax: 0.10.0
libtpu: 0.0.40
codegen_flags: <defaults>
</compile_context>

<pallas_src>
import math

import jax
import jax.numpy as jnp
from jax.experimental import pallas as pl
from jax.experimental.pallas import tpu as pltpu

PAD = 0  # Offsets.PAD


def char_lstm_kernel(ids_ref, fused_ref, whh_f_ref, whh_b_ref, out_ref, xg_ref):
    ids = ids_ref[...]                      # (Nt, W) int32
    Nt, W = ids.shape
    V = fused_ref.shape[0]
    H = whh_f_ref.shape[0]
    G = 4 * H

    fused = fused_ref[...]                  # (V, 8H): table@W_ih + bias, both dirs,
                                            # gate order [i, f, o, g]

    # ---- Phase 1 (off the serial path): embedding lookup + input projection.
    # One (Nt, V) @ (V, 8H) MXU op per char position, staged into VMEM scratch
    # as (direction, t, Nt, 4H) so the recurrence needs no lane slicing.
    for t in range(W):
        oh = (ids[:, t:t + 1] ==
              jax.lax.broadcasted_iota(jnp.int32, (1, V), 1)).astype(fused.dtype)
        xg_t = jnp.dot(oh, fused, preferred_element_type=jnp.float32)  # (Nt, 8H)
        xg_ref[0, t] = xg_t[:, :G]          # forward-direction gate inputs
        xg_ref[1, t] = xg_t[:, G:]          # backward-direction gate inputs

    # word lengths, clamped to >= 1 (matches sorted_word_lengths.masked_fill_)
    lengths = jnp.maximum(
        jnp.sum((ids != PAD).astype(jnp.int32), axis=1, keepdims=True), 1)  # (Nt,1)

    whh_f = whh_f_ref[...]                  # (H, 4H), gate order [i, f, o, g]
    whh_b = whh_b_ref[...]

    def lstm_step(xg_t, h, c, whh, mask):
        # bias already folded into xg_t; gate order [i, f, o, g]
        gates = xg_t + jnp.dot(h.astype(whh.dtype), whh,
                               preferred_element_type=jnp.float32)     # (Nt, 4H)
        sig = jax.nn.sigmoid(gates[:, :3 * H])                         # [i, f, o]
        g = jnp.tanh(gates[:, 3 * H:])
        c_new = sig[:, H:2 * H] * c + sig[:, :H] * g
        h_new = sig[:, 2 * H:3 * H] * jnp.tanh(c_new)
        # pack_padded_sequence semantics: freeze state once t >= word length
        h = jnp.where(mask, h_new, h)
        c = jnp.where(mask, c_new, c)
        return h, c

    def body(s, carry):
        h_f, c_f, h_b, c_b = carry
        # forward direction processes t = s
        h_f, c_f = lstm_step(xg_ref[0, s], h_f, c_f, whh_f, s < lengths)
        # backward direction processes t = W-1-s (starts at t=length-1, ends at 0)
        tb = W - 1 - s
        h_b, c_b = lstm_step(xg_ref[1, tb], h_b, c_b, whh_b, tb < lengths)
        return h_f, c_f, h_b, c_b

    z = jnp.zeros((Nt, H), jnp.float32)
    h_f, _, h_b, _ = jax.lax.fori_loop(0, W, body, (z, z, z, z), unroll=True)

    out_ref[...] = jnp.concatenate([h_f, h_b], axis=-1)


def char_lstm_embeddings(xch, params, *, n_tile=256, mxu_dtype=jnp.float32):
    """xch: (B, T, W) int char ids -> (B, T, lstmsz) float32.

    params are PyTorch-shaped: (table (V,D),
                                w_ih_f (4H,D), w_hh_f (4H,H), b_f (4H,),
                                w_ih_b (4H,D), w_hh_b (4H,H), b_b (4H,))
    with PyTorch gate order [i, f, g, o]; all re-layout is done here.
    """
    table, wih_f, whh_f, b_f, wih_b, whh_b, b_b = params
    B, T, W = xch.shape
    V, D = table.shape
    H = whh_f.shape[1]
    N = B * T

    def reorder(m):  # columns [i, f, g, o] -> [i, f, o, g]
        return jnp.concatenate(
            [m[..., :2 * H], m[..., 3 * H:], m[..., 2 * H:3 * H]], axis=-1)

    # Fused embedding + input projection (+ bias folded in), both directions.
    fused = jnp.concatenate(
        [reorder(table @ wih_f.T + b_f[None, :]),
         reorder(table @ wih_b.T + b_b[None, :])], axis=1).astype(mxu_dtype)  # (V,8H)
    whhT_f = reorder(whh_f.T).astype(mxu_dtype)                               # (H,4H)
    whhT_b = reorder(whh_b.T).astype(mxu_dtype)

    ids = xch.reshape(N, W).astype(jnp.int32)
    # Large tiles fill the MXU and amortize grid overhead; clamp for tiny inputs.
    n_tile = max(8, min(n_tile, pl.cdiv(N, 8) * 8))
    n_pad = pl.cdiv(N, n_tile) * n_tile
    if n_pad != N:
        ids = jnp.pad(ids, ((0, n_pad - N), (0, 0)), constant_values=PAD)

    out = pl.pallas_call(
        char_lstm_kernel,
        out_shape=jax.ShapeDtypeStruct((n_pad, 2 * H), jnp.float32),
        grid_spec=pltpu.PrefetchScalarGridSpec(
            num_scalar_prefetch=0,
            grid=(n_pad // n_tile,),
            in_specs=[
                pl.BlockSpec((n_tile, W), lambda i: (i, 0)),      # char ids
                pl.BlockSpec((V, 8 * H), lambda i: (0, 0)),       # fused x-proj
                pl.BlockSpec((H, 4 * H), lambda i: (0, 0)),       # W_hh fwd
                pl.BlockSpec((H, 4 * H), lambda i: (0, 0)),       # W_hh bwd
            ],
            out_specs=pl.BlockSpec((n_tile, 2 * H), lambda i: (i, 0)),
            scratch_shapes=[
                # per-timestep gate inputs: (direction, t, word, 4H)
                pltpu.VMEM((2, W, n_tile, 4 * H), jnp.float32),
            ],
        ),
        compiler_params=pltpu.CompilerParams(
            dimension_semantics=("parallel",)),
    )(ids, fused, whhT_f, whhT_b)

    return out[:N].reshape(B, T, 2 * H)


def init_params(key, vsz, dsz, lstmsz):
    """Deterministic synthetic params matching the PyTorch module's shapes."""
    H = lstmsz // 2  # pytorch_lstm('blstm') uses hidden = lstmsz // ndir
    ks = jax.random.split(key, 9)
    table = jax.random.normal(ks[0], (vsz, dsz), jnp.float32)
    table = table.at[PAD].set(0.0)            # nn.Embedding padding_idx
    s = 1.0 / math.sqrt(H)

    def u(k, shape):
        return jax.random.uniform(k, shape, jnp.float32, -s, s)

    # PyTorch nn.LSTM params, gate order [i, f, g, o]; b = b_ih + b_hh
    wih_f = u(ks[1], (4 * H, dsz))
    whh_f = u(ks[2], (4 * H, H))
    b_f = u(ks[3], (4 * H,)) + u(ks[4], (4 * H,))
    wih_b = u(ks[5], (4 * H, dsz))
    whh_b = u(ks[6], (4 * H, H))
    b_b = u(ks[7], (4 * H,)) + u(ks[8], (4 * H,))
    return table, wih_f, whh_f, b_f, wih_b, whh_b, b_b


def reference(xch, params):
    """Pure-JAX replica of the PyTorch forward for verification."""
    table, wih_f, whh_f, b_f, wih_b, whh_b, b_b = params
    B, T, W = xch.shape
    H = whh_f.shape[1]
    ids = xch.reshape(-1, W)
    E = table[ids]
    lengths = jnp.maximum(jnp.sum(ids != PAD, axis=1, keepdims=True), 1)

    def run(wih, whh, b, ts):
        h = jnp.zeros((ids.shape[0], H), jnp.float32)
        c = jnp.zeros_like(h)
        for t in ts:
            gates = E[:, t, :] @ wih.T + h @ whh.T + b
            i = jax.nn.sigmoid(gates[:, :H])
            f = jax.nn.sigmoid(gates[:, H:2 * H])
            g = jnp.tanh(gates[:, 2 * H:3 * H])
            o = jax.nn.sigmoid(gates[:, 3 * H:])
            cn = f * c + i * g
            hn = o * jnp.tanh(cn)
            m = t < lengths
            h = jnp.where(m, hn, h)
            c = jnp.where(m, cn, c)
        return h

    h_f = run(wih_f, whh_f, b_f, range(W))
    h_b = run(wih_b, whh_b, b_b, range(W - 1, -1, -1))
    return jnp.concatenate([h_f, h_b], -1).reshape(B, T, 2 * H)


if __name__ == "__main__":
    key = jax.random.PRNGKey(0)
    B, T, W = 2, 8, 8
    vsz, dsz, lstmsz = 32, 16, 32

    k1, k2, k3 = jax.random.split(key, 3)
    params = init_params(k1, vsz, dsz, lstmsz)

    # random char ids with trailing PAD so words have variable lengths
    chars = jax.random.randint(k2, (B, T, W), 1, vsz, dtype=jnp.int32)
    lens = jax.random.randint(k3, (B, T), 0, W + 1, dtype=jnp.int32)
    pos = jnp.arange(W)[None, None, :]
    xch = jnp.where(pos < lens[..., None], chars, PAD)  # includes all-PAD words

    out = jax.block_until_ready(char_lstm_embeddings(xch, params))
    ref = reference(xch, params)

    assert out.shape == (B, T, lstmsz)
    assert jnp.allclose(out, ref, atol=1e-4, rtol=1e-4), \
        float(jnp.max(jnp.abs(out - ref)))
    print("KERNEL_OK")
</pallas_src>

<mosaic_0001>
module attributes {stable_mosaic.version = 11 : i64} {
  func.func @char_lstm_kernel(%arg0: i32, %arg1: memref<16x8xi32, #tpu.memory_space<vmem>>, %arg2: memref<32x128xf32, #tpu.memory_space<vmem>>, %arg3: memref<16x64xf32, #tpu.memory_space<vmem>>, %arg4: memref<16x64xf32, #tpu.memory_space<vmem>>, %arg5: memref<16x32xf32, #tpu.memory_space<vmem>>, %arg6: memref<2x8x16x64xf32, #tpu.memory_space<vmem>>) attributes {dimension_semantics = [#tpu.dimension_semantics<parallel>], iteration_bounds = array<i64: 1>, scalar_prefetch = 0 : i64, scratch_operands = 1 : i64, tpu.core_type = #tpu.core_type<tc>, window_params = [{transform_indices = @transform_0, window_bounds = array<i64: 16, 8>}, {pipeline_mode = #tpu.pipeline_mode<synchronous>, transform_indices = @transform_1, window_bounds = array<i64: 32, 128>}, {pipeline_mode = #tpu.pipeline_mode<synchronous>, transform_indices = @transform_2, window_bounds = array<i64: 16, 64>}, {pipeline_mode = #tpu.pipeline_mode<synchronous>, transform_indices = @transform_3, window_bounds = array<i64: 16, 64>}, {transform_indices = @transform_4, window_bounds = array<i64: 16, 32>}]} {
    %c0 = arith.constant 0 : index
    %c0_0 = arith.constant 0 : index
    %0 = vector.load %arg1[%c0, %c0_0] : memref<16x8xi32, #tpu.memory_space<vmem>>, vector<16x8xi32>
    %c0_1 = arith.constant 0 : index
    %c0_2 = arith.constant 0 : index
    %1 = vector.load %arg2[%c0_1, %c0_2] : memref<32x128xf32, #tpu.memory_space<vmem>>, vector<32x128xf32>
    %2 = vector.extract_strided_slice %0 {offsets = [0, 0], sizes = [16, 1], strides = [1, 1]} : vector<16x8xi32> to vector<16x1xi32>
    %3 = tpu.iota {dimensions = array<i32: 1>} : vector<1x32xi32>
    %4 = vector.broadcast %2 : vector<16x1xi32> to vector<16x32xi32>
    %5 = vector.broadcast %3 : vector<1x32xi32> to vector<16x32xi32>
    %6 = arith.cmpi eq, %4, %5 : vector<16x32xi32>
    %7 = arith.extui %6 : vector<16x32xi1> to vector<16x32xi32>
    %8 = arith.sitofp %7 : vector<16x32xi32> to vector<16x32xf32>
    %cst = arith.constant dense<0.000000e+00> : vector<16x128xf32>
    %9 = tpu.matmul %8, %1, %cst {dimension_numbers = #tpu.dot_dimension_numbers<[1], [0], [0], [1], [0, 0, 1, 1], [], []>} : vector<16x32xf32>, vector<32x128xf32>, vector<16x128xf32> -> vector<16x128xf32>
    %10 = vector.extract_strided_slice %9 {offsets = [0, 0], sizes = [16, 64], strides = [1, 1]} : vector<16x128xf32> to vector<16x64xf32>
    %c0_3 = arith.constant 0 : index
    %c0_4 = arith.constant 0 : index
    %c0_5 = arith.constant 0 : index
    %c0_6 = arith.constant 0 : index
    %11 = vector.load %arg6[%c0_3, %c0_4, %c0_5, %c0_6] : memref<2x8x16x64xf32, #tpu.memory_space<vmem>>, vector<1x1x16x64xf32>
    %12 = vector.shape_cast %11 : vector<1x1x16x64xf32> to vector<16x64xf32>
    %13 = vector.shape_cast %10 : vector<16x64xf32> to vector<1x1x16x64xf32>
    tpu.vector_store %arg6[%c0_3, %c0_4, %c0_5, %c0_6], %13 {strides = array<i32>} : memref<2x8x16x64xf32, #tpu.memory_space<vmem>>, vector<1x1x16x64xf32>,
    %14 = vector.extract_strided_slice %9 {offsets = [0, 64], sizes = [16, 64], strides = [1, 1]} : vector<16x128xf32> to vector<16x64xf32>
    %c1 = arith.constant 1 : index
    %c0_7 = arith.constant 0 : index
    %c0_8 = arith.constant 0 : index
    %c0_9 = arith.constant 0 : index
    %15 = vector.load %arg6[%c1, %c0_7, %c0_8, %c0_9] : memref<2x8x16x64xf32, #tpu.memory_space<vmem>>, vector<1x1x16x64xf32>
    %16 = vector.shape_cast %15 : vector<1x1x16x64xf32> to vector<16x64xf32>
    %17 = vector.shape_cast %14 : vector<16x64xf32> to vector<1x1x16x64xf32>
    tpu.vector_store %arg6[%c1, %c0_7, %c0_8, %c0_9], %17 {strides = array<i32>} : memref<2x8x16x64xf32, #tpu.memory_space<vmem>>, vector<1x1x16x64xf32>,
    %18 = vector.extract_strided_slice %0 {offsets = [0, 1], sizes = [16, 1], strides = [1, 1]} : vector<16x8xi32> to vector<16x1xi32>
    %19 = tpu.iota {dimensions = array<i32: 1>} : vector<1x32xi32>
    %20 = vector.broadcast %18 : vector<16x1xi32> to vector<16x32xi32>
    %21 = vector.broadcast %19 : vector<1x32xi32> to vector<16x32xi32>
    %22 = arith.cmpi eq, %20, %21 : vector<16x32xi32>
    %23 = arith.extui %22 : vector<16x32xi1> to vector<16x32xi32>
    %24 = arith.sitofp %23 : vector<16x32xi32> to vector<16x32xf32>
    %cst_10 = arith.constant dense<0.000000e+00> : vector<16x128xf32>
    %25 = tpu.matmul %24, %1, %cst_10 {dimension_numbers = #tpu.dot_dimension_numbers<[1], [0], [0], [1], [0, 0, 1, 1], [], []>} : vector<16x32xf32>, vector<32x128xf32>, vector<16x128xf32> -> vector<16x128xf32>
    %26 = vector.extract_strided_slice %25 {offsets = [0, 0], sizes = [16, 64], strides = [1, 1]} : vector<16x128xf32> to vector<16x64xf32>
    %c0_11 = arith.constant 0 : index
    %c1_12 = arith.constant 1 : index
    %c0_13 = arith.constant 0 : index
    %c0_14 = arith.constant 0 : index
    %27 = vector.load %arg6[%c0_11, %c1_12, %c0_13, %c0_14] : memref<2x8x16x64xf32, #tpu.memory_space<vmem>>, vector<1x1x16x64xf32>
    %28 = vector.shape_cast %27 : vector<1x1x16x64xf32> to vector<16x64xf32>
    %29 = vector.shape_cast %26 : vector<16x64xf32> to vector<1x1x16x64xf32>
    tpu.vector_store %arg6[%c0_11, %c1_12, %c0_13, %c0_14], %29 {strides = array<i32>} : memref<2x8x16x64xf32, #tpu.memory_space<vmem>>, vector<1x1x16x64xf32>,
    %30 = vector.extract_strided_slice %25 {offsets = [0, 64], sizes = [16, 64], strides = [1, 1]} : vector<16x128xf32> to vector<16x64xf32>
    %c1_15 = arith.constant 1 : index
    %c1_16 = arith.constant 1 : index
    %c0_17 = arith.constant 0 : index
    %c0_18 = arith.constant 0 : index
    %31 = vector.load %arg6[%c1_15, %c1_16, %c0_17, %c0_18] : memref<2x8x16x64xf32, #tpu.memory_space<vmem>>, vector<1x1x16x64xf32>
    %32 = vector.shape_cast %31 : vector<1x1x16x64xf32> to vector<16x64xf32>
    %33 = vector.shape_cast %30 : vector<16x64xf32> to vector<1x1x16x64xf32>
    tpu.vector_store %arg6[%c1_15, %c1_16, %c0_17, %c0_18], %33 {strides = array<i32>} : memref<2x8x16x64xf32, #tpu.memory_space<vmem>>, vector<1x1x16x64xf32>,
    %34 = vector.extract_strided_slice %0 {offsets = [0, 2], sizes = [16, 1], strides = [1, 1]} : vector<16x8xi32> to vector<16x1xi32>
    %35 = tpu.iota {dimensions = array<i32: 1>} : vector<1x32xi32>
    %36 = vector.broadcast %34 : vector<16x1xi32> to vector<16x32xi32>
    %37 = vector.broadcast %35 : vector<1x32xi32> to vector<16x32xi32>
    %38 = arith.cmpi eq, %36, %37 : vector<16x32xi32>
    %39 = arith.extui %38 : vector<16x32xi1> to vector<16x32xi32>
    %40 = arith.sitofp %39 : vector<16x32xi32> to vector<16x32xf32>
    %cst_19 = arith.constant dense<0.000000e+00> : vector<16x128xf32>
    %41 = tpu.matmul %40, %1, %cst_19 {dimension_numbers = #tpu.dot_dimension_numbers<[1], [0], [0], [1], [0, 0, 1, 1], [], []>} : vector<16x32xf32>, vector<32x128xf32>, vector<16x128xf32> -> vector<16x128xf32>
    %42 = vector.extract_strided_slice %41 {offsets = [0, 0], sizes = [16, 64], strides = [1, 1]} : vector<16x128xf32> to vector<16x64xf32>
    %c0_20 = arith.constant 0 : index
    %c2 = arith.constant 2 : index
    %c0_21 = arith.constant 0 : index
    %c0_22 = arith.constant 0 : index
    %43 = vector.load %arg6[%c0_20, %c2, %c0_21, %c0_22] : memref<2x8x16x64xf32, #tpu.memory_space<vmem>>, vector<1x1x16x64xf32>
    %44 = vector.shape_cast %43 : vector<1x1x16x64xf32> to vector<16x64xf32>
    %45 = vector.shape_cast %42 : vector<16x64xf32> to vector<1x1x16x64xf32>
    tpu.vector_store %arg6[%c0_20, %c2, %c0_21, %c0_22], %45 {strides = array<i32>} : memref<2x8x16x64xf32, #tpu.memory_space<vmem>>, vector<1x1x16x64xf32>,
    %46 = vector.extract_strided_slice %41 {offsets = [0, 64], sizes = [16, 64], strides = [1, 1]} : vector<16x128xf32> to vector<16x64xf32>
    %c1_23 = arith.constant 1 : index
    %c2_24 = arith.constant 2 : index
    %c0_25 = arith.constant 0 : index
    %c0_26 = arith.constant 0 : index
    %47 = vector.load %arg6[%c1_23, %c2_24, %c0_25, %c0_26] : memref<2x8x16x64xf32, #tpu.memory_space<vmem>>, vector<1x1x16x64xf32>
    %48 = vector.shape_cast %47 : vector<1x1x16x64xf32> to vector<16x64xf32>
    %49 = vector.shape_cast %46 : vector<16x64xf32> to vector<1x1x16x64xf32>
    tpu.vector_store %arg6[%c1_23, %c2_24, %c0_25, %c0_26], %49 {strides = array<i32>} : memref<2x8x16x64xf32, #tpu.memory_space<vmem>>, vector<1x1x16x64xf32>,
    %50 = vector.extract_strided_slice %0 {offsets = [0, 3], sizes = [16, 1], strides = [1, 1]} : vector<16x8xi32> to vector<16x1xi32>
    %51 = tpu.iota {dimensions = array<i32: 1>} : vector<1x32xi32>
    %52 = vector.broadcast %50 : vector<16x1xi32> to vector<16x32xi32>
    %53 = vector.broadcast %51 : vector<1x32xi32> to vector<16x32xi32>
    %54 = arith.cmpi eq, %52, %53 : vector<16x32xi32>
    %55 = arith.extui %54 : vector<16x32xi1> to vector<16x32xi32>
    %56 = arith.sitofp %55 : vector<16x32xi32> to vector<16x32xf32>
    %cst_27 = arith.constant dense<0.000000e+00> : vector<16x128xf32>
    %57 = tpu.matmul %56, %1, %cst_27 {dimension_numbers = #tpu.dot_dimension_numbers<[1], [0], [0], [1], [0, 0, 1, 1], [], []>} : vector<16x32xf32>, vector<32x128xf32>, vector<16x128xf32> -> vector<16x128xf32>
    %58 = vector.extract_strided_slice %57 {offsets = [0, 0], sizes = [16, 64], strides = [1, 1]} : vector<16x128xf32> to vector<16x64xf32>
    %c0_28 = arith.constant 0 : index
    %c3 = arith.constant 3 : index
    %c0_29 = arith.constant 0 : index
    %c0_30 = arith.constant 0 : index
    %59 = vector.load %arg6[%c0_28, %c3, %c0_29, %c0_30] : memref<2x8x16x64xf32, #tpu.memory_space<vmem>>, vector<1x1x16x64xf32>
    %60 = vector.shape_cast %59 : vector<1x1x16x64xf32> to vector<16x64xf32>
    %61 = vector.shape_cast %58 : vector<16x64xf32> to vector<1x1x16x64xf32>
    tpu.vector_store %arg6[%c0_28, %c3, %c0_29, %c0_30], %61 {strides = array<i32>} : memref<2x8x16x64xf32, #tpu.memory_space<vmem>>, vector<1x1x16x64xf32>,
    %62 = vector.extract_strided_slice %57 {offsets = [0, 64], sizes = [16, 64], strides = [1, 1]} : vector<16x128xf32> to vector<16x64xf32>
    %c1_31 = arith.constant 1 : index
    %c3_32 = arith.constant 3 : index
    %c0_33 = arith.constant 0 : index
    %c0_34 = arith.constant 0 : index
    %63 = vector.load %arg6[%c1_31, %c3_32, %c0_33, %c0_34] : memref<2x8x16x64xf32, #tpu.memory_space<vmem>>, vector<1x1x16x64xf32>
    %64 = vector.shape_cast %63 : vector<1x1x16x64xf32> to vector<16x64xf32>
    %65 = vector.shape_cast %62 : vector<16x64xf32> to vector<1x1x16x64xf32>
    tpu.vector_store %arg6[%c1_31, %c3_32, %c0_33, %c0_34], %65 {strides = array<i32>} : memref<2x8x16x64xf32, #tpu.memory_space<vmem>>, vector<1x1x16x64xf32>,
    %66 = vector.extract_strided_slice %0 {offsets = [0, 4], sizes = [16, 1], strides = [1, 1]} : vector<16x8xi32> to vector<16x1xi32>
    %67 = tpu.iota {dimensions = array<i32: 1>} : vector<1x32xi32>
    %68 = vector.broadcast %66 : vector<16x1xi32> to vector<16x32xi32>
    %69 = vector.broadcast %67 : vector<1x32xi32> to vector<16x32xi32>
    %70 = arith.cmpi eq, %68, %69 : vector<16x32xi32>
    %71 = arith.extui %70 : vector<16x32xi1> to vector<16x32xi32>
    %72 = arith.sitofp %71 : vector<16x32xi32> to vector<16x32xf32>
    %cst_35 = arith.constant dense<0.000000e+00> : vector<16x128xf32>
    %73 = tpu.matmul %72, %1, %cst_35 {dimension_numbers = #tpu.dot_dimension_numbers<[1], [0], [0], [1], [0, 0, 1, 1], [], []>} : vector<16x32xf32>, vector<32x128xf32>, vector<16x128xf32> -> vector<16x128xf32>
    %74 = vector.extract_strided_slice %73 {offsets = [0, 0], sizes = [16, 64], strides = [1, 1]} : vector<16x128xf32> to vector<16x64xf32>
    %c0_36 = arith.constant 0 : index
    %c4 = arith.constant 4 : index
    %c0_37 = arith.constant 0 : index
    %c0_38 = arith.constant 0 : index
    %75 = vector.load %arg6[%c0_36, %c4, %c0_37, %c0_38] : memref<2x8x16x64xf32, #tpu.memory_space<vmem>>, vector<1x1x16x64xf32>
    %76 = vector.shape_cast %75 : vector<1x1x16x64xf32> to vector<16x64xf32>
    %77 = vector.shape_cast %74 : vector<16x64xf32> to vector<1x1x16x64xf32>
    tpu.vector_store %arg6[%c0_36, %c4, %c0_37, %c0_38], %77 {strides = array<i32>} : memref<2x8x16x64xf32, #tpu.memory_space<vmem>>, vector<1x1x16x64xf32>,
    %78 = vector.extract_strided_slice %73 {offsets = [0, 64], sizes = [16, 64], strides = [1, 1]} : vector<16x128xf32> to vector<16x64xf32>
    %c1_39 = arith.constant 1 : index
    %c4_40 = arith.constant 4 : index
    %c0_41 = arith.constant 0 : index
    %c0_42 = arith.constant 0 : index
    %79 = vector.load %arg6[%c1_39, %c4_40, %c0_41, %c0_42] : memref<2x8x16x64xf32, #tpu.memory_space<vmem>>, vector<1x1x16x64xf32>
    %80 = vector.shape_cast %79 : vector<1x1x16x64xf32> to vector<16x64xf32>
    %81 = vector.shape_cast %78 : vector<16x64xf32> to vector<1x1x16x64xf32>
    tpu.vector_store %arg6[%c1_39, %c4_40, %c0_41, %c0_42], %81 {strides = array<i32>} : memref<2x8x16x64xf32, #tpu.memory_space<vmem>>, vector<1x1x16x64xf32>,
    %82 = vector.extract_strided_slice %0 {offsets = [0, 5], sizes = [16, 1], strides = [1, 1]} : vector<16x8xi32> to vector<16x1xi32>
    %83 = tpu.iota {dimensions = array<i32: 1>} : vector<1x32xi32>
    %84 = vector.broadcast %82 : vector<16x1xi32> to vector<16x32xi32>
    %85 = vector.broadcast %83 : vector<1x32xi32> to vector<16x32xi32>
    %86 = arith.cmpi eq, %84, %85 : vector<16x32xi32>
    %87 = arith.extui %86 : vector<16x32xi1> to vector<16x32xi32>
    %88 = arith.sitofp %87 : vector<16x32xi32> to vector<16x32xf32>
    %cst_43 = arith.constant dense<0.000000e+00> : vector<16x128xf32>
    %89 = tpu.matmul %88, %1, %cst_43 {dimension_numbers = #tpu.dot_dimension_numbers<[1], [0], [0], [1], [0, 0, 1, 1], [], []>} : vector<16x32xf32>, vector<32x128xf32>, vector<16x128xf32> -> vector<16x128xf32>
    %90 = vector.extract_strided_slice %89 {offsets = [0, 0], sizes = [16, 64], strides = [1, 1]} : vector<16x128xf32> to vector<16x64xf32>
    %c0_44 = arith.constant 0 : index
    %c5 = arith.constant 5 : index
    %c0_45 = arith.constant 0 : index
    %c0_46 = arith.constant 0 : index
    %91 = vector.load %arg6[%c0_44, %c5, %c0_45, %c0_46] : memref<2x8x16x64xf32, #tpu.memory_space<vmem>>, vector<1x1x16x64xf32>
    %92 = vector.shape_cast %91 : vector<1x1x16x64xf32> to vector<16x64xf32>
    %93 = vector.shape_cast %90 : vector<16x64xf32> to vector<1x1x16x64xf32>
    tpu.vector_store %arg6[%c0_44, %c5, %c0_45, %c0_46], %93 {strides = array<i32>} : memref<2x8x16x64xf32, #tpu.memory_space<vmem>>, vector<1x1x16x64xf32>,
    %94 = vector.extract_strided_slice %89 {offsets = [0, 64], sizes = [16, 64], strides = [1, 1]} : vector<16x128xf32> to vector<16x64xf32>
    %c1_47 = arith.constant 1 : index
    %c5_48 = arith.constant 5 : index
    %c0_49 = arith.constant 0 : index
    %c0_50 = arith.constant 0 : index
    %95 = vector.load %arg6[%c1_47, %c5_48, %c0_49, %c0_50] : memref<2x8x16x64xf32, #tpu.memory_space<vmem>>, vector<1x1x16x64xf32>
    %96 = vector.shape_cast %95 : vector<1x1x16x64xf32> to vector<16x64xf32>
    %97 = vector.shape_cast %94 : vector<16x64xf32> to vector<1x1x16x64xf32>
    tpu.vector_store %arg6[%c1_47, %c5_48, %c0_49, %c0_50], %97 {strides = array<i32>} : memref<2x8x16x64xf32, #tpu.memory_space<vmem>>, vector<1x1x16x64xf32>,
    %98 = vector.extract_strided_slice %0 {offsets = [0, 6], sizes = [16, 1], strides = [1, 1]} : vector<16x8xi32> to vector<16x1xi32>
    %99 = tpu.iota {dimensions = array<i32: 1>} : vector<1x32xi32>
    %100 = vector.broadcast %98 : vector<16x1xi32> to vector<16x32xi32>
    %101 = vector.broadcast %99 : vector<1x32xi32> to vector<16x32xi32>
    %102 = arith.cmpi eq, %100, %101 : vector<16x32xi32>
    %103 = arith.extui %102 : vector<16x32xi1> to vector<16x32xi32>
    %104 = arith.sitofp %103 : vector<16x32xi32> to vector<16x32xf32>
    %cst_51 = arith.constant dense<0.000000e+00> : vector<16x128xf32>
    %105 = tpu.matmul %104, %1, %cst_51 {dimension_numbers = #tpu.dot_dimension_numbers<[1], [0], [0], [1], [0, 0, 1, 1], [], []>} : vector<16x32xf32>, vector<32x128xf32>, vector<16x128xf32> -> vector<16x128xf32>
    %106 = vector.extract_strided_slice %105 {offsets = [0, 0], sizes = [16, 64], strides = [1, 1]} : vector<16x128xf32> to vector<16x64xf32>
    %c0_52 = arith.constant 0 : index
    %c6 = arith.constant 6 : index
    %c0_53 = arith.constant 0 : index
    %c0_54 = arith.constant 0 : index
    %107 = vector.load %arg6[%c0_52, %c6, %c0_53, %c0_54] : memref<2x8x16x64xf32, #tpu.memory_space<vmem>>, vector<1x1x16x64xf32>
    %108 = vector.shape_cast %107 : vector<1x1x16x64xf32> to vector<16x64xf32>
    %109 = vector.shape_cast %106 : vector<16x64xf32> to vector<1x1x16x64xf32>
    tpu.vector_store %arg6[%c0_52, %c6, %c0_53, %c0_54], %109 {strides = array<i32>} : memref<2x8x16x64xf32, #tpu.memory_space<vmem>>, vector<1x1x16x64xf32>,
    %110 = vector.extract_strided_slice %105 {offsets = [0, 64], sizes = [16, 64], strides = [1, 1]} : vector<16x128xf32> to vector<16x64xf32>
    %c1_55 = arith.constant 1 : index
    %c6_56 = arith.constant 6 : index
    %c0_57 = arith.constant 0 : index
    %c0_58 = arith.constant 0 : index
    %111 = vector.load %arg6[%c1_55, %c6_56, %c0_57, %c0_58] : memref<2x8x16x64xf32, #tpu.memory_space<vmem>>, vector<1x1x16x64xf32>
    %112 = vector.shape_cast %111 : vector<1x1x16x64xf32> to vector<16x64xf32>
    %113 = vector.shape_cast %110 : vector<16x64xf32> to vector<1x1x16x64xf32>
    tpu.vector_store %arg6[%c1_55, %c6_56, %c0_57, %c0_58], %113 {strides = array<i32>} : memref<2x8x16x64xf32, #tpu.memory_space<vmem>>, vector<1x1x16x64xf32>,
    %114 = vector.extract_strided_slice %0 {offsets = [0, 7], sizes = [16, 1], strides = [1, 1]} : vector<16x8xi32> to vector<16x1xi32>
    %115 = tpu.iota {dimensions = array<i32: 1>} : vector<1x32xi32>
    %116 = vector.broadcast %114 : vector<16x1xi32> to vector<16x32xi32>
    %117 = vector.broadcast %115 : vector<1x32xi32> to vector<16x32xi32>
    %118 = arith.cmpi eq, %116, %117 : vector<16x32xi32>
    %119 = arith.extui %118 : vector<16x32xi1> to vector<16x32xi32>
    %120 = arith.sitofp %119 : vector<16x32xi32> to vector<16x32xf32>
    %cst_59 = arith.constant dense<0.000000e+00> : vector<16x128xf32>
    %121 = tpu.matmul %120, %1, %cst_59 {dimension_numbers = #tpu.dot_dimension_numbers<[1], [0], [0], [1], [0, 0, 1, 1], [], []>} : vector<16x32xf32>, vector<32x128xf32>, vector<16x128xf32> -> vector<16x128xf32>
    %122 = vector.extract_strided_slice %121 {offsets = [0, 0], sizes = [16, 64], strides = [1, 1]} : vector<16x128xf32> to vector<16x64xf32>
    %c0_60 = arith.constant 0 : index
    %c7 = arith.constant 7 : index
    %c0_61 = arith.constant 0 : index
    %c0_62 = arith.constant 0 : index
    %123 = vector.load %arg6[%c0_60, %c7, %c0_61, %c0_62] : memref<2x8x16x64xf32, #tpu.memory_space<vmem>>, vector<1x1x16x64xf32>
    %124 = vector.shape_cast %123 : vector<1x1x16x64xf32> to vector<16x64xf32>
    %125 = vector.shape_cast %122 : vector<16x64xf32> to vector<1x1x16x64xf32>
    tpu.vector_store %arg6[%c0_60, %c7, %c0_61, %c0_62], %125 {strides = array<i32>} : memref<2x8x16x64xf32, #tpu.memory_space<vmem>>, vector<1x1x16x64xf32>,
    %126 = vector.extract_strided_slice %121 {offsets = [0, 64], sizes = [16, 64], strides = [1, 1]} : vector<16x128xf32> to vector<16x64xf32>
    %c1_63 = arith.constant 1 : index
    %c7_64 = arith.constant 7 : index
    %c0_65 = arith.constant 0 : index
    %c0_66 = arith.constant 0 : index
    %127 = vector.load %arg6[%c1_63, %c7_64, %c0_65, %c0_66] : memref<2x8x16x64xf32, #tpu.memory_space<vmem>>, vector<1x1x16x64xf32>
    %128 = vector.shape_cast %127 : vector<1x1x16x64xf32> to vector<16x64xf32>
    %129 = vector.shape_cast %126 : vector<16x64xf32> to vector<1x1x16x64xf32>
    tpu.vector_store %arg6[%c1_63, %c7_64, %c0_65, %c0_66], %129 {strides = array<i32>} : memref<2x8x16x64xf32, #tpu.memory_space<vmem>>, vector<1x1x16x64xf32>,
    %c0_i32 = arith.constant 0 : i32
    %130 = vector.broadcast %c0_i32 : i32 to vector<16x8xi32>
    %131 = arith.cmpi ne, %0, %130 : vector<16x8xi32>
    %132 = arith.extui %131 : vector<16x8xi1> to vector<16x8xi32>
    %cst_67 = arith.constant dense<0> : vector<16xi32>
    %133 = vector.multi_reduction <add>, %132, %cst_67 [1] : vector<16x8xi32> to vector<16xi32>
    %134 = vector.shape_cast %133 : vector<16xi32> to vector<16x1xi32>
    %c1_i32 = arith.constant 1 : i32
    %135 = vector.broadcast %c1_i32 : i32 to vector<16x1xi32>
    %136 = arith.maxsi %134, %135 : vector<16x1xi32>
    %c0_68 = arith.constant 0 : index
    %c0_69 = arith.constant 0 : index
    %137 = vector.load %arg3[%c0_68, %c0_69] : memref<16x64xf32, #tpu.memory_space<vmem>>, vector<16x64xf32>
    %c0_70 = arith.constant 0 : index
    %c0_71 = arith.constant 0 : index
    %138 = vector.load %arg4[%c0_70, %c0_71] : memref<16x64xf32, #tpu.memory_space<vmem>>, vector<16x64xf32>
    %cst_72 = arith.constant 0.000000e+00 : f32
    %139 = vector.broadcast %cst_72 : f32 to vector<16x16xf32>
    %c0_i32_73 = arith.constant 0 : i32
    %c0_74 = arith.constant 0 : index
    %140 = arith.index_cast %c0_i32_73 : i32 to index
    %c0_75 = arith.constant 0 : index
    %c0_76 = arith.constant 0 : index
    %141 = vector.load %arg6[%c0_74, %140, %c0_75, %c0_76] : memref<2x8x16x64xf32, #tpu.memory_space<vmem>>, vector<1x1x16x64xf32>
    %142 = vector.shape_cast %141 : vector<1x1x16x64xf32> to vector<16x64xf32>
    %143 = vector.broadcast %c0_i32_73 : i32 to vector<16x1xi32>
    %144 = arith.cmpi slt, %143, %136 : vector<16x1xi32>
    %cst_77 = arith.constant dense<0.000000e+00> : vector<16x64xf32>
    %145 = tpu.matmul %139, %137, %cst_77 {dimension_numbers = #tpu.dot_dimension_numbers<[1], [0], [0], [1], [0, 0, 1, 1], [], []>} : vector<16x16xf32>, vector<16x64xf32>, vector<16x64xf32> -> vector<16x64xf32>
    %146 = arith.addf %142, %145 : vector<16x64xf32>
    %147 = vector.extract_strided_slice %146 {offsets = [0, 0], sizes = [16, 48], strides = [1, 1]} : vector<16x64xf32> to vector<16x48xf32>
    %148 = arith.negf %147 : vector<16x48xf32>
    %149 = math.exp %148 : vector<16x48xf32>
    %cst_78 = arith.constant 1.000000e+00 : f32
    %150 = vector.broadcast %cst_78 : f32 to vector<16x48xf32>
    %151 = arith.addf %150, %149 : vector<16x48xf32>
    %152 = arith.divf %150, %151 : vector<16x48xf32>
    %153 = vector.extract_strided_slice %146 {offsets = [0, 48], sizes = [16, 16], strides = [1, 1]} : vector<16x64xf32> to vector<16x16xf32>
    %154 = math.tanh %153 : vector<16x16xf32>
    %155 = vector.extract_strided_slice %152 {offsets = [0, 16], sizes = [16, 16], strides = [1, 1]} : vector<16x48xf32> to vector<16x16xf32>
    %156 = arith.mulf %155, %139 : vector<16x16xf32>
    %157 = vector.extract_strided_slice %152 {offsets = [0, 0], sizes = [16, 16], strides = [1, 1]} : vector<16x48xf32> to vector<16x16xf32>
    %158 = arith.mulf %157, %154 : vector<16x16xf32>
    %159 = arith.addf %156, %158 : vector<16x16xf32>
    %160 = vector.extract_strided_slice %152 {offsets = [0, 32], sizes = [16, 16], strides = [1, 1]} : vector<16x48xf32> to vector<16x16xf32>
    %161 = math.tanh %159 : vector<16x16xf32>
    %162 = arith.mulf %160, %161 : vector<16x16xf32>
    %163 = vector.shape_cast %144 : vector<16x1xi1> to vector<16x1xi1>
    %164 = vector.broadcast %163 : vector<16x1xi1> to vector<16x16xi1>
    %165 = arith.select %164, %162, %139 : vector<16x16xi1>, vector<16x16xf32>
    %166 = vector.shape_cast %144 : vector<16x1xi1> to vector<16x1xi1>
    %167 = vector.broadcast %166 : vector<16x1xi1> to vector<16x16xi1>
    %168 = arith.select %167, %159, %139 : vector<16x16xi1>, vector<16x16xf32>
    %c7_i32 = arith.constant 7 : i32
    %169 = arith.subi %c7_i32, %c0_i32_73 : i32
    %c1_79 = arith.constant 1 : index
    %170 = arith.index_cast %169 : i32 to index
    %c0_80 = arith.constant 0 : index
    %c0_81 = arith.constant 0 : index
    %171 = vector.load %arg6[%c1_79, %170, %c0_80, %c0_81] : memref<2x8x16x64xf32, #tpu.memory_space<vmem>>, vector<1x1x16x64xf32>
    %172 = vector.shape_cast %171 : vector<1x1x16x64xf32> to vector<16x64xf32>
    %173 = vector.broadcast %169 : i32 to vector<16x1xi32>
    %174 = arith.cmpi slt, %173, %136 : vector<16x1xi32>
    %cst_82 = arith.constant dense<0.000000e+00> : vector<16x64xf32>
    %175 = tpu.matmul %139, %138, %cst_82 {dimension_numbers = #tpu.dot_dimension_numbers<[1], [0], [0], [1], [0, 0, 1, 1], [], []>} : vector<16x16xf32>, vector<16x64xf32>, vector<16x64xf32> -> vector<16x64xf32>
    %176 = arith.addf %172, %175 : vector<16x64xf32>
    %177 = vector.extract_strided_slice %176 {offsets = [0, 0], sizes = [16, 48], strides = [1, 1]} : vector<16x64xf32> to vector<16x48xf32>
    %178 = arith.negf %177 : vector<16x48xf32>
    %179 = math.exp %178 : vector<16x48xf32>
    %cst_83 = arith.constant 1.000000e+00 : f32
    %180 = vector.broadcast %cst_83 : f32 to vector<16x48xf32>
    %181 = arith.addf %180, %179 : vector<16x48xf32>
    %182 = arith.divf %180, %181 : vector<16x48xf32>
    %183 = vector.extract_strided_slice %176 {offsets = [0, 48], sizes = [16, 16], strides = [1, 1]} : vector<16x64xf32> to vector<16x16xf32>
    %184 = math.tanh %183 : vector<16x16xf32>
    %185 = vector.extract_strided_slice %182 {offsets = [0, 16], sizes = [16, 16], strides = [1, 1]} : vector<16x48xf32> to vector<16x16xf32>
    %186 = arith.mulf %185, %139 : vector<16x16xf32>
    %187 = vector.extract_strided_slice %182 {offsets = [0, 0], sizes = [16, 16], strides = [1, 1]} : vector<16x48xf32> to vector<16x16xf32>
    %188 = arith.mulf %187, %184 : vector<16x16xf32>
    %189 = arith.addf %186, %188 : vector<16x16xf32>
    %190 = vector.extract_strided_slice %182 {offsets = [0, 32], sizes = [16, 16], strides = [1, 1]} : vector<16x48xf32> to vector<16x16xf32>
    %191 = math.tanh %189 : vector<16x16xf32>
    %192 = arith.mulf %190, %191 : vector<16x16xf32>
    %193 = vector.shape_cast %174 : vector<16x1xi1> to vector<16x1xi1>
    %194 = vector.broadcast %193 : vector<16x1xi1> to vector<16x16xi1>
    %195 = arith.select %194, %192, %139 : vector<16x16xi1>, vector<16x16xf32>
    %196 = vector.shape_cast %174 : vector<16x1xi1> to vector<16x1xi1>
    %197 = vector.broadcast %196 : vector<16x1xi1> to vector<16x16xi1>
    %198 = arith.select %197, %189, %139 : vector<16x16xi1>, vector<16x16xf32>
    %c1_i32_84 = arith.constant 1 : i32
    %c0_85 = arith.constant 0 : index
    %199 = arith.index_cast %c1_i32_84 : i32 to index
    %c0_86 = arith.constant 0 : index
    %c0_87 = arith.constant 0 : index
    %200 = vector.load %arg6[%c0_85, %199, %c0_86, %c0_87] : memref<2x8x16x64xf32, #tpu.memory_space<vmem>>, vector<1x1x16x64xf32>
    %201 = vector.shape_cast %200 : vector<1x1x16x64xf32> to vector<16x64xf32>
    %202 = vector.broadcast %c1_i32_84 : i32 to vector<16x1xi32>
    %203 = arith.cmpi slt, %202, %136 : vector<16x1xi32>
    %cst_88 = arith.constant dense<0.000000e+00> : vector<16x64xf32>
    %204 = tpu.matmul %165, %137, %cst_88 {dimension_numbers = #tpu.dot_dimension_numbers<[1], [0], [0], [1], [0, 0, 1, 1], [], []>} : vector<16x16xf32>, vector<16x64xf32>, vector<16x64xf32> -> vector<16x64xf32>
    %205 = arith.addf %201, %204 : vector<16x64xf32>
    %206 = vector.extract_strided_slice %205 {offsets = [0, 0], sizes = [16, 48], strides = [1, 1]} : vector<16x64xf32> to vector<16x48xf32>
    %207 = arith.negf %206 : vector<16x48xf32>
    %208 = math.exp %207 : vector<16x48xf32>
    %cst_89 = arith.constant 1.000000e+00 : f32
    %209 = vector.broadcast %cst_89 : f32 to vector<16x48xf32>
    %210 = arith.addf %209, %208 : vector<16x48xf32>
    %211 = arith.divf %209, %210 : vector<16x48xf32>
    %212 = vector.extract_strided_slice %205 {offsets = [0, 48], sizes = [16, 16], strides = [1, 1]} : vector<16x64xf32> to vector<16x16xf32>
    %213 = math.tanh %212 : vector<16x16xf32>
    %214 = vector.extract_strided_slice %211 {offsets = [0, 16], sizes = [16, 16], strides = [1, 1]} : vector<16x48xf32> to vector<16x16xf32>
    %215 = arith.mulf %214, %168 : vector<16x16xf32>
    %216 = vector.extract_strided_slice %211 {offsets = [0, 0], sizes = [16, 16], strides = [1, 1]} : vector<16x48xf32> to vector<16x16xf32>
    %217 = arith.mulf %216, %213 : vector<16x16xf32>
    %218 = arith.addf %215, %217 : vector<16x16xf32>
    %219 = vector.extract_strided_slice %211 {offsets = [0, 32], sizes = [16, 16], strides = [1, 1]} : vector<16x48xf32> to vector<16x16xf32>
    %220 = math.tanh %218 : vector<16x16xf32>
    %221 = arith.mulf %219, %220 : vector<16x16xf32>
    %222 = vector.shape_cast %203 : vector<16x1xi1> to vector<16x1xi1>
    %223 = vector.broadcast %222 : vector<16x1xi1> to vector<16x16xi1>
    %224 = arith.select %223, %221, %165 : vector<16x16xi1>, vector<16x16xf32>
    %225 = vector.shape_cast %203 : vector<16x1xi1> to vector<16x1xi1>
    %226 = vector.broadcast %225 : vector<16x1xi1> to vector<16x16xi1>
    %227 = arith.select %226, %218, %168 : vector<16x16xi1>, vector<16x16xf32>
    %c7_i32_90 = arith.constant 7 : i32
    %228 = arith.subi %c7_i32_90, %c1_i32_84 : i32
    %c1_91 = arith.constant 1 : index
    %229 = arith.index_cast %228 : i32 to index
    %c0_92 = arith.constant 0 : index
    %c0_93 = arith.constant 0 : index
    %230 = vector.load %arg6[%c1_91, %229, %c0_92, %c0_93] : memref<2x8x16x64xf32, #tpu.memory_space<vmem>>, vector<1x1x16x64xf32>
    %231 = vector.shape_cast %230 : vector<1x1x16x64xf32> to vector<16x64xf32>
    %232 = vector.broadcast %228 : i32 to vector<16x1xi32>
    %233 = arith.cmpi slt, %232, %136 : vector<16x1xi32>
    %cst_94 = arith.constant dense<0.000000e+00> : vector<16x64xf32>
    %234 = tpu.matmul %195, %138, %cst_94 {dimension_numbers = #tpu.dot_dimension_numbers<[1], [0], [0], [1], [0, 0, 1, 1], [], []>} : vector<16x16xf32>, vector<16x64xf32>, vector<16x64xf32> -> vector<16x64xf32>
    %235 = arith.addf %231, %234 : vector<16x64xf32>
    %236 = vector.extract_strided_slice %235 {offsets = [0, 0], sizes = [16, 48], strides = [1, 1]} : vector<16x64xf32> to vector<16x48xf32>
    %237 = arith.negf %236 : vector<16x48xf32>
    %238 = math.exp %237 : vector<16x48xf32>
    %cst_95 = arith.constant 1.000000e+00 : f32
    %239 = vector.broadcast %cst_95 : f32 to vector<16x48xf32>
    %240 = arith.addf %239, %238 : vector<16x48xf32>
    %241 = arith.divf %239, %240 : vector<16x48xf32>
    %242 = vector.extract_strided_slice %235 {offsets = [0, 48], sizes = [16, 16], strides = [1, 1]} : vector<16x64xf32> to vector<16x16xf32>
    %243 = math.tanh %242 : vector<16x16xf32>
    %244 = vector.extract_strided_slice %241 {offsets = [0, 16], sizes = [16, 16], strides = [1, 1]} : vector<16x48xf32> to vector<16x16xf32>
    %245 = arith.mulf %244, %198 : vector<16x16xf32>
    %246 = vector.extract_strided_slice %241 {offsets = [0, 0], sizes = [16, 16], strides = [1, 1]} : vector<16x48xf32> to vector<16x16xf32>
    %247 = arith.mulf %246, %243 : vector<16x16xf32>
    %248 = arith.addf %245, %247 : vector<16x16xf32>
    %249 = vector.extract_strided_slice %241 {offsets = [0, 32], sizes = [16, 16], strides = [1, 1]} : vector<16x48xf32> to vector<16x16xf32>
    %250 = math.tanh %248 : vector<16x16xf32>
    %251 = arith.mulf %249, %250 : vector<16x16xf32>
    %252 = vector.shape_cast %233 : vector<16x1xi1> to vector<16x1xi1>
    %253 = vector.broadcast %252 : vector<16x1xi1> to vector<16x16xi1>
    %254 = arith.select %253, %251, %195 : vector<16x16xi1>, vector<16x16xf32>
    %255 = vector.shape_cast %233 : vector<16x1xi1> to vector<16x1xi1>
    %256 = vector.broadcast %255 : vector<16x1xi1> to vector<16x16xi1>
    %257 = arith.select %256, %248, %198 : vector<16x16xi1>, vector<16x16xf32>
    %c2_i32 = arith.constant 2 : i32
    %c0_96 = arith.constant 0 : index
    %258 = arith.index_cast %c2_i32 : i32 to index
    %c0_97 = arith.constant 0 : index
    %c0_98 = arith.constant 0 : index
    %259 = vector.load %arg6[%c0_96, %258, %c0_97, %c0_98] : memref<2x8x16x64xf32, #tpu.memory_space<vmem>>, vector<1x1x16x64xf32>
    %260 = vector.shape_cast %259 : vector<1x1x16x64xf32> to vector<16x64xf32>
    %261 = vector.broadcast %c2_i32 : i32 to vector<16x1xi32>
    %262 = arith.cmpi slt, %261, %136 : vector<16x1xi32>
    %cst_99 = arith.constant dense<0.000000e+00> : vector<16x64xf32>
    %263 = tpu.matmul %224, %137, %cst_99 {dimension_numbers = #tpu.dot_dimension_numbers<[1], [0], [0], [1], [0, 0, 1, 1], [], []>} : vector<16x16xf32>, vector<16x64xf32>, vector<16x64xf32> -> vector<16x64xf32>
    %264 = arith.addf %260, %263 : vector<16x64xf32>
    %265 = vector.extract_strided_slice %264 {offsets = [0, 0], sizes = [16, 48], strides = [1, 1]} : vector<16x64xf32> to vector<16x48xf32>
    %266 = arith.negf %265 : vector<16x48xf32>
    %267 = math.exp %266 : vector<16x48xf32>
    %cst_100 = arith.constant 1.000000e+00 : f32
    %268 = vector.broadcast %cst_100 : f32 to vector<16x48xf32>
    %269 = arith.addf %268, %267 : vector<16x48xf32>
    %270 = arith.divf %268, %269 : vector<16x48xf32>
    %271 = vector.extract_strided_slice %264 {offsets = [0, 48], sizes = [16, 16], strides = [1, 1]} : vector<16x64xf32> to vector<16x16xf32>
    %272 = math.tanh %271 : vector<16x16xf32>
    %273 = vector.extract_strided_slice %270 {offsets = [0, 16], sizes = [16, 16], strides = [1, 1]} : vector<16x48xf32> to vector<16x16xf32>
    %274 = arith.mulf %273, %227 : vector<16x16xf32>
    %275 = vector.extract_strided_slice %270 {offsets = [0, 0], sizes = [16, 16], strides = [1, 1]} : vector<16x48xf32> to vector<16x16xf32>
    %276 = arith.mulf %275, %272 : vector<16x16xf32>
    %277 = arith.addf %274, %276 : vector<16x16xf32>
    %278 = vector.extract_strided_slice %270 {offsets = [0, 32], sizes = [16, 16], strides = [1, 1]} : vector<16x48xf32> to vector<16x16xf32>
    %279 = math.tanh %277 : vector<16x16xf32>
    %280 = arith.mulf %278, %279 : vector<16x16xf32>
    %281 = vector.shape_cast %262 : vector<16x1xi1> to vector<16x1xi1>
    %282 = vector.broadcast %281 : vector<16x1xi1> to vector<16x16xi1>
    %283 = arith.select %282, %280, %224 : vector<16x16xi1>, vector<16x16xf32>
    %284 = vector.shape_cast %262 : vector<16x1xi1> to vector<16x1xi1>
    %285 = vector.broadcast %284 : vector<16x1xi1> to vector<16x16xi1>
    %286 = arith.select %285, %277, %227 : vector<16x16xi1>, vector<16x16xf32>
    %c7_i32_101 = arith.constant 7 : i32
    %287 = arith.subi %c7_i32_101, %c2_i32 : i32
    %c1_102 = arith.constant 1 : index
    %288 = arith.index_cast %287 : i32 to index
    %c0_103 = arith.constant 0 : index
    %c0_104 = arith.constant 0 : index
    %289 = vector.load %arg6[%c1_102, %288, %c0_103, %c0_104] : memref<2x8x16x64xf32, #tpu.memory_space<vmem>>, vector<1x1x16x64xf32>
    %290 = vector.shape_cast %289 : vector<1x1x16x64xf32> to vector<16x64xf32>
    %291 = vector.broadcast %287 : i32 to vector<16x1xi32>
    %292 = arith.cmpi slt, %291, %136 : vector<16x1xi32>
    %cst_105 = arith.constant dense<0.000000e+00> : vector<16x64xf32>
    %293 = tpu.matmul %254, %138, %cst_105 {dimension_numbers = #tpu.dot_dimension_numbers<[1], [0], [0], [1], [0, 0, 1, 1], [], []>} : vector<16x16xf32>, vector<16x64xf32>, vector<16x64xf32> -> vector<16x64xf32>
    %294 = arith.addf %290, %293 : vector<16x64xf32>
    %295 = vector.extract_strided_slice %294 {offsets = [0, 0], sizes = [16, 48], strides = [1, 1]} : vector<16x64xf32> to vector<16x48xf32>
    %296 = arith.negf %295 : vector<16x48xf32>
    %297 = math.exp %296 : vector<16x48xf32>
    %cst_106 = arith.constant 1.000000e+00 : f32
    %298 = vector.broadcast %cst_106 : f32 to vector<16x48xf32>
    %299 = arith.addf %298, %297 : vector<16x48xf32>
    %300 = arith.divf %298, %299 : vector<16x48xf32>
    %301 = vector.extract_strided_slice %294 {offsets = [0, 48], sizes = [16, 16], strides = [1, 1]} : vector<16x64xf32> to vector<16x16xf32>
    %302 = math.tanh %301 : vector<16x16xf32>
    %303 = vector.extract_strided_slice %300 {offsets = [0, 16], sizes = [16, 16], strides = [1, 1]} : vector<16x48xf32> to vector<16x16xf32>
    %304 = arith.mulf %303, %257 : vector<16x16xf32>
    %305 = vector.extract_strided_slice %300 {offsets = [0, 0], sizes = [16, 16], strides = [1, 1]} : vector<16x48xf32> to vector<16x16xf32>
    %306 = arith.mulf %305, %302 : vector<16x16xf32>
    %307 = arith.addf %304, %306 : vector<16x16xf32>
    %308 = vector.extract_strided_slice %300 {offsets = [0, 32], sizes = [16, 16], strides = [1, 1]} : vector<16x48xf32> to vector<16x16xf32>
    %309 = math.tanh %307 : vector<16x16xf32>
    %310 = arith.mulf %308, %309 : vector<16x16xf32>
    %311 = vector.shape_cast %292 : vector<16x1xi1> to vector<16x1xi1>
    %312 = vector.broadcast %311 : vector<16x1xi1> to vector<16x16xi1>
    %313 = arith.select %312, %310, %254 : vector<16x16xi1>, vector<16x16xf32>
    %314 = vector.shape_cast %292 : vector<16x1xi1> to vector<16x1xi1>
    %315 = vector.broadcast %314 : vector<16x1xi1> to vector<16x16xi1>
    %316 = arith.select %315, %307, %257 : vector<16x16xi1>, vector<16x16xf32>
    %c3_i32 = arith.constant 3 : i32
    %c0_107 = arith.constant 0 : index
    %317 = arith.index_cast %c3_i32 : i32 to index
    %c0_108 = arith.constant 0 : index
    %c0_109 = arith.constant 0 : index
    %318 = vector.load %arg6[%c0_107, %317, %c0_108, %c0_109] : memref<2x8x16x64xf32, #tpu.memory_space<vmem>>, vector<1x1x16x64xf32>
    %319 = vector.shape_cast %318 : vector<1x1x16x64xf32> to vector<16x64xf32>
    %320 = vector.broadcast %c3_i32 : i32 to vector<16x1xi32>
    %321 = arith.cmpi slt, %320, %136 : vector<16x1xi32>
    %cst_110 = arith.constant dense<0.000000e+00> : vector<16x64xf32>
    %322 = tpu.matmul %283, %137, %cst_110 {dimension_numbers = #tpu.dot_dimension_numbers<[1], [0], [0], [1], [0, 0, 1, 1], [], []>} : vector<16x16xf32>, vector<16x64xf32>, vector<16x64xf32> -> vector<16x64xf32>
    %323 = arith.addf %319, %322 : vector<16x64xf32>
    %324 = vector.extract_strided_slice %323 {offsets = [0, 0], sizes = [16, 48], strides = [1, 1]} : vector<16x64xf32> to vector<16x48xf32>
    %325 = arith.negf %324 : vector<16x48xf32>
    %326 = math.exp %325 : vector<16x48xf32>
    %cst_111 = arith.constant 1.000000e+00 : f32
    %327 = vector.broadcast %cst_111 : f32 to vector<16x48xf32>
    %328 = arith.addf %327, %326 : vector<16x48xf32>
    %329 = arith.divf %327, %328 : vector<16x48xf32>
    %330 = vector.extract_strided_slice %323 {offsets = [0, 48], sizes = [16, 16], strides = [1, 1]} : vector<16x64xf32> to vector<16x16xf32>
    %331 = math.tanh %330 : vector<16x16xf32>
    %332 = vector.extract_strided_slice %329 {offsets = [0, 16], sizes = [16, 16], strides = [1, 1]} : vector<16x48xf32> to vector<16x16xf32>
    %333 = arith.mulf %332, %286 : vector<16x16xf32>
    %334 = vector.extract_strided_slice %329 {offsets = [0, 0], sizes = [16, 16], strides = [1, 1]} : vector<16x48xf32> to vector<16x16xf32>
    %335 = arith.mulf %334, %331 : vector<16x16xf32>
    %336 = arith.addf %333, %335 : vector<16x16xf32>
    %337 = vector.extract_strided_slice %329 {offsets = [0, 32], sizes = [16, 16], strides = [1, 1]} : vector<16x48xf32> to vector<16x16xf32>
    %338 = math.tanh %336 : vector<16x16xf32>
    %339 = arith.mulf %337, %338 : vector<16x16xf32>
    %340 = vector.shape_cast %321 : vector<16x1xi1> to vector<16x1xi1>
    %341 = vector.broadcast %340 : vector<16x1xi1> to vector<16x16xi1>
    %342 = arith.select %341, %339, %283 : vector<16x16xi1>, vector<16x16xf32>
    %343 = vector.shape_cast %321 : vector<16x1xi1> to vector<16x1xi1>
    %344 = vector.broadcast %343 : vector<16x1xi1> to vector<16x16xi1>
    %345 = arith.select %344, %336, %286 : vector<16x16xi1>, vector<16x16xf32>
    %c7_i32_112 = arith.constant 7 : i32
    %346 = arith.subi %c7_i32_112, %c3_i32 : i32
    %c1_113 = arith.constant 1 : index
    %347 = arith.index_cast %346 : i32 to index
    %c0_114 = arith.constant 0 : index
    %c0_115 = arith.constant 0 : index
    %348 = vector.load %arg6[%c1_113, %347, %c0_114, %c0_115] : memref<2x8x16x64xf32, #tpu.memory_space<vmem>>, vector<1x1x16x64xf32>
    %349 = vector.shape_cast %348 : vector<1x1x16x64xf32> to vector<16x64xf32>
    %350 = vector.broadcast %346 : i32 to vector<16x1xi32>
    %351 = arith.cmpi slt, %350, %136 : vector<16x1xi32>
    %cst_116 = arith.constant dense<0.000000e+00> : vector<16x64xf32>
    %352 = tpu.matmul %313, %138, %cst_116 {dimension_numbers = #tpu.dot_dimension_numbers<[1], [0], [0], [1], [0, 0, 1, 1], [], []>} : vector<16x16xf32>, vector<16x64xf32>, vector<16x64xf32> -> vector<16x64xf32>
    %353 = arith.addf %349, %352 : vector<16x64xf32>
    %354 = vector.extract_strided_slice %353 {offsets = [0, 0], sizes = [16, 48], strides = [1, 1]} : vector<16x64xf32> to vector<16x48xf32>
    %355 = arith.negf %354 : vector<16x48xf32>
    %356 = math.exp %355 : vector<16x48xf32>
    %cst_117 = arith.constant 1.000000e+00 : f32
    %357 = vector.broadcast %cst_117 : f32 to vector<16x48xf32>
    %358 = arith.addf %357, %356 : vector<16x48xf32>
    %359 = arith.divf %357, %358 : vector<16x48xf32>
    %360 = vector.extract_strided_slice %353 {offsets = [0, 48], sizes = [16, 16], strides = [1, 1]} : vector<16x64xf32> to vector<16x16xf32>
    %361 = math.tanh %360 : vector<16x16xf32>
    %362 = vector.extract_strided_slice %359 {offsets = [0, 16], sizes = [16, 16], strides = [1, 1]} : vector<16x48xf32> to vector<16x16xf32>
    %363 = arith.mulf %362, %316 : vector<16x16xf32>
    %364 = vector.extract_strided_slice %359 {offsets = [0, 0], sizes = [16, 16], strides = [1, 1]} : vector<16x48xf32> to vector<16x16xf32>
    %365 = arith.mulf %364, %361 : vector<16x16xf32>
    %366 = arith.addf %363, %365 : vector<16x16xf32>
    %367 = vector.extract_strided_slice %359 {offsets = [0, 32], sizes = [16, 16], strides = [1, 1]} : vector<16x48xf32> to vector<16x16xf32>
    %368 = math.tanh %366 : vector<16x16xf32>
    %369 = arith.mulf %367, %368 : vector<16x16xf32>
    %370 = vector.shape_cast %351 : vector<16x1xi1> to vector<16x1xi1>
    %371 = vector.broadcast %370 : vector<16x1xi1> to vector<16x16xi1>
    %372 = arith.select %371, %369, %313 : vector<16x16xi1>, vector<16x16xf32>
    %373 = vector.shape_cast %351 : vector<16x1xi1> to vector<16x1xi1>
    %374 = vector.broadcast %373 : vector<16x1xi1> to vector<16x16xi1>
    %375 = arith.select %374, %366, %316 : vector<16x16xi1>, vector<16x16xf32>
    %c4_i32 = arith.constant 4 : i32
    %c0_118 = arith.constant 0 : index
    %376 = arith.index_cast %c4_i32 : i32 to index
    %c0_119 = arith.constant 0 : index
    %c0_120 = arith.constant 0 : index
    %377 = vector.load %arg6[%c0_118, %376, %c0_119, %c0_120] : memref<2x8x16x64xf32, #tpu.memory_space<vmem>>, vector<1x1x16x64xf32>
    %378 = vector.shape_cast %377 : vector<1x1x16x64xf32> to vector<16x64xf32>
    %379 = vector.broadcast %c4_i32 : i32 to vector<16x1xi32>
    %380 = arith.cmpi slt, %379, %136 : vector<16x1xi32>
    %cst_121 = arith.constant dense<0.000000e+00> : vector<16x64xf32>
    %381 = tpu.matmul %342, %137, %cst_121 {dimension_numbers = #tpu.dot_dimension_numbers<[1], [0], [0], [1], [0, 0, 1, 1], [], []>} : vector<16x16xf32>, vector<16x64xf32>, vector<16x64xf32> -> vector<16x64xf32>
    %382 = arith.addf %378, %381 : vector<16x64xf32>
    %383 = vector.extract_strided_slice %382 {offsets = [0, 0], sizes = [16, 48], strides = [1, 1]} : vector<16x64xf32> to vector<16x48xf32>
    %384 = arith.negf %383 : vector<16x48xf32>
    %385 = math.exp %384 : vector<16x48xf32>
    %cst_122 = arith.constant 1.000000e+00 : f32
    %386 = vector.broadcast %cst_122 : f32 to vector<16x48xf32>
    %387 = arith.addf %386, %385 : vector<16x48xf32>
    %388 = arith.divf %386, %387 : vector<16x48xf32>
    %389 = vector.extract_strided_slice %382 {offsets = [0, 48], sizes = [16, 16], strides = [1, 1]} : vector<16x64xf32> to vector<16x16xf32>
    %390 = math.tanh %389 : vector<16x16xf32>
    %391 = vector.extract_strided_slice %388 {offsets = [0, 16], sizes = [16, 16], strides = [1, 1]} : vector<16x48xf32> to vector<16x16xf32>
    %392 = arith.mulf %391, %345 : vector<16x16xf32>
    %393 = vector.extract_strided_slice %388 {offsets = [0, 0], sizes = [16, 16], strides = [1, 1]} : vector<16x48xf32> to vector<16x16xf32>
    %394 = arith.mulf %393, %390 : vector<16x16xf32>
    %395 = arith.addf %392, %394 : vector<16x16xf32>
    %396 = vector.extract_strided_slice %388 {offsets = [0, 32], sizes = [16, 16], strides = [1, 1]} : vector<16x48xf32> to vector<16x16xf32>
    %397 = math.tanh %395 : vector<16x16xf32>
    %398 = arith.mulf %396, %397 : vector<16x16xf32>
    %399 = vector.shape_cast %380 : vector<16x1xi1> to vector<16x1xi1>
    %400 = vector.broadcast %399 : vector<16x1xi1> to vector<16x16xi1>
    %401 = arith.select %400, %398, %342 : vector<16x16xi1>, vector<16x16xf32>
    %402 = vector.shape_cast %380 : vector<16x1xi1> to vector<16x1xi1>
    %403 = vector.broadcast %402 : vector<16x1xi1> to vector<16x16xi1>
    %404 = arith.select %403, %395, %345 : vector<16x16xi1>, vector<16x16xf32>
    %c7_i32_123 = arith.constant 7 : i32
    %405 = arith.subi %c7_i32_123, %c4_i32 : i32
    %c1_124 = arith.constant 1 : index
    %406 = arith.index_cast %405 : i32 to index
    %c0_125 = arith.constant 0 : index
    %c0_126 = arith.constant 0 : index
    %407 = vector.load %arg6[%c1_124, %406, %c0_125, %c0_126] : memref<2x8x16x64xf32, #tpu.memory_space<vmem>>, vector<1x1x16x64xf32>
    %408 = vector.shape_cast %407 : vector<1x1x16x64xf32> to vector<16x64xf32>
    %409 = vector.broadcast %405 : i32 to vector<16x1xi32>
    %410 = arith.cmpi slt, %409, %136 : vector<16x1xi32>
    %cst_127 = arith.constant dense<0.000000e+00> : vector<16x64xf32>
    %411 = tpu.matmul %372, %138, %cst_127 {dimension_numbers = #tpu.dot_dimension_numbers<[1], [0], [0], [1], [0, 0, 1, 1], [], []>} : vector<16x16xf32>, vector<16x64xf32>, vector<16x64xf32> -> vector<16x64xf32>
    %412 = arith.addf %408, %411 : vector<16x64xf32>
    %413 = vector.extract_strided_slice %412 {offsets = [0, 0], sizes = [16, 48], strides = [1, 1]} : vector<16x64xf32> to vector<16x48xf32>
    %414 = arith.negf %413 : vector<16x48xf32>
    %415 = math.exp %414 : vector<16x48xf32>
    %cst_128 = arith.constant 1.000000e+00 : f32
    %416 = vector.broadcast %cst_128 : f32 to vector<16x48xf32>
    %417 = arith.addf %416, %415 : vector<16x48xf32>
    %418 = arith.divf %416, %417 : vector<16x48xf32>
    %419 = vector.extract_strided_slice %412 {offsets = [0, 48], sizes = [16, 16], strides = [1, 1]} : vector<16x64xf32> to vector<16x16xf32>
    %420 = math.tanh %419 : vector<16x16xf32>
    %421 = vector.extract_strided_slice %418 {offsets = [0, 16], sizes = [16, 16], strides = [1, 1]} : vector<16x48xf32> to vector<16x16xf32>
    %422 = arith.mulf %421, %375 : vector<16x16xf32>
    %423 = vector.extract_strided_slice %418 {offsets = [0, 0], sizes = [16, 16], strides = [1, 1]} : vector<16x48xf32> to vector<16x16xf32>
    %424 = arith.mulf %423, %420 : vector<16x16xf32>
    %425 = arith.addf %422, %424 : vector<16x16xf32>
    %426 = vector.extract_strided_slice %418 {offsets = [0, 32], sizes = [16, 16], strides = [1, 1]} : vector<16x48xf32> to vector<16x16xf32>
    %427 = math.tanh %425 : vector<16x16xf32>
    %428 = arith.mulf %426, %427 : vector<16x16xf32>
    %429 = vector.shape_cast %410 : vector<16x1xi1> to vector<16x1xi1>
    %430 = vector.broadcast %429 : vector<16x1xi1> to vector<16x16xi1>
    %431 = arith.select %430, %428, %372 : vector<16x16xi1>, vector<16x16xf32>
    %432 = vector.shape_cast %410 : vector<16x1xi1> to vector<16x1xi1>
    %433 = vector.broadcast %432 : vector<16x1xi1> to vector<16x16xi1>
    %434 = arith.select %433, %425, %375 : vector<16x16xi1>, vector<16x16xf32>
    %c5_i32 = arith.constant 5 : i32
    %c0_129 = arith.constant 0 : index
    %435 = arith.index_cast %c5_i32 : i32 to index
    %c0_130 = arith.constant 0 : index
    %c0_131 = arith.constant 0 : index
    %436 = vector.load %arg6[%c0_129, %435, %c0_130, %c0_131] : memref<2x8x16x64xf32, #tpu.memory_space<vmem>>, vector<1x1x16x64xf32>
    %437 = vector.shape_cast %436 : vector<1x1x16x64xf32> to vector<16x64xf32>
    %438 = vector.broadcast %c5_i32 : i32 to vector<16x1xi32>
    %439 = arith.cmpi slt, %438, %136 : vector<16x1xi32>
    %cst_132 = arith.constant dense<0.000000e+00> : vector<16x64xf32>
    %440 = tpu.matmul %401, %137, %cst_132 {dimension_numbers = #tpu.dot_dimension_numbers<[1], [0], [0], [1], [0, 0, 1, 1], [], []>} : vector<16x16xf32>, vector<16x64xf32>, vector<16x64xf32> -> vector<16x64xf32>
    %441 = arith.addf %437, %440 : vector<16x64xf32>
    %442 = vector.extract_strided_slice %441 {offsets = [0, 0], sizes = [16, 48], strides = [1, 1]} : vector<16x64xf32> to vector<16x48xf32>
    %443 = arith.negf %442 : vector<16x48xf32>
    %444 = math.exp %443 : vector<16x48xf32>
    %cst_133 = arith.constant 1.000000e+00 : f32
    %445 = vector.broadcast %cst_133 : f32 to vector<16x48xf32>
    %446 = arith.addf %445, %444 : vector<16x48xf32>
    %447 = arith.divf %445, %446 : vector<16x48xf32>
    %448 = vector.extract_strided_slice %441 {offsets = [0, 48], sizes = [16, 16], strides = [1, 1]} : vector<16x64xf32> to vector<16x16xf32>
    %449 = math.tanh %448 : vector<16x16xf32>
    %450 = vector.extract_strided_slice %447 {offsets = [0, 16], sizes = [16, 16], strides = [1, 1]} : vector<16x48xf32> to vector<16x16xf32>
    %451 = arith.mulf %450, %404 : vector<16x16xf32>
    %452 = vector.extract_strided_slice %447 {offsets = [0, 0], sizes = [16, 16], strides = [1, 1]} : vector<16x48xf32> to vector<16x16xf32>
    %453 = arith.mulf %452, %449 : vector<16x16xf32>
    %454 = arith.addf %451, %453 : vector<16x16xf32>
    %455 = vector.extract_strided_slice %447 {offsets = [0, 32], sizes = [16, 16], strides = [1, 1]} : vector<16x48xf32> to vector<16x16xf32>
    %456 = math.tanh %454 : vector<16x16xf32>
    %457 = arith.mulf %455, %456 : vector<16x16xf32>
    %458 = vector.shape_cast %439 : vector<16x1xi1> to vector<16x1xi1>
    %459 = vector.broadcast %458 : vector<16x1xi1> to vector<16x16xi1>
    %460 = arith.select %459, %457, %401 : vector<16x16xi1>, vector<16x16xf32>
    %461 = vector.shape_cast %439 : vector<16x1xi1> to vector<16x1xi1>
    %462 = vector.broadcast %461 : vector<16x1xi1> to vector<16x16xi1>
    %463 = arith.select %462, %454, %404 : vector<16x16xi1>, vector<16x16xf32>
    %c7_i32_134 = arith.constant 7 : i32
    %464 = arith.subi %c7_i32_134, %c5_i32 : i32
    %c1_135 = arith.constant 1 : index
    %465 = arith.index_cast %464 : i32 to index
    %c0_136 = arith.constant 0 : index
    %c0_137 = arith.constant 0 : index
    %466 = vector.load %arg6[%c1_135, %465, %c0_136, %c0_137] : memref<2x8x16x64xf32, #tpu.memory_space<vmem>>, vector<1x1x16x64xf32>
    %467 = vector.shape_cast %466 : vector<1x1x16x64xf32> to vector<16x64xf32>
    %468 = vector.broadcast %464 : i32 to vector<16x1xi32>
    %469 = arith.cmpi slt, %468, %136 : vector<16x1xi32>
    %cst_138 = arith.constant dense<0.000000e+00> : vector<16x64xf32>
    %470 = tpu.matmul %431, %138, %cst_138 {dimension_numbers = #tpu.dot_dimension_numbers<[1], [0], [0], [1], [0, 0, 1, 1], [], []>} : vector<16x16xf32>, vector<16x64xf32>, vector<16x64xf32> -> vector<16x64xf32>
    %471 = arith.addf %467, %470 : vector<16x64xf32>
    %472 = vector.extract_strided_slice %471 {offsets = [0, 0], sizes = [16, 48], strides = [1, 1]} : vector<16x64xf32> to vector<16x48xf32>
    %473 = arith.negf %472 : vector<16x48xf32>
    %474 = math.exp %473 : vector<16x48xf32>
    %cst_139 = arith.constant 1.000000e+00 : f32
    %475 = vector.broadcast %cst_139 : f32 to vector<16x48xf32>
    %476 = arith.addf %475, %474 : vector<16x48xf32>
    %477 = arith.divf %475, %476 : vector<16x48xf32>
    %478 = vector.extract_strided_slice %471 {offsets = [0, 48], sizes = [16, 16], strides = [1, 1]} : vector<16x64xf32> to vector<16x16xf32>
    %479 = math.tanh %478 : vector<16x16xf32>
    %480 = vector.extract_strided_slice %477 {offsets = [0, 16], sizes = [16, 16], strides = [1, 1]} : vector<16x48xf32> to vector<16x16xf32>
    %481 = arith.mulf %480, %434 : vector<16x16xf32>
    %482 = vector.extract_strided_slice %477 {offsets = [0, 0], sizes = [16, 16], strides = [1, 1]} : vector<16x48xf32> to vector<16x16xf32>
    %483 = arith.mulf %482, %479 : vector<16x16xf32>
    %484 = arith.addf %481, %483 : vector<16x16xf32>
    %485 = vector.extract_strided_slice %477 {offsets = [0, 32], sizes = [16, 16], strides = [1, 1]} : vector<16x48xf32> to vector<16x16xf32>
    %486 = math.tanh %484 : vector<16x16xf32>
    %487 = arith.mulf %485, %486 : vector<16x16xf32>
    %488 = vector.shape_cast %469 : vector<16x1xi1> to vector<16x1xi1>
    %489 = vector.broadcast %488 : vector<16x1xi1> to vector<16x16xi1>
    %490 = arith.select %489, %487, %431 : vector<16x16xi1>, vector<16x16xf32>
    %491 = vector.shape_cast %469 : vector<16x1xi1> to vector<16x1xi1>
    %492 = vector.broadcast %491 : vector<16x1xi1> to vector<16x16xi1>
    %493 = arith.select %492, %484, %434 : vector<16x16xi1>, vector<16x16xf32>
    %c6_i32 = arith.constant 6 : i32
    %c0_140 = arith.constant 0 : index
    %494 = arith.index_cast %c6_i32 : i32 to index
    %c0_141 = arith.constant 0 : index
    %c0_142 = arith.constant 0 : index
    %495 = vector.load %arg6[%c0_140, %494, %c0_141, %c0_142] : memref<2x8x16x64xf32, #tpu.memory_space<vmem>>, vector<1x1x16x64xf32>
    %496 = vector.shape_cast %495 : vector<1x1x16x64xf32> to vector<16x64xf32>
    %497 = vector.broadcast %c6_i32 : i32 to vector<16x1xi32>
    %498 = arith.cmpi slt, %497, %136 : vector<16x1xi32>
    %cst_143 = arith.constant dense<0.000000e+00> : vector<16x64xf32>
    %499 = tpu.matmul %460, %137, %cst_143 {dimension_numbers = #tpu.dot_dimension_numbers<[1], [0], [0], [1], [0, 0, 1, 1], [], []>} : vector<16x16xf32>, vector<16x64xf32>, vector<16x64xf32> -> vector<16x64xf32>
    %500 = arith.addf %496, %499 : vector<16x64xf32>
    %501 = vector.extract_strided_slice %500 {offsets = [0, 0], sizes = [16, 48], strides = [1, 1]} : vector<16x64xf32> to vector<16x48xf32>
    %502 = arith.negf %501 : vector<16x48xf32>
    %503 = math.exp %502 : vector<16x48xf32>
    %cst_144 = arith.constant 1.000000e+00 : f32
    %504 = vector.broadcast %cst_144 : f32 to vector<16x48xf32>
    %505 = arith.addf %504, %503 : vector<16x48xf32>
    %506 = arith.divf %504, %505 : vector<16x48xf32>
    %507 = vector.extract_strided_slice %500 {offsets = [0, 48], sizes = [16, 16], strides = [1, 1]} : vector<16x64xf32> to vector<16x16xf32>
    %508 = math.tanh %507 : vector<16x16xf32>
    %509 = vector.extract_strided_slice %506 {offsets = [0, 16], sizes = [16, 16], strides = [1, 1]} : vector<16x48xf32> to vector<16x16xf32>
    %510 = arith.mulf %509, %463 : vector<16x16xf32>
    %511 = vector.extract_strided_slice %506 {offsets = [0, 0], sizes = [16, 16], strides = [1, 1]} : vector<16x48xf32> to vector<16x16xf32>
    %512 = arith.mulf %511, %508 : vector<16x16xf32>
    %513 = arith.addf %510, %512 : vector<16x16xf32>
    %514 = vector.extract_strided_slice %506 {offsets = [0, 32], sizes = [16, 16], strides = [1, 1]} : vector<16x48xf32> to vector<16x16xf32>
    %515 = math.tanh %513 : vector<16x16xf32>
    %516 = arith.mulf %514, %515 : vector<16x16xf32>
    %517 = vector.shape_cast %498 : vector<16x1xi1> to vector<16x1xi1>
    %518 = vector.broadcast %517 : vector<16x1xi1> to vector<16x16xi1>
    %519 = arith.select %518, %516, %460 : vector<16x16xi1>, vector<16x16xf32>
    %520 = vector.shape_cast %498 : vector<16x1xi1> to vector<16x1xi1>
    %521 = vector.broadcast %520 : vector<16x1xi1> to vector<16x16xi1>
    %522 = arith.select %521, %513, %463 : vector<16x16xi1>, vector<16x16xf32>
    %c7_i32_145 = arith.constant 7 : i32
    %523 = arith.subi %c7_i32_145, %c6_i32 : i32
    %c1_146 = arith.constant 1 : index
    %524 = arith.index_cast %523 : i32 to index
    %c0_147 = arith.constant 0 : index
    %c0_148 = arith.constant 0 : index
    %525 = vector.load %arg6[%c1_146, %524, %c0_147, %c0_148] : memref<2x8x16x64xf32, #tpu.memory_space<vmem>>, vector<1x1x16x64xf32>
    %526 = vector.shape_cast %525 : vector<1x1x16x64xf32> to vector<16x64xf32>
    %527 = vector.broadcast %523 : i32 to vector<16x1xi32>
    %528 = arith.cmpi slt, %527, %136 : vector<16x1xi32>
    %cst_149 = arith.constant dense<0.000000e+00> : vector<16x64xf32>
    %529 = tpu.matmul %490, %138, %cst_149 {dimension_numbers = #tpu.dot_dimension_numbers<[1], [0], [0], [1], [0, 0, 1, 1], [], []>} : vector<16x16xf32>, vector<16x64xf32>, vector<16x64xf32> -> vector<16x64xf32>
    %530 = arith.addf %526, %529 : vector<16x64xf32>
    %531 = vector.extract_strided_slice %530 {offsets = [0, 0], sizes = [16, 48], strides = [1, 1]} : vector<16x64xf32> to vector<16x48xf32>
    %532 = arith.negf %531 : vector<16x48xf32>
    %533 = math.exp %532 : vector<16x48xf32>
    %cst_150 = arith.constant 1.000000e+00 : f32
    %534 = vector.broadcast %cst_150 : f32 to vector<16x48xf32>
    %535 = arith.addf %534, %533 : vector<16x48xf32>
    %536 = arith.divf %534, %535 : vector<16x48xf32>
    %537 = vector.extract_strided_slice %530 {offsets = [0, 48], sizes = [16, 16], strides = [1, 1]} : vector<16x64xf32> to vector<16x16xf32>
    %538 = math.tanh %537 : vector<16x16xf32>
    %539 = vector.extract_strided_slice %536 {offsets = [0, 16], sizes = [16, 16], strides = [1, 1]} : vector<16x48xf32> to vector<16x16xf32>
    %540 = arith.mulf %539, %493 : vector<16x16xf32>
    %541 = vector.extract_strided_slice %536 {offsets = [0, 0], sizes = [16, 16], strides = [1, 1]} : vector<16x48xf32> to vector<16x16xf32>
    %542 = arith.mulf %541, %538 : vector<16x16xf32>
    %543 = arith.addf %540, %542 : vector<16x16xf32>
    %544 = vector.extract_strided_slice %536 {offsets = [0, 32], sizes = [16, 16], strides = [1, 1]} : vector<16x48xf32> to vector<16x16xf32>
    %545 = math.tanh %543 : vector<16x16xf32>
    %546 = arith.mulf %544, %545 : vector<16x16xf32>
    %547 = vector.shape_cast %528 : vector<16x1xi1> to vector<16x1xi1>
    %548 = vector.broadcast %547 : vector<16x1xi1> to vector<16x16xi1>
    %549 = arith.select %548, %546, %490 : vector<16x16xi1>, vector<16x16xf32>
    %550 = vector.shape_cast %528 : vector<16x1xi1> to vector<16x1xi1>
    %551 = vector.broadcast %550 : vector<16x1xi1> to vector<16x16xi1>
    %552 = arith.select %551, %543, %493 : vector<16x16xi1>, vector<16x16xf32>
    %c7_i32_151 = arith.constant 7 : i32
    %c0_152 = arith.constant 0 : index
    %553 = arith.index_cast %c7_i32_151 : i32 to index
    %c0_153 = arith.constant 0 : index
    %c0_154 = arith.constant 0 : index
    %554 = vector.load %arg6[%c0_152, %553, %c0_153, %c0_154] : memref<2x8x16x64xf32, #tpu.memory_space<vmem>>, vector<1x1x16x64xf32>
    %555 = vector.shape_cast %554 : vector<1x1x16x64xf32> to vector<16x64xf32>
    %556 = vector.broadcast %c7_i32_151 : i32 to vector<16x1xi32>
    %557 = arith.cmpi slt, %556, %136 : vector<16x1xi32>
    %cst_155 = arith.constant dense<0.000000e+00> : vector<16x64xf32>
    %558 = tpu.matmul %519, %137, %cst_155 {dimension_numbers = #tpu.dot_dimension_numbers<[1], [0], [0], [1], [0, 0, 1, 1], [], []>} : vector<16x16xf32>, vector<16x64xf32>, vector<16x64xf32> -> vector<16x64xf32>
    %559 = arith.addf %555, %558 : vector<16x64xf32>
    %560 = vector.extract_strided_slice %559 {offsets = [0, 0], sizes = [16, 48], strides = [1, 1]} : vector<16x64xf32> to vector<16x48xf32>
    %561 = arith.negf %560 : vector<16x48xf32>
    %562 = math.exp %561 : vector<16x48xf32>
    %cst_156 = arith.constant 1.000000e+00 : f32
    %563 = vector.broadcast %cst_156 : f32 to vector<16x48xf32>
    %564 = arith.addf %563, %562 : vector<16x48xf32>
    %565 = arith.divf %563, %564 : vector<16x48xf32>
    %566 = vector.extract_strided_slice %559 {offsets = [0, 48], sizes = [16, 16], strides = [1, 1]} : vector<16x64xf32> to vector<16x16xf32>
    %567 = math.tanh %566 : vector<16x16xf32>
    %568 = vector.extract_strided_slice %565 {offsets = [0, 16], sizes = [16, 16], strides = [1, 1]} : vector<16x48xf32> to vector<16x16xf32>
    %569 = arith.mulf %568, %522 : vector<16x16xf32>
    %570 = vector.extract_strided_slice %565 {offsets = [0, 0], sizes = [16, 16], strides = [1, 1]} : vector<16x48xf32> to vector<16x16xf32>
    %571 = arith.mulf %570, %567 : vector<16x16xf32>
    %572 = arith.addf %569, %571 : vector<16x16xf32>
    %573 = vector.extract_strided_slice %565 {offsets = [0, 32], sizes = [16, 16], strides = [1, 1]} : vector<16x48xf32> to vector<16x16xf32>
    %574 = math.tanh %572 : vector<16x16xf32>
    %575 = arith.mulf %573, %574 : vector<16x16xf32>
    %576 = vector.shape_cast %557 : vector<16x1xi1> to vector<16x1xi1>
    %577 = vector.broadcast %576 : vector<16x1xi1> to vector<16x16xi1>
    %578 = arith.select %577, %575, %519 : vector<16x16xi1>, vector<16x16xf32>
    %579 = vector.shape_cast %557 : vector<16x1xi1> to vector<16x1xi1>
    %580 = vector.broadcast %579 : vector<16x1xi1> to vector<16x16xi1>
    %581 = arith.select %580, %572, %522 : vector<16x16xi1>, vector<16x16xf32>
    %c7_i32_157 = arith.constant 7 : i32
    %582 = arith.subi %c7_i32_157, %c7_i32_151 : i32
    %c1_158 = arith.constant 1 : index
    %583 = arith.index_cast %582 : i32 to index
    %c0_159 = arith.constant 0 : index
    %c0_160 = arith.constant 0 : index
    %584 = vector.load %arg6[%c1_158, %583, %c0_159, %c0_160] : memref<2x8x16x64xf32, #tpu.memory_space<vmem>>, vector<1x1x16x64xf32>
    %585 = vector.shape_cast %584 : vector<1x1x16x64xf32> to vector<16x64xf32>
    %586 = vector.broadcast %582 : i32 to vector<16x1xi32>
    %587 = arith.cmpi slt, %586, %136 : vector<16x1xi32>
    %cst_161 = arith.constant dense<0.000000e+00> : vector<16x64xf32>
    %588 = tpu.matmul %549, %138, %cst_161 {dimension_numbers = #tpu.dot_dimension_numbers<[1], [0], [0], [1], [0, 0, 1, 1], [], []>} : vector<16x16xf32>, vector<16x64xf32>, vector<16x64xf32> -> vector<16x64xf32>
    %589 = arith.addf %585, %588 : vector<16x64xf32>
    %590 = vector.extract_strided_slice %589 {offsets = [0, 0], sizes = [16, 48], strides = [1, 1]} : vector<16x64xf32> to vector<16x48xf32>
    %591 = arith.negf %590 : vector<16x48xf32>
    %592 = math.exp %591 : vector<16x48xf32>
    %cst_162 = arith.constant 1.000000e+00 : f32
    %593 = vector.broadcast %cst_162 : f32 to vector<16x48xf32>
    %594 = arith.addf %593, %592 : vector<16x48xf32>
    %595 = arith.divf %593, %594 : vector<16x48xf32>
    %596 = vector.extract_strided_slice %589 {offsets = [0, 48], sizes = [16, 16], strides = [1, 1]} : vector<16x64xf32> to vector<16x16xf32>
    %597 = math.tanh %596 : vector<16x16xf32>
    %598 = vector.extract_strided_slice %595 {offsets = [0, 16], sizes = [16, 16], strides = [1, 1]} : vector<16x48xf32> to vector<16x16xf32>
    %599 = arith.mulf %598, %552 : vector<16x16xf32>
    %600 = vector.extract_strided_slice %595 {offsets = [0, 0], sizes = [16, 16], strides = [1, 1]} : vector<16x48xf32> to vector<16x16xf32>
    %601 = arith.mulf %600, %597 : vector<16x16xf32>
    %602 = arith.addf %599, %601 : vector<16x16xf32>
    %603 = vector.extract_strided_slice %595 {offsets = [0, 32], sizes = [16, 16], strides = [1, 1]} : vector<16x48xf32> to vector<16x16xf32>
    %604 = math.tanh %602 : vector<16x16xf32>
    %605 = arith.mulf %603, %604 : vector<16x16xf32>
    %606 = vector.shape_cast %587 : vector<16x1xi1> to vector<16x1xi1>
    %607 = vector.broadcast %606 : vector<16x1xi1> to vector<16x16xi1>
    %608 = arith.select %607, %605, %549 : vector<16x16xi1>, vector<16x16xf32>
    %609 = vector.shape_cast %587 : vector<16x1xi1> to vector<16x1xi1>
    %610 = vector.broadcast %609 : vector<16x1xi1> to vector<16x16xi1>
    %611 = arith.select %610, %602, %552 : vector<16x16xi1>, vector<16x16xf32>
    %c8_i32 = arith.constant 8 : i32
    %612 = tpu.concatenate %578, %608 in 1 : vector<16x16xf32>, vector<16x16xf32> -> vector<16x32xf32>
    %c0_163 = arith.constant 0 : index
    %c0_164 = arith.constant 0 : index
    %613 = vector.load %arg5[%c0_163, %c0_164] : memref<16x32xf32, #tpu.memory_space<vmem>>, vector<16x32xf32>
    tpu.vector_store %arg5[%c0_163, %c0_164], %612 {strides = array<i32>} : memref<16x32xf32, #tpu.memory_space<vmem>>, vector<16x32xf32>,
    return
  }
  func.func @transform_0(%arg0: i32) -> (i32, i32) {
    %c0_i32 = arith.constant 0 : i32
    %c0_i32_0 = arith.constant 0 : i32
    return %arg0, %c0_i32 : i32, i32
  }
  func.func @transform_1(%arg0: i32) -> (i32, i32) {
    %c0_i32 = arith.constant 0 : i32
    %c0_i32_0 = arith.constant 0 : i32
    %c0_i32_1 = arith.constant 0 : i32
    return %c0_i32, %c0_i32_0 : i32, i32
  }
  func.func @transform_2(%arg0: i32) -> (i32, i32) {
    %c0_i32 = arith.constant 0 : i32
    %c0_i32_0 = arith.constant 0 : i32
    %c0_i32_1 = arith.constant 0 : i32
    return %c0_i32, %c0_i32_0 : i32, i32
  }
  func.func @transform_3(%arg0: i32) -> (i32, i32) {
    %c0_i32 = arith.constant 0 : i32
    %c0_i32_0 = arith.constant 0 : i32
    %c0_i32_1 = arith.constant 0 : i32
    return %c0_i32, %c0_i32_0 : i32, i32
  }
  func.func @transform_4(%arg0: i32) -> (i32, i32) {
    %c0_i32 = arith.constant 0 : i32
    %c0_i32_0 = arith.constant 0 : i32
    return %arg0, %c0_i32 : i32, i32
  }
}

</mosaic_0001>

<bundles_post_ra>
// kernel: tpu_custom_call.1
= control target key start
LH: loop header
LB: loop body
LE: loop exit
PB: predicated region body
PF: predicated region fallthrough
CT: control target
= control target key end

     0   :  { %9 = vsyncpa [#allocation4], 0  ;;  %s5087_s0 = inlined_call_operand.vmem [shape: s32[16,8], index: 0, kind: input, shape index: {}]   ;;  %s5088_s1 = inlined_call_operand.hbm [shape: f32[32,128], index: 1, kind: input, shape index: {}]   ;;  %s5089_s2 = inlined_call_operand.vmem [shape: f32[16,64], index: 2, kind: input, shape index: {}]   ;;  %s5090_s3 = inlined_call_operand.hbm [shape: f32[16,64], index: 3, kind: input, shape index: {}]   ;;  %s5091_s4 = inlined_call_operand.hbm [shape: f32[16,32], index: 4, kind: output, shape index: {}]  }
   0x1   :  { %10 = vsyncpa [#allocation7], 0 }
   0x2   :  { %11 = vsyncpa [#allocation5], 0  ;;  %s4034_s15 = smov [#allocation3]  }
   0x3   :  { %s19_s16 = sshll.u32 %s4034_s15, 4  ;;  %s20_s16 = int_to_ptr.vmem [resolvable:$true] %s19_s16 }
   0x4   :  { %s3976_s17 = scalar_lea.vmem %s20_s16, 512  ;;  %p3981_p1 = scmp.lt.s32.totalorder %s20_s16, %s20_s16 }
   0x5   :  { %p3977_p0 = scmp.ne.s32.totalorder %s20_s16, %s3976_s17  ;;  %p3982_p2 = scmp.lt.s32.totalorder %s3976_s17, %s3976_s17 }
   0x7   :  { %p3983_p3 = por %p3982_p2, %p3981_p1 }
   0x9   :  { %p3984_p4 = pnand %p3983_p3, %p3977_p0 }
   0xb   :  { %3987 = shalt.err (!%p3984_p4)
}
   0xc   :  { %s4035_s18 = smov 128   ;;  %s4036_s19 = smov 8  }
   0xd   :  { %25 = dma.hbm_to_vmem [thread:$0]  %s5088_s1, 512, %s20_s16, [#allocation4], %s4035_s18, %s4035_s18, %s4036_s19  }
   0xe   :  { %s4037_s22 = smov [#allocation6]  }
   0xf   :  { %s33_s23 = sshll.u32 %s4037_s22, 4  ;;  %s34_s23 = int_to_ptr.vmem [resolvable:$true] %s33_s23 }
  0x10   :  { %s3996_s24 = scalar_lea.vmem %s34_s23, 256  ;;  %p4001_p6 = scmp.lt.s32.totalorder %s34_s23, %s34_s23 }
  0x11   :  { %p3997_p5 = scmp.ne.s32.totalorder %s34_s23, %s3996_s24  ;;  %p4002_p7 = scmp.lt.s32.totalorder %s3996_s24, %s3996_s24 }
  0x13   :  { %p4003_p8 = por %p4002_p7, %p4001_p6 }
  0x15   :  { %p4004_p9 = pnand %p4003_p8, %p3997_p5 }
  0x17   :  { %4007 = shalt.err (!%p4004_p9)
}
  0x18   :  { %39 = dma.hbm_to_vmem [thread:$0]  %s5090_s3, 256, %s34_s23, [#allocation7], %s4035_s18, %s4035_s18, %s4036_s19  }
  0x19   :  { %4028 = dma.done.wait [#allocation4], 512  }
  0x1a   :  { %4029 = vsyncadd [#allocation4], 4294966784 }
  0x1b   :  { %4030 = dma.done.wait [#allocation7], 256  }
  0x1c   :  { %4031 = vsyncadd [#allocation7], 4294967040  ;;  %v4038_v0 = vmov 3   ;;  %v4039_v1 = vmov 1   ;;  %v4093_v2 = vld [vmem:[%s5087_s0] sm:$0xff]  ;;  %v4095_v3 = vld [vmem:[#allocation3 + $0x18] sm:$0xff]  ;;  %v52_v14 = vlaneseq }
  0x1d   :  { %3696 = vset.pattern.permute.xlu1 %v4038_v0  ;;  %3695 = vset.pattern.permute.xlu0 %v4039_v1  ;;  %v4099_v4 = vld [vmem:[#allocation3 + $0x10] sm:$0xff]  ;;  %v4104_v5 = vld [vmem:[%s5087_s0 + $0x8] sm:$0xff]  ;;  %v4121_v7 = vld [vmem:[#allocation3] sm:$0xff]  ;;  %v4040_v8 = vmov 5   ;;  %v4041_v9 = vmov 7   ;;  %v4042_v10 = vmov 0  }
  0x1e   :  { %377 = vperm.xlu1 %3696, %v4093_v2   ;;  %163 = vperm.xlu0 %3695, %v4093_v2   ;;  %v4111_v6 = vld [vmem:[#allocation3 + $0x8] sm:$0xff]  ;;  %v4043_v11 = vmov 2   ;;  %v4044_v12 = vmov 4   ;;  %v4045_v13 = vmov 6   ;;  %v4143_v15 = vand.u32 127, %v52_v14  ;;  %v4216_v44 = vld [vmem:[#allocation6] sm:$0xff] }
  0x1f   :  { %3487 = vmatprep.subr.mxu1 %v4095_v3  ;;  %3476 = vmatprep.subr.mxu0 %v4095_v3  ;;  %vm5092_vm0 = vcmask 261120   ;;  %v4046_v18 = vmov 0.0   ;;  %v4204_v40 = vld [vmem:[#allocation6 + $0x8] sm:$0xff]  ;;  %v4261_v52 = vld [vmem:[%s5089_s2] sm:$0xff]  ;;  %s4047_s6 = smov 64   ;;  %s4048_s7 = smov 80  }
  0x20   :  { %3488 = vmatpush3.msra.mxu1 %v4095_v3  ;;  %3477 = vmatpush3.msra.mxu0 %v4095_v3  ;;  %v4253_v51 = vld [vmem:[%s5089_s2 + $0x8] sm:$0xff]  ;;  %s4049_s8 = smov 16   ;;  %s4050_s9 = smov 96  }
  0x21   :  { %3489 = vmatprep.subr.mxu1 %v4099_v4  ;;  %3478 = vmatprep.subr.mxu0 %v4099_v4  ;;  %s4052_s14 = smov [#allocation8]  }
  0x22   :  { %380 = vperm.xlu1 %3696, %v4104_v5   ;;  %166 = vperm.xlu0 %3695, %v4104_v5   ;;  %s3259_s15 = sshll.u32 %s4052_s14, 4  ;;  %s3260_s15 = int_to_ptr.vmem [resolvable:$true] %s3259_s15 }
  0x23   :  { %3490 = vmatpush3.msra.mxu1 %v4099_v4  ;;  %3479 = vmatpush3.msra.mxu0 %v4099_v4  ;;  %s4008_s16 = scalar_lea.vmem %s3260_s15, 256  ;;  %p4013_p11 = scmp.lt.s32.totalorder %s3260_s15, %s3260_s15 }
  0x24   :  { %3491 = vmatprep.subr.mxu1 %v4111_v6  ;;  %3480 = vmatprep.subr.mxu0 %v4111_v6  ;;  %p4009_p10 = scmp.ne.s32.totalorder %s3260_s15, %s4008_s16  ;;  %p4014_p12 = scmp.lt.s32.totalorder %s4008_s16, %s4008_s16 }
  0x25   :  { %3492 = vmatpush3.msra.mxu1 %v4111_v6  ;;  %3481 = vmatpush3.msra.mxu0 %v4111_v6 }
  0x26   :  { %3698 = vset.pattern.permute.xlu1 %v4040_v8  ;;  %3697 = vset.pattern.permute.xlu0 %v4040_v8  ;;  %p4015_p13 = por %p4014_p12, %p4013_p11 }
  0x27   :  { %594 = vperm.xlu1 %3698, %v4104_v5   ;;  %591 = vperm.xlu0 %3697, %v4093_v2  }
  0x28   :  { %3493 = vmatprep.subr.mxu1 %v4121_v7  ;;  %3482 = vmatprep.subr.mxu0 %v4121_v7  ;;  %p4016_p0 = pnand %p4015_p13, %p4009_p10 }
  0x29   :  { %3494 = vmatpush3.msra.mxu1 %v4121_v7  ;;  %3483 = vmatpush3.msra.mxu0 %v4121_v7 }
  0x2a   :  { %3509 = vmatprep.subr.mxu1 %v4095_v3  ;;  %3498 = vmatprep.subr.mxu0 %v4095_v3 }
  0x2b   :  { %3699 = vset.pattern.permute.xlu1 %v4041_v9  ;;  %3700 = vset.pattern.permute.xlu0 %v4041_v9 }
  0x2c   :  { %805 = vperm.xlu1 %3699, %v4093_v2   ;;  %808 = vperm.xlu0 %3700, %v4104_v5  }
  0x30   :  { %3701 = vset.pattern.permute.xlu1 %v4042_v10  ;;  %3702 = vset.pattern.permute.xlu0 %v4043_v11 }
  0x31   :  { %55 = vperm.xlu1 %3701, %v4093_v2   ;;  %270 = vperm.xlu0 %3702, %v4093_v2  }
  0x35   :  { %58 = vperm.xlu1 %3701, %v4104_v5   ;;  %3705 = vset.pattern.permute.xlu0 %v4044_v12 }
  0x36   :  { %487 = vperm.xlu0 %3705, %v4104_v5  }
  0x39   :  { %3703 = vset.pattern.permute.xlu1 %v4043_v11 }
  0x3a   :  { %273 = vperm.xlu1 %3703, %v4104_v5   ;;  %3707 = vset.pattern.permute.xlu0 %v4041_v9 }
  0x3e   :  { %3704 = vset.pattern.permute.xlu1 %v4044_v12 }
  0x3f   :  { %484 = vperm.xlu1 %3704, %v4093_v2  }
  0x43   :  { %3706 = vset.pattern.permute.xlu1 %v4045_v13 }
  0x44   :  { %698 = vperm.xlu1 %3706, %v4093_v2  }
  0x48   :  { %701 = vperm.xlu1 %3706, %v4104_v5  }
  0x99   :  { %v164_v16 = vpop.permute.xlu0 %163  ;;  %v378_v17 = vpop.permute.xlu1 %377 }
  0x9a   :  { %vm168_vm1 = vcmp.eq.s32.totalorder %v164_v16, %v4143_v15  ;;  %vm382_vm2 = vcmp.eq.s32.totalorder %v378_v17, %v4143_v15 }
  0x9b   :  { %v3276_v19 = vsel %vm168_vm1, 1.0, %v4046_v18  ;;  %v3284_v22 = vsel %vm382_vm2, 1.0, %v4046_v18  ;;  %vm148_vm2 = vcmask 523264  }
  0x9c   :  { %3495 = vmatprep.mubr.msk.f32.mxu1 %vm5092_vm0, %v3276_v19 }
  0x9d   :  { %v167_v20 = vpop.permute.xlu0 %166  ;;  %v381_v21 = vpop.permute.xlu1 %380 }
  0x9e   :  { %vm169_vm3 = vcmp.eq.s32.totalorder %v167_v20, %v4143_v15  ;;  %vm383_vm5 = vcmp.eq.s32.totalorder %v381_v21, %v4143_v15 }
  0x9f   :  { %v3277_v23 = vsel %vm169_vm3, 1.0, %v4046_v18  ;;  %v3285_v27 = vsel %vm383_vm5, 1.0, %v4046_v18  ;;  %vm911_vm3 = vcmp.ne.s32.totalorder %v4093_v2, 0  ;;  %vm912_vm5 = vcmp.ne.s32.totalorder %v4104_v5, 0 }
  0xa0   :  { %3496 = vmatmul.mubr.msk.f32.vlgmr.msra.gmra.mxu1 %vm5092_vm0, %v3277_v23 }
  0xa1   :  { %3510 = vmatpush3.msra.mxu1 %v4095_v3  ;;  %3517 = vmatprep.mubr.msk.f32.mxu1 %vm5092_vm0, %v3284_v22 }
  0xa2   :  { %3511 = vmatprep.subr.mxu1 %v4099_v4  ;;  %v595_v24 = vpop.permute.xlu1 %594  ;;  %v592_v25 = vpop.permute.xlu0 %591 }
  0xa3   :  { %3512 = vmatpush3.msra.mxu1 %v4099_v4  ;;  %vm596_vm4 = vcmp.eq.s32.totalorder %v592_v25, %v4143_v15  ;;  %vm597_vm6 = vcmp.eq.s32.totalorder %v595_v24, %v4143_v15 }
  0xa4   :  { %3513 = vmatprep.subr.mxu1 %v4111_v6  ;;  %v3292_v26 = vsel %vm596_vm4, 1.0, %v4046_v18  ;;  %v3293_v31 = vsel %vm597_vm6, 1.0, %v4046_v18  ;;  %vm915_vm4 = vcmask 64512  }
  0xa5   :  { %3514 = vmatpush3.msra.mxu1 %v4111_v6 }
  0xa6   :  { %3515 = vmatprep.subr.mxu1 %v4121_v7 }
  0xa7   :  { %3516 = vmatpush3.msra.mxu1 %v4121_v7  ;;  %v806_v28 = vpop.permute.xlu1 %805  ;;  %v809_v29 = vpop.permute.xlu0 %808 }
  0xa8   :  { %3518 = vmatmul.mubr.msk.f32.vlgmr.msra.gmra.mxu1 %vm5092_vm0, %v3285_v27  ;;  %3531 = vmatprep.subr.mxu1 %v4095_v3  ;;  %vm810_vm7 = vcmp.eq.s32.totalorder %v806_v28, %v4143_v15  ;;  %vm811_vm10 = vcmp.eq.s32.totalorder %v809_v29, %v4143_v15 }
  0xa9   :  { %3532 = vmatpush3.msra.mxu1 %v4095_v3  ;;  %3539 = vmatprep.mubr.msk.f32.mxu1 %vm5092_vm0, %v3292_v26  ;;  %v3300_v32 = vsel %vm810_vm7, 1.0, %v4046_v18  ;;  %v3301_v37 = vsel %vm811_vm10, 1.0, %v4046_v18 }
  0xaa   :  { %3533 = vmatprep.subr.mxu1 %v4099_v4 }
  0xab   :  { %3534 = vmatpush3.msra.mxu1 %v4099_v4 }
  0xac   :  { %3535 = vmatprep.subr.mxu1 %v4111_v6  ;;  %v56_v30 = vpop.permute.xlu1 %55  ;;  %v271_v35 = vpop.permute.xlu0 %270 }
  0xad   :  { %3536 = vmatpush3.msra.mxu1 %v4111_v6  ;;  %vm60_vm8 = vcmp.eq.s32.totalorder %v56_v30, %v4143_v15  ;;  %vm275_vm11 = vcmp.eq.s32.totalorder %v271_v35, %v4143_v15 }
  0xae   :  { %3537 = vmatprep.subr.mxu1 %v4121_v7  ;;  %v3272_v33 = vsel %vm60_vm8, 1.0, %v4046_v18  ;;  %v3280_v39 = vsel %vm275_vm11, 1.0, %v4046_v18 }
  0xaf   :  { %3538 = vmatpush3.msra.mxu1 %v4121_v7  ;;  %3484 = vmatprep.mubr.msk.f32.mxu0 %vm5092_vm0, %v3272_v33 }
  0xb0   :  { %3540 = vmatmul.mubr.msk.f32.vlgmr.msra.gmra.mxu1 %vm5092_vm0, %v3293_v31  ;;  %3553 = vmatprep.subr.mxu1 %v4095_v3  ;;  %v59_v34 = vpop.permute.xlu1 %58 }
  0xb1   :  { %vm61_vm9 = vcmp.eq.s32.totalorder %v59_v34, %v4143_v15  ;;  %3554 = vmatpush3.msra.mxu1 %v4095_v3  ;;  %3561 = vmatprep.mubr.msk.f32.mxu1 %vm5092_vm0, %v3300_v32  ;;  %v488_v43 = vpop.permute.xlu0 %487 }
  0xb2   :  { %v3273_v36 = vsel %vm61_vm9, 1.0, %v4046_v18  ;;  %3555 = vmatprep.subr.mxu1 %v4099_v4  ;;  %vm490_vm14 = vcmp.eq.s32.totalorder %v488_v43, %v4143_v15 }
  0xb3   :  { %3556 = vmatpush3.msra.mxu1 %v4099_v4  ;;  %3485 = vmatmul.mubr.msk.f32.vlgmr.msra.gmra.mxu0 %vm5092_vm0, %v3273_v36  ;;  %v3289_v47 = vsel %vm490_vm14, 1.0, %v4046_v18 }
  0xb4   :  { %3499 = vmatpush3.msra.mxu0 %v4095_v3  ;;  %3557 = vmatprep.subr.mxu1 %v4111_v6 }
  0xb5   :  { %3500 = vmatprep.subr.mxu0 %v4099_v4  ;;  %3558 = vmatpush3.msra.mxu1 %v4111_v6  ;;  %v274_v38 = vpop.permute.xlu1 %273 }
  0xb6   :  { %3501 = vmatpush3.msra.mxu0 %v4099_v4  ;;  %3559 = vmatprep.subr.mxu1 %v4121_v7  ;;  %vm276_vm12 = vcmp.eq.s32.totalorder %v274_v38, %v4143_v15  ;;  %v913_v38 = vsel %vm911_vm3, 1, %v4042_v10 }
  0xb7   :  { %3502 = vmatprep.subr.mxu0 %v4111_v6  ;;  %3560 = vmatpush3.msra.mxu1 %v4121_v7  ;;  %v3281_v41 = vsel %vm276_vm12, 1.0, %v4046_v18  ;;  %vm954_vm12 = vcmask 130048  }
  0xb8   :  { %3503 = vmatpush3.msra.mxu0 %v4111_v6  ;;  %3562 = vmatmul.mubr.msk.f32.vlgmr.msra.gmra.mxu1 %vm5092_vm0, %v3301_v37 }
  0xb9   :  { %3504 = vmatprep.subr.mxu0 %v4121_v7  ;;  %3506 = vmatprep.mubr.msk.f32.mxu0 %vm5092_vm0, %v3280_v39  ;;  %v916_v39 = vsel %vm915_vm4, %v913_v38, 0 }
  0xba   :  { %3505 = vmatpush3.msra.mxu0 %v4121_v7  ;;  %v485_v42 = vpop.permute.xlu1 %484  ;;  %3571 = vmatprep.subr.mxu1 %v4204_v40  ;;  %v917_v43 = vand.u32 65535, %v916_v39 }
  0xbb   :  { %3520 = vmatprep.subr.mxu0 %v4095_v3  ;;  %3507 = vmatmul.mubr.msk.f32.vlgmr.msra.gmra.mxu0 %vm5092_vm0, %v3281_v41  ;;  %vm489_vm13 = vcmp.eq.s32.totalorder %v485_v42, %v4143_v15  ;;  %v918_v41 = vshrl.u32 %v916_v39, 16 }
  0xbc   :  { %3521 = vmatpush3.msra.mxu0 %v4095_v3  ;;  %v3288_v45 = vsel %vm489_vm13, 1.0, %v4046_v18  ;;  %3572 = vmatpush3.msra.mxu1 %v4204_v40 }
  0xbd   :  { %3522 = vmatprep.subr.mxu0 %v4099_v4  ;;  %3528 = vmatprep.mubr.msk.f32.mxu0 %vm5092_vm0, %v3288_v45  ;;  %v920_v42 = vcvt.s32.f32 %v918_v41  ;;  %v914_v45 = vsel %vm912_vm5, 1, %v4042_v10 }
  0xbe   :  { %3523 = vmatpush3.msra.mxu0 %v4099_v4  ;;  %3573 = vmatprep.subr.mxu1 %v4216_v44 }
  0xbf   :  { %3524 = vmatprep.subr.mxu0 %v4111_v6  ;;  %v699_v46 = vpop.permute.xlu1 %698  ;;  %3574 = vmatpush3.msra.mxu1 %v4216_v44 }
  0xc0   :  { %3525 = vmatpush3.msra.mxu0 %v4111_v6  ;;  %vm703_vm15 = vcmp.eq.s32.totalorder %v699_v46, %v4143_v15  ;;  %3575 = vmatprep.mubr.f32.mxu1 %v4046_v18  ;;  %v929_v46 = vsel %vm915_vm4, %v914_v45, 0 }
  0xc1   :  { %3526 = vmatprep.subr.mxu0 %v4121_v7  ;;  %v3296_v48 = vsel %vm703_vm15, 1.0, %v4046_v18  ;;  %3576 = vmatmul.mubr.f32.vlgmr.msra.gmra.mxu1 %v4046_v18 }
  0xc2   :  { %3527 = vmatpush3.msra.mxu0 %v4121_v7  ;;  %3585 = vmatprep.subr.mxu1 %v4204_v40 }
  0xc3   :  { %3542 = vmatprep.subr.mxu0 %v4095_v3  ;;  %3529 = vmatmul.mubr.msk.f32.vlgmr.msra.gmra.mxu0 %vm5092_vm0, %v3289_v47  ;;  %v702_v49 = vpop.permute.xlu1 %701  ;;  %v919_v47 = vcvt.s32.f32 %v917_v43 }
  0xc4   :  { %3543 = vmatpush3.msra.mxu0 %v4095_v3  ;;  %3550 = vmatprep.mubr.msk.f32.mxu0 %vm5092_vm0, %v3296_v48  ;;  %vm704_vm1 = vcmp.eq.s32.totalorder %v702_v49, %v4143_v15  ;;  %v930_v48 = vand.u32 65535, %v929_v46 }
  0xc5   :  { %3544 = vmatprep.subr.mxu0 %v4099_v4  ;;  %3586 = vmatpush3.msra.mxu1 %v4204_v40  ;;  %v3297_v50 = vsel %vm704_vm1, 1.0, %v4046_v18 }
  0xc6   :  { %3545 = vmatpush3.msra.mxu0 %v4099_v4  ;;  %3587 = vmatprep.subr.mxu1 %v4216_v44  ;;  %v932_v49 = vcvt.s32.f32 %v930_v48 }
  0xc7   :  { %3546 = vmatprep.subr.mxu0 %v4111_v6  ;;  %3588 = vmatpush3.msra.mxu1 %v4216_v44 }
  0xc8   :  { %3547 = vmatpush3.msra.mxu0 %v4111_v6  ;;  %3599 = vmatprep.subr.mxu1 %v4204_v40 }
  0xc9   :  { %3548 = vmatprep.subr.mxu0 %v4121_v7 }
  0xca   :  { %3549 = vmatpush3.msra.mxu0 %v4121_v7 }
  0xcb   :  { %3551 = vmatmul.mubr.msk.f32.vlgmr.msra.gmra.mxu0 %vm5092_vm0, %v3297_v50  ;;  %3564 = vmatprep.subr.mxu0 %v4253_v51 }
  0xcc   :  { %3565 = vmatpush3.msra.mxu0 %v4253_v51  ;;  %3568 = vmatprep.mubr.f32.mxu0 %v4046_v18 }
  0xcd   :  { %3566 = vmatprep.subr.mxu0 %v4261_v52 }
  0xce   :  { %3567 = vmatpush3.msra.mxu0 %v4261_v52 }
  0xcf   :  { %3569 = vmatmul.mubr.f32.vlgmr.msra.gmra.mxu0 %v4046_v18  ;;  %3578 = vmatprep.subr.mxu0 %v4253_v51 }
  0xd0   :  { %3579 = vmatpush3.msra.mxu0 %v4253_v51 }
  0xd1   :  { %3580 = vmatprep.subr.mxu0 %v4261_v52 }
  0xd2   :  { %3581 = vmatpush3.msra.mxu0 %v4261_v52 }
  0xd3   :  { %3592 = vmatprep.subr.mxu0 %v4253_v51 }
 0x160   :  { %v4275_v53 = vpop.f32.mrf.mxu1 }
 0x161   :  { %257 = vst.msk [vmem:[#allocation2 + $0x18] sm:$0xff] %vm148_vm2, %v4275_v53 }
 0x162   :  { %v4279_v54 = vpop.f32.mrf.mxu1 }
 0x163   :  { %256 = vst.msk [vmem:[#allocation2 + $0x10] sm:$0xff] %vm148_vm2, %v4279_v54 }
 0x168   :  { %v4283_v55 = vpop.f32.mrf.mxu1 }
 0x169   :  { %471 = vst.msk [vmem:[#allocation2 + $0x38] sm:$0xff] %vm148_vm2, %v4283_v55 }
 0x16a   :  { %v4287_v56 = vpop.f32.mrf.mxu1 }
 0x16b   :  { %470 = vst.msk [vmem:[#allocation2 + $0x30] sm:$0xff] %vm148_vm2, %v4287_v56 }
 0x170   :  { %v4291_v57 = vpop.f32.mrf.mxu1 }
 0x171   :  { %685 = vst.msk [vmem:[#allocation2 + $0x58] sm:$0xff] %vm148_vm2, %v4291_v57 }
 0x172   :  { %v4295_v58 = vpop.f32.mrf.mxu1 }
 0x173   :  { %684 = vst.msk [vmem:[#allocation2 + $0x50] sm:$0xff] %vm148_vm2, %v4295_v58  ;;  %v4299_v59 = vpop.f32.mrf.mxu0 }
 0x174   :  { %150 = vst.msk [vmem:[#allocation2 + $0x8] sm:$0xff] %vm148_vm2, %v4299_v59 }
 0x175   :  { %v4303_v60 = vpop.f32.mrf.mxu0 }
 0x176   :  { %149 = vst.msk [vmem:[#allocation2] sm:$0xff] %vm148_vm2, %v4303_v60 }
 0x178   :  { %v3563_v61 = vpop.f32.mrf.mxu1 }
 0x179   :  { %899 = vst.msk [vmem:[#allocation2 + $0x78] sm:$0xff] %vm148_vm2, %v3563_v61  ;;  %904 = vrot.lane.b32.xlu1 %v3563_v61, %s4047_s6 }
 0x17a   :  { %v888_v62 = vpop.f32.mrf.mxu1 }
 0x17b   :  { %898 = vst.msk [vmem:[#allocation2 + $0x70] sm:$0xff] %vm148_vm2, %v888_v62  ;;  %902 = vrot.lane.b32.xlu0 %v888_v62, %s4047_s6  ;;  %v4311_v63 = vpop.f32.mrf.mxu0  ;;  %v951_v9 = vld [vmem:[#allocation2 + $0x8] sm:$0xff] }
 0x17c   :  { %364 = vst.msk [vmem:[#allocation2 + $0x28] sm:$0xff] %vm148_vm2, %v4311_v63 }
 0x17d   :  { %v4315_v0 = vpop.f32.mrf.mxu0  ;;  %v950_v8 = vld [vmem:[#allocation2] sm:$0xff] }
 0x17e   :  { %363 = vst.msk [vmem:[#allocation2 + $0x20] sm:$0xff] %vm148_vm2, %v4315_v0 }
 0x181   :  { %v3577_v19 = vpop.f32.mrf.mxu1 }
 0x183   :  { %v4319_v1 = vpop.f32.mrf.mxu0  ;;  %v1161_v22 = vpop.f32.mrf.mxu1 }
 0x184   :  { %578 = vst.msk [vmem:[#allocation2 + $0x48] sm:$0xff] %vm148_vm2, %v4319_v1 }
 0x185   :  { %v4323_v3 = vpop.f32.mrf.mxu0 }
 0x186   :  { %577 = vst.msk [vmem:[#allocation2 + $0x40] sm:$0xff] %vm148_vm2, %v4323_v3 }
 0x18b   :  { %v4327_v4 = vpop.f32.mrf.mxu0 }
 0x18c   :  { %792 = vst.msk [vmem:[#allocation2 + $0x68] sm:$0xff] %vm148_vm2, %v4327_v4 }
 0x18d   :  { %v4331_v6 = vpop.f32.mrf.mxu0 }
 0x18e   :  { %791 = vst.msk [vmem:[#allocation2 + $0x60] sm:$0xff] %vm148_vm2, %v4331_v6 }
 0x18f   :  { %v3570_v7 = vpop.f32.mrf.mxu0 }
 0x190   :  { %v1034_v13 = vadd.f32 %v3570_v7, %v951_v9 }
 0x191   :  { %v1024_v11 = vpop.f32.mrf.mxu0 }
 0x192   :  { %v1033_v12 = vadd.f32 %v1024_v11, %v950_v8  ;;  %v3305_v20 = vmul.f32 -1.442695, %v1034_v13 }
 0x194   :  { %3708 = vtanh.f32 %v1033_v12  ;;  %v3304_v18 = vmul.f32 -1.442695, %v1033_v12 }
 0x195   :  { %3710 = vtanh.f32 %v1034_v13 }
 0x196   :  { %3712 = vpow2.f32 %v3304_v18 }
 0x197   :  { %3714 = vpow2.f32 %v3305_v20 }
 0x1a1   :  { %v3709_v14 = vpop.eup %3708 }
 0x1a2   :  { %1053 = vrot.lane.b32.xlu0 %v3709_v14, %s4048_s7  ;;  %v3711_v15 = vpop.eup %3710  ;;  %v931_v14 = vshrl.u32 %v929_v46, 16 }
 0x1a3   :  { %v3713_v26 = vpop.eup %3712 }
 0x1a4   :  { %v1041_v27 = vadd.f32 1.0, %v3713_v26  ;;  %v3715_v28 = vpop.eup %3714 }
 0x1a5   :  { %v1042_v30 = vadd.f32 1.0, %v3715_v28 }
 0x1a6   :  { %1055 = vrot.lane.b32.xlu0 %v3711_v15, %s4048_s7 }
 0x1eb   :  { %v905_v16 = vpop.permute.xlu1 %904 }
 0x1ec   :  { %910 = vst.msk [vmem:[#allocation2 + $0xf8] sm:$0xff] %vm148_vm2, %v905_v16  ;;  %v933_v16 = vcvt.s32.f32 %v931_v14 }
 0x1ed   :  { %v903_v17 = vpop.permute.xlu0 %902 }
 0x1ee   :  { %909 = vst.msk [vmem:[#allocation2 + $0xf0] sm:$0xff] %vm148_vm2, %v903_v17 }
 0x1f3   :  { %v1092_v23 = vld [vmem:[#allocation2 + $0xf8] sm:$0xff] }
 0x1f4   :  { %v1171_v25 = vadd.f32 %v3577_v19, %v1092_v23 }
 0x1f5   :  { %v1091_v21 = vld [vmem:[#allocation2 + $0xf0] sm:$0xff] }
 0x1f6   :  { %v1170_v24 = vadd.f32 %v1161_v22, %v1091_v21  ;;  %v3307_v2 = vmul.f32 -1.442695, %v1171_v25 }
 0x1f8   :  { %3716 = vtanh.f32 %v1170_v24  ;;  %v3306_v50 = vmul.f32 -1.442695, %v1170_v24 }
 0x1f9   :  { %3718 = vtanh.f32 %v1171_v25 }
 0x1fa   :  { %3720 = vrcp.f32 %v1041_v27 }
 0x1fb   :  { %3722 = vrcp.f32 %v1042_v30 }
 0x1fc   :  { %3724 = vpow2.f32 %v3306_v50 }
 0x1fd   :  { %3726 = vpow2.f32 %v3307_v2 }
 0x205   :  { %v3717_v29 = vpop.eup %3716 }
 0x206   :  { %1190 = vrot.lane.b32.xlu1 %v3717_v29, %s4048_s7  ;;  %v3719_v31 = vpop.eup %3718 }
 0x207   :  { %v4341_v32 = vpop.eup %3720 }
 0x208   :  { %v4345_v35 = vpop.eup %3722  ;;  %v1049_v17 = vmul.f32 0.0, %v4341_v32 }
 0x209   :  { %v3725_v61 = vpop.eup %3724  ;;  %v1050_v20 = vmul.f32 0.0, %v4345_v35 }
 0x20a   :  { %1192 = vrot.lane.b32.xlu1 %v3719_v31, %s4048_s7  ;;  %v1178_v62 = vadd.f32 1.0, %v3725_v61  ;;  %v3727_v7 = vpop.eup %3726 }
 0x20b   :  { %v1179_v8 = vadd.f32 1.0, %v3727_v7 }
 0x20c   :  { %3728 = vrcp.f32 %v1178_v62 }
 0x20d   :  { %3730 = vrcp.f32 %v1179_v8 }
 0x214   :  { %v1054_v33 = vpop.permute.xlu0 %1053 }
 0x215   :  { %v1059_v34 = vmul.f32 %v4341_v32, %v1054_v33 }
 0x217   :  { %1063 = vrot.lane.b32.xlu0 %v1059_v34, %s4049_s8 }
 0x218   :  { %v1056_v36 = vpop.permute.xlu0 %1055 }
 0x219   :  { %v1060_v37 = vmul.f32 %v4345_v35, %v1056_v36  ;;  %v4353_v5 = vpop.eup %3728 }
 0x21a   :  { %v4357_v11 = vpop.eup %3730  ;;  %v1186_v24 = vmul.f32 0.0, %v4353_v5 }
 0x21b   :  { %1065 = vrot.lane.b32.xlu0 %v1060_v37, %s4049_s8  ;;  %v1187_v27 = vmul.f32 0.0, %v4357_v11 }
 0x23a   :  { %923 = vadd.xlane.f32.xlu0 %v920_v42 }
 0x23e   :  { %921 = vadd.xlane.f32.xlu0 %v919_v47 }
 0x242   :  { %934 = vadd.xlane.f32.xlu0 %v932_v49 }
 0x278   :  { %v1191_v10 = vpop.permute.xlu1 %1190 }
 0x279   :  { %v1196_v9 = vmul.f32 %v4353_v5, %v1191_v10 }
 0x27b   :  { %1200 = vrot.lane.b32.xlu1 %v1196_v9, %s4049_s8 }
 0x27c   :  { %v1193_v12 = vpop.permute.xlu1 %1192 }
 0x27d   :  { %v1197_v13 = vmul.f32 %v4357_v11, %v1193_v12 }
 0x27f   :  { %1202 = vrot.lane.b32.xlu1 %v1197_v13, %s4049_s8 }
 0x289   :  { %v1064_v15 = vpop.permute.xlu0 %1063 }
 0x28a   :  { %v4362_v18 = vadd.f32 %v1064_v15, %v1049_v17  ;;  %v1228_v17 = vld [vmem:[#allocation2 + $0x10] sm:$0xff] }
 0x28c   :  { %3732 = vtanh.f32 %v4362_v18 }
 0x28d   :  { %v1066_v19 = vpop.permute.xlu0 %1065 }
 0x28e   :  { %v4366_v21 = vadd.f32 %v1066_v19, %v1050_v20 }
 0x290   :  { %3734 = vtanh.f32 %v4366_v21 }
 0x299   :  { %v3733_v22 = vpop.eup %3732 }
 0x29d   :  { %v3735_v23 = vpop.eup %3734 }
 0x2a3   :  { %936 = vadd.xlane.f32.xlu1 %v933_v16 }
 0x2b4   :  { %1075 = vrot.lane.b32.xlu1 %v3733_v22, %s4049_s8  ;;  %v1229_v22 = vld [vmem:[#allocation2 + $0x18] sm:$0xff] }
 0x2b8   :  { %1077 = vrot.lane.b32.xlu1 %v3735_v23, %s4049_s8 }
 0x2c3   :  { %v924_v33 = vpop.xlane.xlu0 %923 }
 0x2c4   :  { %v926_v34 = vcvt.f32.s32 %v924_v33 }
 0x2c6   :  { %v927_v37 = vshll.u32 %v926_v34, 16 }
 0x2c7   :  { %v922_v36 = vpop.xlane.xlu0 %921 }
 0x2c8   :  { %v925_v38 = vcvt.f32.s32 %v922_v36 }
 0x2ca   :  { %v928_v39 = vadd.s32 %v927_v37, %v925_v38 }
 0x2cb   :  { %v935_v41 = vpop.xlane.xlu0 %934 }
 0x2cc   :  { %vm942_vm6 = vcmp.gt.s32.totalorder %v928_v39, 1  ;;  %v938_v45 = vcvt.f32.s32 %v935_v41 }
 0x2cd   :  { %v4381_v46 = vsel %vm942_vm6, %v928_v39, 1 }
 0x2ce   :  { %vm5093_vm7 = vcmp.gt.s32.totalorder %v4381_v46, 0  ;;  %vm1093_vm10 = vcmp.gt.s32.totalorder %v4381_v46, 7  ;;  %vm1230_vm13 = vcmp.gt.s32.totalorder %v4381_v46, 1  ;;  %vm1377_vm15 = vcmp.gt.s32.totalorder %v4381_v46, 6 }
 0x2cf   :  { %vm1524_vm3 = vcmp.gt.s32.totalorder %v4381_v46, 2  ;;  %vm1671_vm5 = vcmp.gt.s32.totalorder %v4381_v46, 5 }
 0x2ed   :  { %v1201_v25 = vpop.permute.xlu1 %1200 }
 0x2ee   :  { %v4372_v26 = vadd.f32 %v1201_v25, %v1186_v24 }
 0x2f0   :  { %3736 = vtanh.f32 %v4372_v26 }
 0x2f1   :  { %v1203_v28 = vpop.permute.xlu1 %1202 }
 0x2f2   :  { %v4376_v29 = vadd.f32 %v1203_v28, %v1187_v27 }
 0x2f4   :  { %3738 = vtanh.f32 %v4376_v29 }
 0x2fd   :  { %v3737_v30 = vpop.eup %3736 }
 0x2fe   :  { %1212 = vrot.lane.b32.xlu0 %v3737_v30, %s4049_s8 }
 0x301   :  { %v3739_v31 = vpop.eup %3738 }
 0x302   :  { %1214 = vrot.lane.b32.xlu1 %v3739_v31, %s4049_s8 }
 0x32c   :  { %v937_v42 = vpop.xlane.xlu1 %936 }
 0x32d   :  { %v939_v43 = vcvt.f32.s32 %v937_v42 }
 0x32f   :  { %v940_v47 = vshll.u32 %v939_v43, 16 }
 0x330   :  { %v1076_v48 = vpop.permute.xlu1 %1075 }
 0x331   :  { %v941_v49 = vadd.s32 %v940_v47, %v938_v45  ;;  %v1081_v50 = vmul.f32 %v4341_v32, %v1076_v48 }
 0x333   :  { %vm944_vm8 = vcmp.gt.s32.totalorder %v941_v49, 1  ;;  %v4387_v2 = vsel %vm5093_vm7, %v1081_v50, 0.0 }
 0x334   :  { %v4389_v61 = vsel %vm944_vm8, %v941_v49, 1  ;;  %v1078_v62 = vpop.permute.xlu1 %1077  ;;  %1234 = vrot.lane.b32.xlu0 %v4387_v2, %s4050_s9  ;;  %vm1818_vm8 = vcmp.gt.s32.totalorder %v4381_v46, 3 }
 0x335   :  { %v1082_v7 = vmul.f32 %v4345_v35, %v1078_v62  ;;  %vm5094_vm9 = vcmp.gt.s32.totalorder %v4389_v61, 0  ;;  %vm1094_vm11 = vcmp.gt.s32.totalorder %v4389_v61, 7  ;;  %vm1231_vm14 = vcmp.gt.s32.totalorder %v4389_v61, 1 }
 0x336   :  { %vm1378_vm1 = vcmp.gt.s32.totalorder %v4389_v61, 6  ;;  %vm1525_vm4 = vcmp.gt.s32.totalorder %v4389_v61, 2  ;;  %vm1672_vm6 = vcmp.gt.s32.totalorder %v4389_v61, 5  ;;  %vm1819_vm0 = vcmp.gt.s32.totalorder %v4389_v61, 3 }
 0x337   :  { %v4397_v32 = vsel %vm5094_vm9, %v1082_v7, 0.0 }
 0x338   :  { %1236 = vrot.lane.b32.xlu0 %v4397_v32, %s4050_s9 }
 0x33c   :  { %795 = vrot.lane.b32.xlu0 %v4331_v6, %s4047_s6 }
 0x370   :  { %v1213_v8 = vpop.permute.xlu0 %1212 }
 0x371   :  { %v1218_v10 = vmul.f32 %v4353_v5, %v1213_v8 }
 0x373   :  { %v4407_v35 = vsel %vm1093_vm10, %v1218_v10, 0.0 }
 0x374   :  { %v1215_v9 = vpop.permute.xlu1 %1214  ;;  %1381 = vrot.lane.b32.xlu1 %v4407_v35, %s4050_s9 }
 0x375   :  { %v1219_v12 = vmul.f32 %v4357_v11, %v1215_v9 }
 0x377   :  { %v4415_v6 = vsel %vm1094_vm11, %v1219_v12, 0.0 }
 0x378   :  { %1383 = vrot.lane.b32.xlu1 %v4415_v6, %s4050_s9 }
 0x37c   :  { %797 = vrot.lane.b32.xlu1 %v4327_v4, %s4047_s6 }
 0x3a6   :  { %v1235_v5 = vpop.permute.xlu0 %1234 }
 0x3a7   :  { %3582 = vmatprep.mubr.msk.f32.mxu0 %vm954_vm12, %v1235_v5 }
 0x3aa   :  { %v1237_v13 = vpop.permute.xlu0 %1236 }
 0x3ab   :  { %3583 = vmatmul.mubr.msk.f32.vlgmr.msra.gmra.mxu0 %vm954_vm12, %v1237_v13 }
 0x3ac   :  { %3593 = vmatpush3.msra.mxu0 %v4253_v51 }
 0x3ad   :  { %3594 = vmatprep.subr.mxu0 %v4261_v52 }
 0x3ae   :  { %v796_v11 = vpop.permute.xlu0 %795  ;;  %3595 = vmatpush3.msra.mxu0 %v4261_v52 }
 0x3af   :  { %802 = vst.msk [vmem:[#allocation2 + $0xe0] sm:$0xff] %vm148_vm2, %v796_v11  ;;  %3606 = vmatprep.subr.mxu0 %v4253_v51 }
 0x3b6   :  { %v1375_v28 = vld [vmem:[#allocation2 + $0xe0] sm:$0xff] }
 0x3e6   :  { %v1382_v14 = vpop.permute.xlu1 %1381 }
 0x3e7   :  { %3589 = vmatprep.mubr.msk.f32.mxu1 %vm954_vm12, %v1382_v14 }
 0x3ea   :  { %v1384_v4 = vpop.permute.xlu1 %1383 }
 0x3eb   :  { %3590 = vmatmul.mubr.msk.f32.vlgmr.msra.gmra.mxu1 %vm954_vm12, %v1384_v4 }
 0x3ec   :  { %3600 = vmatpush3.msra.mxu1 %v4204_v40 }
 0x3ed   :  { %3601 = vmatprep.subr.mxu1 %v4216_v44 }
 0x3ee   :  { %v798_v15 = vpop.permute.xlu1 %797  ;;  %3602 = vmatpush3.msra.mxu1 %v4216_v44 }
 0x3ef   :  { %803 = vst.msk [vmem:[#allocation2 + $0xe8] sm:$0xff] %vm148_vm2, %v798_v15  ;;  %3613 = vmatprep.subr.mxu1 %v4204_v40 }
 0x3f6   :  { %v1376_v33 = vld [vmem:[#allocation2 + $0xe8] sm:$0xff] }
 0x46b   :  { %v3584_v16 = vpop.f32.mrf.mxu0 }
 0x46c   :  { %v1318_v23 = vadd.f32 %v3584_v16, %v1229_v22 }
 0x46d   :  { %v1308_v19 = vpop.f32.mrf.mxu0 }
 0x46e   :  { %v1317_v20 = vadd.f32 %v1308_v19, %v1228_v17  ;;  %v3311_v39 = vmul.f32 -1.442695, %v1318_v23  ;;  %v4446_v19 = vsel %vm5093_vm7, %v4362_v18, 0.0  ;;  %vm1965_vm7 = vcmp.gt.s32.totalorder %v4381_v46, 4 }
 0x470   :  { %3740 = vtanh.f32 %v1317_v20  ;;  %v3310_v38 = vmul.f32 -1.442695, %v1317_v20 }
 0x471   :  { %3742 = vtanh.f32 %v1318_v23 }
 0x47d   :  { %v3741_v24 = vpop.eup %3740 }
 0x47e   :  { %1337 = vrot.lane.b32.xlu0 %v3741_v24, %s4048_s7  ;;  %v3743_v25 = vpop.eup %3742  ;;  %v4454_v24 = vsel %vm5094_vm9, %v4366_v21, 0.0  ;;  %v4466_v21 = vsel %vm1093_vm10, %v4372_v26, 0.0  ;;  %vm1966_vm9 = vcmp.gt.s32.totalorder %v4389_v61, 4 }
 0x482   :  { %1339 = vrot.lane.b32.xlu0 %v3743_v25, %s4048_s7 }
 0x4ab   :  { %v3591_v27 = vpop.f32.mrf.mxu1 }
 0x4ac   :  { %v1465_v34 = vadd.f32 %v3591_v27, %v1376_v33 }
 0x4ad   :  { %v1455_v30 = vpop.f32.mrf.mxu1 }
 0x4ae   :  { %v1464_v31 = vadd.f32 %v1455_v30, %v1375_v28  ;;  %v3315_v10 = vmul.f32 -1.442695, %v1465_v34 }
 0x4b0   :  { %3744 = vtanh.f32 %v1464_v31  ;;  %v3314_v8 = vmul.f32 -1.442695, %v1464_v31 }
 0x4b1   :  { %3746 = vtanh.f32 %v1465_v34 }
 0x4b2   :  { %3748 = vpow2.f32 %v3310_v38 }
 0x4b3   :  { %3750 = vpow2.f32 %v3311_v39 }
 0x4bd   :  { %v3745_v36 = vpop.eup %3744 }
 0x4be   :  { %1484 = vrot.lane.b32.xlu1 %v3745_v36, %s4048_s7  ;;  %v3747_v37 = vpop.eup %3746  ;;  %v4474_v36 = vsel %vm1094_vm11, %v4376_v29, 0.0 }
 0x4bf   :  { %v3749_v41 = vpop.eup %3748 }
 0x4c0   :  { %v1325_v42 = vadd.f32 1.0, %v3749_v41  ;;  %v3751_v43 = vpop.eup %3750 }
 0x4c1   :  { %v1326_v45 = vadd.f32 1.0, %v3751_v43 }
 0x4c2   :  { %1486 = vrot.lane.b32.xlu1 %v3747_v37, %s4048_s7  ;;  %3752 = vrcp.f32 %v1325_v42 }
 0x4c3   :  { %3754 = vrcp.f32 %v1326_v45 }
 0x4c4   :  { %3756 = vpow2.f32 %v3314_v8 }
 0x4c5   :  { %3758 = vpow2.f32 %v3315_v10 }
 0x4cf   :  { %v3753_v47 = vpop.eup %3752 }
 0x4d0   :  { %v3755_v50 = vpop.eup %3754  ;;  %v1333_v20 = vmul.f32 %v3753_v47, %v4446_v19 }
 0x4d1   :  { %v3757_v9 = vpop.eup %3756  ;;  %v1334_v25 = vmul.f32 %v3755_v50, %v4454_v24 }
 0x4d2   :  { %v1472_v12 = vadd.f32 1.0, %v3757_v9  ;;  %v3759_v5 = vpop.eup %3758 }
 0x4d3   :  { %v1473_v13 = vadd.f32 1.0, %v3759_v5 }
 0x4d4   :  { %3760 = vrcp.f32 %v1472_v12  ;;  %v1522_v12 = vld [vmem:[#allocation2 + $0x20] sm:$0xff] }
 0x4d5   :  { %3762 = vrcp.f32 %v1473_v13 }
 0x4e1   :  { %v3761_v11 = vpop.eup %3760 }
 0x4e2   :  { %v3763_v15 = vpop.eup %3762  ;;  %v1480_v31 = vmul.f32 %v3761_v11, %v4466_v21 }
 0x4e3   :  { %v1481_v37 = vmul.f32 %v3763_v15, %v4474_v36 }
 0x4f0   :  { %v1338_v48 = vpop.permute.xlu0 %1337 }
 0x4f1   :  { %v1343_v49 = vmul.f32 %v3753_v47, %v1338_v48 }
 0x4f3   :  { %1347 = vrot.lane.b32.xlu0 %v1343_v49, %s4049_s8 }
 0x4f4   :  { %v1340_v62 = vpop.permute.xlu0 %1339 }
 0x4f5   :  { %v1344_v7 = vmul.f32 %v3755_v50, %v1340_v62 }
 0x4f7   :  { %1349 = vrot.lane.b32.xlu0 %v1344_v7, %s4049_s8 }
 0x530   :  { %v1485_v14 = vpop.permute.xlu1 %1484 }
 0x531   :  { %v1490_v4 = vmul.f32 %v3761_v11, %v1485_v14 }
 0x533   :  { %1494 = vrot.lane.b32.xlu1 %v1490_v4, %s4049_s8 }
 0x534   :  { %v1487_v16 = vpop.permute.xlu1 %1486 }
 0x535   :  { %v1491_v17 = vmul.f32 %v3763_v15, %v1487_v16 }
 0x537   :  { %1496 = vrot.lane.b32.xlu1 %v1491_v17, %s4049_s8 }
 0x565   :  { %v1348_v22 = vpop.permute.xlu0 %1347 }
 0x566   :  { %v4449_v23 = vadd.f32 %v1348_v22, %v1333_v20 }
 0x568   :  { %3764 = vtanh.f32 %v4449_v23 }
 0x569   :  { %v1350_v27 = vpop.permute.xlu0 %1349 }
 0x56a   :  { %v4458_v28 = vadd.f32 %v1350_v27, %v1334_v25 }
 0x56c   :  { %3766 = vtanh.f32 %v4458_v28 }
 0x575   :  { %v3765_v18 = vpop.eup %3764 }
 0x576   :  { %1359 = vrot.lane.b32.xlu0 %v3765_v18, %s4049_s8 }
 0x579   :  { %v3767_v30 = vpop.eup %3766 }
 0x57a   :  { %1361 = vrot.lane.b32.xlu0 %v3767_v30, %s4049_s8 }
 0x5a5   :  { %v1495_v33 = vpop.permute.xlu1 %1494 }
 0x5a6   :  { %v4469_v34 = vadd.f32 %v1495_v33, %v1480_v31 }
 0x5a8   :  { %3768 = vtanh.f32 %v4469_v34 }
 0x5a9   :  { %v1497_v38 = vpop.permute.xlu1 %1496 }
 0x5aa   :  { %v4478_v39 = vadd.f32 %v1497_v38, %v1481_v37 }
 0x5ac   :  { %3770 = vtanh.f32 %v4478_v39 }
 0x5b5   :  { %v3769_v26 = vpop.eup %3768 }
 0x5b6   :  { %1506 = vrot.lane.b32.xlu1 %v3769_v26, %s4049_s8 }
 0x5b9   :  { %v3771_v41 = vpop.eup %3770 }
 0x5ba   :  { %1508 = vrot.lane.b32.xlu1 %v3771_v41, %s4049_s8 }
 0x5e8   :  { %v1360_v42 = vpop.permute.xlu0 %1359 }
 0x5e9   :  { %v1365_v43 = vmul.f32 %v3753_v47, %v1360_v42 }
 0x5eb   :  { %v4487_v29 = vsel %vm1230_vm13, %v1365_v43, %v4387_v2 }
 0x5ec   :  { %1528 = vrot.lane.b32.xlu0 %v4487_v29, %s4050_s9  ;;  %v1362_v45 = vpop.permute.xlu0 %1361 }
 0x5ed   :  { %v1366_v48 = vmul.f32 %v3755_v50, %v1362_v45 }
 0x5ef   :  { %v4495_v49 = vsel %vm1231_vm14, %v1366_v48, %v4397_v32 }
 0x5f0   :  { %1530 = vrot.lane.b32.xlu0 %v4495_v49, %s4050_s9 }
 0x5f4   :  { %688 = vrot.lane.b32.xlu0 %v4295_v58, %s4047_s6 }
 0x628   :  { %v1507_v2 = vpop.permute.xlu1 %1506 }
 0x629   :  { %v1512_v47 = vmul.f32 %v3761_v11, %v1507_v2  ;;  %v1523_v11 = vld [vmem:[#allocation2 + $0x28] sm:$0xff] }
 0x62b   :  { %v4505_v50 = vsel %vm1377_vm15, %v1512_v47, %v4407_v35 }
 0x62c   :  { %1675 = vrot.lane.b32.xlu1 %v4505_v50, %s4050_s9  ;;  %v1509_v32 = vpop.permute.xlu1 %1508 }
 0x62d   :  { %v1513_v62 = vmul.f32 %v3763_v15, %v1509_v32 }
 0x62f   :  { %v4513_v58 = vsel %vm1378_vm1, %v1513_v62, %v4415_v6 }
 0x630   :  { %1677 = vrot.lane.b32.xlu1 %v4513_v58, %s4050_s9 }
 0x634   :  { %690 = vrot.lane.b32.xlu1 %v4291_v57, %s4047_s6 }
 0x65e   :  { %v1529_v35 = vpop.permute.xlu0 %1528 }
 0x65f   :  { %3596 = vmatprep.mubr.msk.f32.mxu0 %vm954_vm12, %v1529_v35 }
 0x662   :  { %v1531_v7 = vpop.permute.xlu0 %1530 }
 0x663   :  { %3597 = vmatmul.mubr.msk.f32.vlgmr.msra.gmra.mxu0 %vm954_vm12, %v1531_v7 }
 0x664   :  { %3607 = vmatpush3.msra.mxu0 %v4253_v51 }
 0x665   :  { %3608 = vmatprep.subr.mxu0 %v4261_v52 }
 0x666   :  { %v689_v8 = vpop.permute.xlu0 %688  ;;  %3609 = vmatpush3.msra.mxu0 %v4261_v52 }
 0x667   :  { %695 = vst.msk [vmem:[#allocation2 + $0xd0] sm:$0xff] %vm148_vm2, %v689_v8  ;;  %3620 = vmatprep.subr.mxu0 %v4253_v51 }
 0x69e   :  { %v1676_v6 = vpop.permute.xlu1 %1675 }
 0x69f   :  { %3603 = vmatprep.mubr.msk.f32.mxu1 %vm954_vm12, %v1676_v6 }
 0x6a2   :  { %v1678_v57 = vpop.permute.xlu1 %1677 }
 0x6a3   :  { %3604 = vmatmul.mubr.msk.f32.vlgmr.msra.gmra.mxu1 %vm954_vm12, %v1678_v57 }
 0x6a4   :  { %3614 = vmatpush3.msra.mxu1 %v4204_v40 }
 0x6a5   :  { %3615 = vmatprep.subr.mxu1 %v4216_v44 }
 0x6a6   :  { %v691_v10 = vpop.permute.xlu1 %690  ;;  %3616 = vmatpush3.msra.mxu1 %v4216_v44  ;;  %v1669_v44 = vld [vmem:[#allocation2 + $0xd0] sm:$0xff] }
 0x6a7   :  { %696 = vst.msk [vmem:[#allocation2 + $0xd8] sm:$0xff] %vm148_vm2, %v691_v10  ;;  %3627 = vmatprep.subr.mxu1 %v4204_v40 }
 0x6ae   :  { %v1670_v22 = vld [vmem:[#allocation2 + $0xd8] sm:$0xff] }
 0x723   :  { %v3598_v9 = vpop.f32.mrf.mxu0 }
 0x724   :  { %v1612_v14 = vadd.f32 %v3598_v9, %v1523_v11 }
 0x725   :  { %v1602_v5 = vpop.f32.mrf.mxu0 }
 0x726   :  { %v1611_v13 = vadd.f32 %v1602_v5, %v1522_v12  ;;  %v3319_v30 = vmul.f32 -1.442695, %v1612_v14  ;;  %v4545_v5 = vsel %vm1230_vm13, %v4449_v23, %v4446_v19 }
 0x728   :  { %3772 = vtanh.f32 %v1611_v13  ;;  %v3318_v18 = vmul.f32 -1.442695, %v1611_v13 }
 0x729   :  { %3774 = vtanh.f32 %v1612_v14 }
 0x735   :  { %v3773_v4 = vpop.eup %3772 }
 0x736   :  { %1631 = vrot.lane.b32.xlu0 %v3773_v4, %s4048_s7  ;;  %v3775_v15 = vpop.eup %3774  ;;  %v4554_v4 = vsel %vm1231_vm14, %v4458_v28, %v4454_v24  ;;  %v4567_v24 = vsel %vm1377_vm15, %v4469_v34, %v4466_v21 }
 0x73a   :  { %1633 = vrot.lane.b32.xlu0 %v3775_v15, %s4048_s7 }
 0x763   :  { %v3605_v16 = vpop.f32.mrf.mxu1 }
 0x764   :  { %v1759_v40 = vadd.f32 %v3605_v16, %v1670_v22  ;;  %v4576_v22 = vsel %vm1378_vm1, %v4478_v39, %v4474_v36 }
 0x765   :  { %v1749_v17 = vpop.f32.mrf.mxu1 }
 0x766   :  { %v1758_v20 = vadd.f32 %v1749_v17, %v1669_v44  ;;  %v3323_v47 = vmul.f32 -1.442695, %v1759_v40 }
 0x768   :  { %3776 = vtanh.f32 %v1758_v20  ;;  %v3322_v2 = vmul.f32 -1.442695, %v1758_v20 }
 0x769   :  { %3778 = vtanh.f32 %v1759_v40 }
 0x76a   :  { %3780 = vpow2.f32 %v3318_v18 }
 0x76b   :  { %3782 = vpow2.f32 %v3319_v30 }
 0x775   :  { %v3777_v25 = vpop.eup %3776 }
 0x776   :  { %1778 = vrot.lane.b32.xlu1 %v3777_v25, %s4048_s7  ;;  %v3779_v27 = vpop.eup %3778 }
 0x777   :  { %v3781_v31 = vpop.eup %3780 }
 0x778   :  { %v1619_v33 = vadd.f32 1.0, %v3781_v31  ;;  %v3783_v37 = vpop.eup %3782 }
 0x779   :  { %v1620_v38 = vadd.f32 1.0, %v3783_v37 }
 0x77a   :  { %1780 = vrot.lane.b32.xlu1 %v3779_v27, %s4048_s7  ;;  %3784 = vrcp.f32 %v1619_v33 }
 0x77b   :  { %3786 = vrcp.f32 %v1620_v38 }
 0x77c   :  { %3788 = vpow2.f32 %v3322_v2 }
 0x77d   :  { %3790 = vpow2.f32 %v3323_v47 }
 0x787   :  { %v3785_v26 = vpop.eup %3784 }
 0x788   :  { %v3787_v43 = vpop.eup %3786  ;;  %v1627_v13 = vmul.f32 %v3785_v26, %v4545_v5 }
 0x789   :  { %v3789_v32 = vpop.eup %3788  ;;  %v1628_v15 = vmul.f32 %v3787_v43, %v4554_v4 }
 0x78a   :  { %v1766_v62 = vadd.f32 1.0, %v3789_v32  ;;  %v3791_v35 = vpop.eup %3790  ;;  %v1817_v32 = vld [vmem:[#allocation2 + $0x38] sm:$0xff] }
 0x78b   :  { %v1767_v7 = vadd.f32 1.0, %v3791_v35 }
 0x78c   :  { %3792 = vrcp.f32 %v1766_v62 }
 0x78d   :  { %3794 = vrcp.f32 %v1767_v7 }
 0x799   :  { %v3793_v8 = vpop.eup %3792 }
 0x79a   :  { %v3795_v10 = vpop.eup %3794  ;;  %v1774_v28 = vmul.f32 %v3793_v8, %v4567_v24 }
 0x79b   :  { %v1775_v40 = vmul.f32 %v3795_v10, %v4576_v22 }
 0x7a8   :  { %v1632_v41 = vpop.permute.xlu0 %1631 }
 0x7a9   :  { %v1637_v42 = vmul.f32 %v3785_v26, %v1632_v41 }
 0x7ab   :  { %1641 = vrot.lane.b32.xlu0 %v1637_v42, %s4049_s8 }
 0x7ac   :  { %v1634_v45 = vpop.permute.xlu0 %1633 }
 0x7ad   :  { %v1638_v48 = vmul.f32 %v3787_v43, %v1634_v45  ;;  %v4633_v45 = vld [vmem:[#allocation6] sm:$0xff] }
 0x7af   :  { %1643 = vrot.lane.b32.xlu0 %v1638_v48, %s4049_s8 }
 0x7e8   :  { %v1779_v6 = vpop.permute.xlu1 %1778 }
 0x7e9   :  { %v1784_v57 = vmul.f32 %v3793_v8, %v1779_v6 }
 0x7eb   :  { %1788 = vrot.lane.b32.xlu1 %v1784_v57, %s4049_s8 }
 0x7ec   :  { %v1781_v9 = vpop.permute.xlu1 %1780 }
 0x7ed   :  { %v1785_v12 = vmul.f32 %v3795_v10, %v1781_v9 }
 0x7ef   :  { %1790 = vrot.lane.b32.xlu1 %v1785_v12, %s4049_s8 }
 0x81d   :  { %v1642_v11 = vpop.permute.xlu0 %1641 }
 0x81e   :  { %v4548_v14 = vadd.f32 %v1642_v11, %v1627_v13 }
 0x820   :  { %3796 = vtanh.f32 %v4548_v14 }
 0x821   :  { %v1644_v16 = vpop.permute.xlu0 %1643 }
 0x822   :  { %v4558_v44 = vadd.f32 %v1644_v16, %v1628_v15 }
 0x824   :  { %3798 = vtanh.f32 %v4558_v44 }
 0x82d   :  { %v3797_v19 = vpop.eup %3796 }
 0x82e   :  { %1653 = vrot.lane.b32.xlu0 %v3797_v19, %s4049_s8 }
 0x831   :  { %v3799_v23 = vpop.eup %3798 }
 0x832   :  { %1655 = vrot.lane.b32.xlu0 %v3799_v23, %s4049_s8 }
 0x85d   :  { %v1789_v17 = vpop.permute.xlu1 %1788 }
 0x85e   :  { %v4570_v20 = vadd.f32 %v1789_v17, %v1774_v28 }
 0x860   :  { %3800 = vtanh.f32 %v4570_v20 }
 0x861   :  { %v1791_v25 = vpop.permute.xlu1 %1790 }
 0x862   :  { %v4580_v27 = vadd.f32 %v1791_v25, %v1775_v40 }
 0x864   :  { %3802 = vtanh.f32 %v4580_v27 }
 0x86d   :  { %v3801_v21 = vpop.eup %3800 }
 0x86e   :  { %1800 = vrot.lane.b32.xlu1 %v3801_v21, %s4049_s8 }
 0x871   :  { %v3803_v34 = vpop.eup %3802 }
 0x872   :  { %1802 = vrot.lane.b32.xlu1 %v3803_v34, %s4049_s8 }
 0x8a0   :  { %v1654_v18 = vpop.permute.xlu0 %1653 }
 0x8a1   :  { %v1659_v30 = vmul.f32 %v3785_v26, %v1654_v18 }
 0x8a3   :  { %v4589_v36 = vsel %vm1524_vm3, %v1659_v30, %v4487_v29 }
 0x8a4   :  { %1822 = vrot.lane.b32.xlu0 %v4589_v36, %s4050_s9  ;;  %v1656_v39 = vpop.permute.xlu0 %1655 }
 0x8a5   :  { %v1660_v31 = vmul.f32 %v3787_v43, %v1656_v39  ;;  %v4630_v43 = vld [vmem:[#allocation6 + $0x8] sm:$0xff] }
 0x8a7   :  { %v4597_v33 = vsel %vm1525_vm4, %v1660_v31, %v4495_v49 }
 0x8a8   :  { %1824 = vrot.lane.b32.xlu0 %v4597_v33, %s4050_s9 }
 0x8ac   :  { %581 = vrot.lane.b32.xlu0 %v4323_v3, %s4047_s6 }
 0x8e0   :  { %v1801_v29 = vpop.permute.xlu1 %1800 }
 0x8e1   :  { %v1806_v37 = vmul.f32 %v3793_v8, %v1801_v29 }
 0x8e3   :  { %v4607_v38 = vsel %vm1671_vm5, %v1806_v37, %v4505_v50 }
 0x8e4   :  { %1969 = vrot.lane.b32.xlu1 %v4607_v38, %s4050_s9  ;;  %v1803_v49 = vpop.permute.xlu1 %1802 }
 0x8e5   :  { %v1807_v26 = vmul.f32 %v3795_v10, %v1803_v49 }
 0x8e7   :  { %v4615_v3 = vsel %vm1672_vm6, %v1807_v26, %v4513_v58 }
 0x8e8   :  { %1971 = vrot.lane.b32.xlu1 %v4615_v3, %s4050_s9 }
 0x8ec   :  { %583 = vrot.lane.b32.xlu1 %v4319_v1, %s4047_s6 }
 0x916   :  { %v1823_v50 = vpop.permute.xlu0 %1822 }
 0x917   :  { %3610 = vmatprep.mubr.msk.f32.mxu0 %vm954_vm12, %v1823_v50 }
 0x91a   :  { %v1825_v41 = vpop.permute.xlu0 %1824 }
 0x91b   :  { %3611 = vmatmul.mubr.msk.f32.vlgmr.msra.gmra.mxu0 %vm954_vm12, %v1825_v41 }
 0x91c   :  { %3621 = vmatpush3.msra.mxu0 %v4253_v51 }
 0x91d   :  { %3622 = vmatprep.subr.mxu0 %v4261_v52 }
 0x91e   :  { %v582_v42 = vpop.permute.xlu0 %581  ;;  %3623 = vmatpush3.msra.mxu0 %v4261_v52  ;;  %v1816_v52 = vld [vmem:[#allocation2 + $0x30] sm:$0xff] }
 0x91f   :  { %588 = vst.msk [vmem:[#allocation2 + $0xc0] sm:$0xff] %vm148_vm2, %v582_v42  ;;  %3634 = vmatprep.subr.mxu0 %v4253_v51 }
 0x926   :  { %v1963_v6 = vld [vmem:[#allocation2 + $0xc0] sm:$0xff] }
 0x956   :  { %v1970_v58 = vpop.permute.xlu1 %1969 }
 0x957   :  { %3617 = vmatprep.mubr.msk.f32.mxu1 %vm954_vm12, %v1970_v58 }
 0x95a   :  { %v1972_v1 = vpop.permute.xlu1 %1971 }
 0x95b   :  { %3618 = vmatmul.mubr.msk.f32.vlgmr.msra.gmra.mxu1 %vm954_vm12, %v1972_v1 }
 0x95c   :  { %3628 = vmatpush3.msra.mxu1 %v4630_v43 }
 0x95d   :  { %3629 = vmatprep.subr.mxu1 %v4633_v45 }
 0x95e   :  { %v584_v48 = vpop.permute.xlu1 %583  ;;  %3630 = vmatpush3.msra.mxu1 %v4633_v45 }
 0x95f   :  { %589 = vst.msk [vmem:[#allocation2 + $0xc8] sm:$0xff] %vm148_vm2, %v584_v48  ;;  %3641 = vmatprep.subr.mxu1 %v4630_v43 }
 0x966   :  { %v1964_v9 = vld [vmem:[#allocation2 + $0xc8] sm:$0xff] }
 0x9db   :  { %v3612_v51 = vpop.f32.mrf.mxu0 }
 0x9dc   :  { %v1906_v62 = vadd.f32 %v3612_v51, %v1817_v32  ;;  %v4651_v51 = vsel %vm1524_vm3, %v4548_v14, %v4545_v5  ;;  %v4660_v32 = vsel %vm1525_vm4, %v4558_v44, %v4554_v4  ;;  %v4673_v4 = vsel %vm1671_vm5, %v4570_v20, %v4567_v24 }
 0x9dd   :  { %v1896_v2 = vpop.f32.mrf.mxu0 }
 0x9de   :  { %v1905_v47 = vadd.f32 %v1896_v2, %v1816_v52  ;;  %v3327_v16 = vmul.f32 -1.442695, %v1906_v62 }
 0x9e0   :  { %3804 = vtanh.f32 %v1905_v47  ;;  %v3326_v15 = vmul.f32 -1.442695, %v1905_v47 }
 0x9e1   :  { %3806 = vtanh.f32 %v1906_v62 }
 0x9ed   :  { %v3805_v35 = vpop.eup %3804 }
 0x9ee   :  { %1925 = vrot.lane.b32.xlu0 %v3805_v35, %s4048_s7  ;;  %v3807_v7 = vpop.eup %3806 }
 0x9f2   :  { %1927 = vrot.lane.b32.xlu0 %v3807_v7, %s4048_s7 }
 0xa1b   :  { %v3619_v8 = vpop.f32.mrf.mxu1 }
 0xa1c   :  { %v2053_v12 = vadd.f32 %v3619_v8, %v1964_v9 }
 0xa1d   :  { %v2043_v57 = vpop.f32.mrf.mxu1 }
 0xa1e   :  { %v2052_v10 = vadd.f32 %v2043_v57, %v1963_v6  ;;  %v3331_v31 = vmul.f32 -1.442695, %v2053_v12  ;;  %v4682_v57 = vsel %vm1672_vm6, %v4580_v27, %v4576_v22 }
 0xa20   :  { %3808 = vtanh.f32 %v2052_v10  ;;  %v3330_v39 = vmul.f32 -1.442695, %v2052_v10 }
 0xa21   :  { %3810 = vtanh.f32 %v2053_v12 }
 0xa22   :  { %3812 = vpow2.f32 %v3326_v15 }
 0xa23   :  { %3814 = vpow2.f32 %v3327_v16 }
 0xa2d   :  { %v3809_v13 = vpop.eup %3808 }
 0xa2e   :  { %2072 = vrot.lane.b32.xlu1 %v3809_v13, %s4048_s7  ;;  %v3811_v11 = vpop.eup %3810 }
 0xa2f   :  { %v3813_v19 = vpop.eup %3812 }
 0xa30   :  { %v1913_v23 = vadd.f32 1.0, %v3813_v19  ;;  %v3815_v28 = vpop.eup %3814 }
 0xa31   :  { %v1914_v17 = vadd.f32 1.0, %v3815_v28 }
 0xa32   :  { %2074 = vrot.lane.b32.xlu1 %v3811_v11, %s4048_s7  ;;  %3816 = vrcp.f32 %v1913_v23 }
 0xa33   :  { %3818 = vrcp.f32 %v1914_v17 }
 0xa34   :  { %3820 = vpow2.f32 %v3330_v39 }
 0xa35   :  { %3822 = vpow2.f32 %v3331_v31 }
 0xa3f   :  { %v3817_v40 = vpop.eup %3816 }
 0xa40   :  { %v3819_v34 = vpop.eup %3818  ;;  %v1921_v52 = vmul.f32 %v3817_v40, %v4651_v51 }
 0xa41   :  { %v3821_v29 = vpop.eup %3820  ;;  %v1922_v62 = vmul.f32 %v3819_v34, %v4660_v32 }
 0xa42   :  { %v2060_v37 = vadd.f32 1.0, %v3821_v29  ;;  %v3823_v49 = vpop.eup %3822  ;;  %v2111_v29 = vld [vmem:[#allocation2 + $0x48] sm:$0xff] }
 0xa43   :  { %v2061_v26 = vadd.f32 1.0, %v3823_v49 }
 0xa44   :  { %3824 = vrcp.f32 %v2060_v37 }
 0xa45   :  { %3826 = vrcp.f32 %v2061_v26 }
 0xa51   :  { %v3825_v50 = vpop.eup %3824 }
 0xa52   :  { %v3827_v58 = vpop.eup %3826  ;;  %v2068_v44 = vmul.f32 %v3825_v50, %v4673_v4 }
 0xa53   :  { %v2069_v10 = vmul.f32 %v3827_v58, %v4682_v57 }
 0xa60   :  { %v1926_v25 = vpop.permute.xlu0 %1925 }
 0xa61   :  { %v1931_v21 = vmul.f32 %v3817_v40, %v1926_v25 }
 0xa63   :  { %1935 = vrot.lane.b32.xlu0 %v1931_v21, %s4049_s8 }
 0xa64   :  { %v1928_v18 = vpop.permute.xlu0 %1927 }
 0xa65   :  { %v1932_v30 = vmul.f32 %v3819_v34, %v1928_v18 }
 0xa67   :  { %1937 = vrot.lane.b32.xlu0 %v1932_v30, %s4049_s8  ;;  %v2110_v30 = vld [vmem:[#allocation2 + $0x40] sm:$0xff] }
 0xaa0   :  { %v2073_v41 = vpop.permute.xlu1 %2072 }
 0xaa1   :  { %v2078_v42 = vmul.f32 %v3825_v50, %v2073_v41 }
 0xaa3   :  { %2082 = vrot.lane.b32.xlu1 %v2078_v42, %s4049_s8 }
 0xaa4   :  { %v2075_v1 = vpop.permute.xlu1 %2074 }
 0xaa5   :  { %v2079_v48 = vmul.f32 %v3827_v58, %v2075_v1 }
 0xaa7   :  { %2084 = vrot.lane.b32.xlu1 %v2079_v48, %s4049_s8 }
 0xad5   :  { %v1936_v2 = vpop.permute.xlu0 %1935 }
 0xad6   :  { %v4654_v47 = vadd.f32 %v1936_v2, %v1921_v52 }
 0xad8   :  { %3828 = vtanh.f32 %v4654_v47 }
 0xad9   :  { %v1938_v35 = vpop.permute.xlu0 %1937 }
 0xada   :  { %v4664_v7 = vadd.f32 %v1938_v35, %v1922_v62 }
 0xadc   :  { %3830 = vtanh.f32 %v4664_v7 }
 0xae5   :  { %v3829_v5 = vpop.eup %3828 }
 0xae6   :  { %1947 = vrot.lane.b32.xlu0 %v3829_v5, %s4049_s8 }
 0xae9   :  { %v3831_v14 = vpop.eup %3830 }
 0xaea   :  { %1949 = vrot.lane.b32.xlu0 %v3831_v14, %s4049_s8 }
 0xb15   :  { %v2083_v8 = vpop.permute.xlu1 %2082 }
 0xb16   :  { %v4676_v6 = vadd.f32 %v2083_v8, %v2068_v44 }
 0xb18   :  { %3832 = vtanh.f32 %v4676_v6 }
 0xb19   :  { %v2085_v9 = vpop.permute.xlu1 %2084 }
 0xb1a   :  { %v4686_v12 = vadd.f32 %v2085_v9, %v2069_v10 }
 0xb1c   :  { %3834 = vtanh.f32 %v4686_v12 }
 0xb25   :  { %v3833_v24 = vpop.eup %3832 }
 0xb26   :  { %2094 = vrot.lane.b32.xlu1 %v3833_v24, %s4049_s8 }
 0xb29   :  { %v3835_v20 = vpop.eup %3834 }
 0xb2a   :  { %2096 = vrot.lane.b32.xlu1 %v3835_v20, %s4049_s8 }
 0xb58   :  { %v1948_v13 = vpop.permute.xlu0 %1947 }
 0xb59   :  { %v1953_v11 = vmul.f32 %v3817_v40, %v1948_v13  ;;  %v4732_v40 = vld [vmem:[%s5089_s2 + $0x8] sm:$0xff] }
 0xb5b   :  { %v4695_v22 = vsel %vm1818_vm8, %v1953_v11, %v4589_v36 }
 0xb5c   :  { %2114 = vrot.lane.b32.xlu0 %v4695_v22, %s4050_s9  ;;  %v1950_v27 = vpop.permute.xlu0 %1949 }
 0xb5d   :  { %v1954_v15 = vmul.f32 %v3819_v34, %v1950_v27 }
 0xb5f   :  { %v4703_v16 = vsel %vm1819_vm0, %v1954_v15, %v4597_v33 }
 0xb60   :  { %2116 = vrot.lane.b32.xlu0 %v4703_v16, %s4050_s9 }
 0xb64   :  { %474 = vrot.lane.b32.xlu0 %v4287_v56, %s4047_s6 }
 0xb98   :  { %v2095_v36 = vpop.permute.xlu1 %2094 }
 0xb99   :  { %v2100_v19 = vmul.f32 %v3825_v50, %v2095_v36 }
 0xb9b   :  { %v4713_v23 = vsel %vm1965_vm7, %v2100_v19, %v4607_v38 }
 0xb9c   :  { %2255 = vrot.lane.b32.xlu1 %v4713_v23, %s4050_s9  ;;  %v2097_v33 = vpop.permute.xlu1 %2096 }
 0xb9d   :  { %v2101_v28 = vmul.f32 %v3827_v58, %v2097_v33 }
 0xb9f   :  { %v4721_v56 = vsel %vm1966_vm9, %v2101_v28, %v4615_v3  ;;  %v4738_v3 = vld [vmem:[%s5089_s2] sm:$0xff]  ;;  %s4051_s2 = smov 112  }
 0xba0   :  { %2257 = vrot.lane.b32.xlu1 %v4721_v56, %s4050_s9 }
 0xba4   :  { %476 = vrot.lane.b32.xlu1 %v4283_v55, %s4047_s6 }
 0xbce   :  { %v2115_v38 = vpop.permute.xlu0 %2114 }
 0xbcf   :  { %3624 = vmatprep.mubr.msk.f32.mxu0 %vm954_vm12, %v2115_v38 }
 0xbd2   :  { %v2117_v17 = vpop.permute.xlu0 %2116 }
 0xbd3   :  { %3625 = vmatmul.mubr.msk.f32.vlgmr.msra.gmra.mxu0 %vm954_vm12, %v2117_v17 }
 0xbd4   :  { %3635 = vmatpush3.msra.mxu0 %v4732_v40 }
 0xbd5   :  { %3636 = vmatprep.subr.mxu0 %v4738_v3 }
 0xbd6   :  { %v475_v55 = vpop.permute.xlu0 %474  ;;  %3637 = vmatpush3.msra.mxu0 %v4738_v3 }
 0xbd7   :  { %481 = vst.msk [vmem:[#allocation2 + $0xb0] sm:$0xff] %vm148_vm2, %v475_v55  ;;  %3648 = vmatprep.subr.mxu0 %v4732_v40 }
 0xbde   :  { %v2251_v41 = vld [vmem:[#allocation2 + $0xb0] sm:$0xff] }
 0xc0e   :  { %v2256_v25 = vpop.permute.xlu1 %2255 }
 0xc0f   :  { %3631 = vmatprep.mubr.msk.f32.mxu1 %vm954_vm12, %v2256_v25 }
 0xc12   :  { %v2258_v21 = vpop.permute.xlu1 %2257 }
 0xc13   :  { %3632 = vmatmul.mubr.msk.f32.vlgmr.msra.gmra.mxu1 %vm954_vm12, %v2258_v21 }
 0xc14   :  { %3642 = vmatpush3.msra.mxu1 %v4630_v43 }
 0xc15   :  { %3643 = vmatprep.subr.mxu1 %v4633_v45 }
 0xc16   :  { %v477_v34 = vpop.permute.xlu1 %476  ;;  %3644 = vmatpush3.msra.mxu1 %v4633_v45 }
 0xc17   :  { %482 = vst.msk [vmem:[#allocation2 + $0xb8] sm:$0xff] %vm148_vm2, %v477_v34  ;;  %3655 = vmatprep.subr.mxu1 %v4630_v43 }
 0xc1e   :  { %v2252_v1 = vld [vmem:[#allocation2 + $0xb8] sm:$0xff] }
 0xc93   :  { %v3626_v18 = vpop.f32.mrf.mxu0 }
 0xc94   :  { %v2198_v37 = vadd.f32 %v3626_v18, %v2111_v29  ;;  %v4763_v18 = vsel %vm1818_vm8, %v4654_v47, %v4651_v51  ;;  %v4772_v29 = vsel %vm1819_vm0, %v4664_v7, %v4660_v32  ;;  %v4785_v32 = vsel %vm1965_vm7, %v4676_v6, %v4673_v4 }
 0xc95   :  { %v2188_v39 = vpop.f32.mrf.mxu0 }
 0xc96   :  { %v2197_v31 = vadd.f32 %v2188_v39, %v2110_v30  ;;  %v3335_v35 = vmul.f32 -1.442695, %v2198_v37 }
 0xc98   :  { %3836 = vtanh.f32 %v2197_v31  ;;  %v3334_v62 = vmul.f32 -1.442695, %v2197_v31 }
 0xc99   :  { %3838 = vtanh.f32 %v2198_v37 }
 0xca5   :  { %v3837_v49 = vpop.eup %3836 }
 0xca6   :  { %2217 = vrot.lane.b32.xlu0 %v3837_v49, %s4048_s7  ;;  %v3839_v26 = vpop.eup %3838 }
 0xcaa   :  { %2219 = vrot.lane.b32.xlu0 %v3839_v26, %s4048_s7 }
 0xcd3   :  { %v3633_v50 = vpop.f32.mrf.mxu1 }
 0xcd4   :  { %v2339_v48 = vadd.f32 %v3633_v50, %v2252_v1 }
 0xcd5   :  { %v2329_v42 = vpop.f32.mrf.mxu1 }
 0xcd6   :  { %v2338_v58 = vadd.f32 %v2329_v42, %v2251_v41  ;;  %v3339_v15 = vmul.f32 -1.442695, %v2339_v48  ;;  %v4794_v42 = vsel %vm1966_vm9, %v4686_v12, %v4682_v57 }
 0xcd8   :  { %3840 = vtanh.f32 %v2338_v58  ;;  %v3338_v27 = vmul.f32 -1.442695, %v2338_v58 }
 0xcd9   :  { %3842 = vtanh.f32 %v2339_v48 }
 0xcda   :  { %3844 = vpow2.f32 %v3334_v62 }
 0xcdb   :  { %3846 = vpow2.f32 %v3335_v35 }
 0xce5   :  { %v3841_v52 = vpop.eup %3840 }
 0xce6   :  { %2358 = vrot.lane.b32.xlu1 %v3841_v52, %s4048_s7  ;;  %v3843_v2 = vpop.eup %3842 }
 0xce7   :  { %v3845_v5 = vpop.eup %3844 }
 0xce8   :  { %v2205_v14 = vadd.f32 1.0, %v3845_v5  ;;  %v3847_v44 = vpop.eup %3846 }
 0xce9   :  { %v2206_v8 = vadd.f32 1.0, %v3847_v44 }
 0xcea   :  { %2360 = vrot.lane.b32.xlu1 %v3843_v2, %s4048_s7  ;;  %3848 = vrcp.f32 %v2205_v14 }
 0xceb   :  { %3850 = vrcp.f32 %v2206_v8 }
 0xcec   :  { %3852 = vpow2.f32 %v3338_v27  ;;  %v2393_v27 = vld [vmem:[#allocation2 + $0x58] sm:$0xff] }
 0xced   :  { %3854 = vpow2.f32 %v3339_v15 }
 0xcf7   :  { %v3849_v10 = vpop.eup %3848 }
 0xcf8   :  { %v3851_v20 = vpop.eup %3850  ;;  %v2213_v30 = vmul.f32 %v3849_v10, %v4763_v18 }
 0xcf9   :  { %v3853_v36 = vpop.eup %3852  ;;  %v2214_v37 = vmul.f32 %v3851_v20, %v4772_v29 }
 0xcfa   :  { %v2346_v19 = vadd.f32 1.0, %v3853_v36  ;;  %v3855_v33 = vpop.eup %3854 }
 0xcfb   :  { %v2347_v28 = vadd.f32 1.0, %v3855_v33 }
 0xcfc   :  { %3856 = vrcp.f32 %v2346_v19 }
 0xcfd   :  { %3858 = vrcp.f32 %v2347_v28 }
 0xd09   :  { %v3857_v38 = vpop.eup %3856 }
 0xd0a   :  { %v3859_v25 = vpop.eup %3858  ;;  %v2354_v7 = vmul.f32 %v3857_v38, %v4785_v32 }
 0xd0b   :  { %v2355_v58 = vmul.f32 %v3859_v25, %v4794_v42 }
 0xd18   :  { %v2218_v9 = vpop.permute.xlu0 %2217 }
 0xd19   :  { %v2223_v24 = vmul.f32 %v3849_v10, %v2218_v9 }
 0xd1b   :  { %2227 = vrot.lane.b32.xlu0 %v2223_v24, %s4049_s8 }
 0xd1c   :  { %v2220_v13 = vpop.permute.xlu0 %2219 }
 0xd1d   :  { %v2224_v11 = vmul.f32 %v3851_v20, %v2220_v13 }
 0xd1f   :  { %2229 = vrot.lane.b32.xlu0 %v2224_v11, %s4049_s8 }
 0xd58   :  { %v2359_v17 = vpop.permute.xlu1 %2358 }
 0xd59   :  { %v2364_v55 = vmul.f32 %v3857_v38, %v2359_v17 }
 0xd5b   :  { %2368 = vrot.lane.b32.xlu1 %v2364_v55, %s4049_s8 }
 0xd5c   :  { %v2361_v21 = vpop.permute.xlu1 %2360 }
 0xd5d   :  { %v2365_v34 = vmul.f32 %v3859_v25, %v2361_v21 }
 0xd5f   :  { %2370 = vrot.lane.b32.xlu1 %v2365_v34, %s4049_s8 }
 0xd8d   :  { %v2228_v39 = vpop.permute.xlu0 %2227 }
 0xd8e   :  { %v4766_v31 = vadd.f32 %v2228_v39, %v2213_v30 }
 0xd90   :  { %3860 = vtanh.f32 %v4766_v31 }
 0xd91   :  { %v2230_v49 = vpop.permute.xlu0 %2229 }
 0xd92   :  { %v4776_v26 = vadd.f32 %v2230_v49, %v2214_v37 }
 0xd94   :  { %3862 = vtanh.f32 %v4776_v26 }
 0xd9d   :  { %v3861_v51 = vpop.eup %3860 }
 0xd9e   :  { %2239 = vrot.lane.b32.xlu0 %v3861_v51, %s4049_s8 }
 0xda1   :  { %v3863_v47 = vpop.eup %3862 }
 0xda2   :  { %2241 = vrot.lane.b32.xlu0 %v3863_v47, %s4049_s8 }
 0xdcd   :  { %v2369_v50 = vpop.permute.xlu1 %2368 }
 0xdce   :  { %v4788_v41 = vadd.f32 %v2369_v50, %v2354_v7 }
 0xdd0   :  { %3864 = vtanh.f32 %v4788_v41 }
 0xdd1   :  { %v2371_v1 = vpop.permute.xlu1 %2370 }
 0xdd2   :  { %v4798_v48 = vadd.f32 %v2371_v1, %v2355_v58 }
 0xdd4   :  { %3866 = vtanh.f32 %v4798_v48 }
 0xddd   :  { %v3865_v4 = vpop.eup %3864 }
 0xdde   :  { %2380 = vrot.lane.b32.xlu1 %v3865_v4, %s4049_s8 }
 0xde1   :  { %v3867_v6 = vpop.eup %3866 }
 0xde2   :  { %2382 = vrot.lane.b32.xlu1 %v3867_v6, %s4049_s8 }
 0xe10   :  { %v2240_v52 = vpop.permute.xlu0 %2239 }
 0xe11   :  { %v2245_v2 = vmul.f32 %v3849_v10, %v2240_v52 }
 0xe13   :  { %v4806_v57 = vsel %vm1965_vm7, %v2245_v2, %v4695_v22 }
 0xe14   :  { %2396 = vrot.lane.b32.xlu0 %v4806_v57, %s4050_s9  ;;  %v2242_v12 = vpop.permute.xlu0 %2241 }
 0xe15   :  { %v2246_v62 = vmul.f32 %v3851_v20, %v2242_v12  ;;  %v2392_v20 = vld [vmem:[#allocation2 + $0x50] sm:$0xff] }
 0xe17   :  { %v4813_v35 = vsel %vm1966_vm9, %v2246_v62, %v4703_v16 }
 0xe18   :  { %2398 = vrot.lane.b32.xlu0 %v4813_v35, %s4050_s9 }
 0xe1c   :  { %367 = vrot.lane.b32.xlu0 %v4315_v0, %s4047_s6 }
 0xe50   :  { %v2381_v5 = vpop.permute.xlu1 %2380 }
 0xe51   :  { %v2386_v14 = vmul.f32 %v3857_v38, %v2381_v5 }
 0xe53   :  { %v4822_v22 = vsel %vm1818_vm8, %v2386_v14, %v4713_v23 }
 0xe54   :  { %2537 = vrot.lane.b32.xlu1 %v4822_v22, %s4050_s9  ;;  %v2383_v44 = vpop.permute.xlu1 %2382 }
 0xe55   :  { %v2387_v8 = vmul.f32 %v3859_v25, %v2383_v44 }
 0xe57   :  { %v4829_v16 = vsel %vm1819_vm0, %v2387_v8, %v4721_v56 }
 0xe58   :  { %2539 = vrot.lane.b32.xlu1 %v4829_v16, %s4050_s9 }
 0xe5c   :  { %369 = vrot.lane.b32.xlu1 %v4311_v63, %s4047_s6 }
 0xe86   :  { %v2397_v0 = vpop.permute.xlu0 %2396 }
 0xe87   :  { %3638 = vmatprep.mubr.msk.f32.mxu0 %vm954_vm12, %v2397_v0 }
 0xe8a   :  { %v2399_v23 = vpop.permute.xlu0 %2398 }
 0xe8b   :  { %3639 = vmatmul.mubr.msk.f32.vlgmr.msra.gmra.mxu0 %vm954_vm12, %v2399_v23 }
 0xe8c   :  { %3649 = vmatpush3.msra.mxu0 %v4732_v40 }
 0xe8d   :  { %3650 = vmatprep.subr.mxu0 %v4738_v3 }
 0xe8e   :  { %v368_v10 = vpop.permute.xlu0 %367  ;;  %3651 = vmatpush3.msra.mxu0 %v4738_v3 }
 0xe8f   :  { %374 = vst.msk [vmem:[#allocation2 + $0xa0] sm:$0xff] %vm148_vm2, %v368_v10  ;;  %3662 = vmatprep.subr.mxu0 %v4732_v40 }
 0xe96   :  { %v2533_v28 = vld [vmem:[#allocation2 + $0xa0] sm:$0xff] }
 0xec6   :  { %v2538_v56 = vpop.permute.xlu1 %2537 }
 0xec7   :  { %3645 = vmatprep.mubr.msk.f32.mxu1 %vm954_vm12, %v2538_v56 }
 0xeca   :  { %v2540_v63 = vpop.permute.xlu1 %2539 }
 0xecb   :  { %3646 = vmatmul.mubr.msk.f32.vlgmr.msra.gmra.mxu1 %vm954_vm12, %v2540_v63  ;;  %v4861_v63 = vsel %vm1965_vm7, %v4766_v31, %v4763_v18  ;;  %vm5097_vm7 = vcmask 261120  }
 0xecc   :  { %3656 = vmatpush3.msra.mxu1 %v4630_v43 }
 0xecd   :  { %3657 = vmatprep.subr.mxu1 %v4633_v45 }
 0xece   :  { %v370_v9 = vpop.permute.xlu1 %369  ;;  %3658 = vmatpush3.msra.mxu1 %v4633_v45 }
 0xecf   :  { %375 = vst.msk [vmem:[#allocation2 + $0xa8] sm:$0xff] %vm148_vm2, %v370_v9  ;;  %3669 = vmatprep.subr.mxu1 %v4630_v43 }
 0xed6   :  { %v2534_v55 = vld [vmem:[#allocation2 + $0xa8] sm:$0xff] }
 0xf4b   :  { %v3640_v24 = vpop.f32.mrf.mxu0 }
 0xf4c   :  { %v2480_v15 = vadd.f32 %v3640_v24, %v2393_v27 }
 0xf4d   :  { %v2470_v13 = vpop.f32.mrf.mxu0 }
 0xf4e   :  { %v2479_v11 = vadd.f32 %v2470_v13, %v2392_v20  ;;  %v3343_v39 = vmul.f32 -1.442695, %v2480_v15  ;;  %v4870_v13 = vsel %vm1966_vm9, %v4776_v26, %v4772_v29  ;;  %v4883_v29 = vsel %vm1818_vm8, %v4788_v41, %v4785_v32  ;;  %vm5098_vm9 = vmmov %vm5097_vm7 }
 0xf50   :  { %3868 = vtanh.f32 %v2479_v11  ;;  %v3342_v30 = vmul.f32 -1.442695, %v2479_v11 }
 0xf51   :  { %3870 = vtanh.f32 %v2480_v15 }
 0xf5d   :  { %v3869_v36 = vpop.eup %3868 }
 0xf5e   :  { %2499 = vrot.lane.b32.xlu0 %v3869_v36, %s4048_s7  ;;  %v3871_v19 = vpop.eup %3870 }
 0xf62   :  { %2501 = vrot.lane.b32.xlu0 %v3871_v19, %s4048_s7 }
 0xf8b   :  { %v3647_v33 = vpop.f32.mrf.mxu1 }
 0xf8c   :  { %v2621_v25 = vadd.f32 %v3647_v33, %v2534_v55  ;;  %v4892_v33 = vsel %vm1819_vm0, %v4798_v48, %v4794_v42  ;;  %vm5095_vm0 = vcmp.gt.s32.totalorder %v4389_v61, 0 }
 0xf8d   :  { %v2611_v38 = vpop.f32.mrf.mxu1 }
 0xf8e   :  { %v2620_v17 = vadd.f32 %v2611_v38, %v2533_v28  ;;  %v3347_v2 = vmul.f32 -1.442695, %v2621_v25 }
 0xf90   :  { %3872 = vtanh.f32 %v2620_v17  ;;  %v3346_v52 = vmul.f32 -1.442695, %v2620_v17 }
 0xf91   :  { %3874 = vtanh.f32 %v2621_v25 }
 0xf92   :  { %3876 = vpow2.f32 %v3342_v30 }
 0xf93   :  { %3878 = vpow2.f32 %v3343_v39 }
 0xf9d   :  { %v3873_v21 = vpop.eup %3872 }
 0xf9e   :  { %2640 = vrot.lane.b32.xlu1 %v3873_v21, %s4048_s7  ;;  %v3875_v34 = vpop.eup %3874 }
 0xf9f   :  { %v3877_v37 = vpop.eup %3876 }
 0xfa0   :  { %v2487_v49 = vadd.f32 1.0, %v3877_v37  ;;  %v3879_v51 = vpop.eup %3878 }
 0xfa1   :  { %v2488_v47 = vadd.f32 1.0, %v3879_v51 }
 0xfa2   :  { %2642 = vrot.lane.b32.xlu1 %v3875_v34, %s4048_s7  ;;  %3880 = vrcp.f32 %v2487_v49 }
 0xfa3   :  { %3882 = vrcp.f32 %v2488_v47 }
 0xfa4   :  { %3884 = vpow2.f32 %v3346_v52 }
 0xfa5   :  { %3886 = vpow2.f32 %v3347_v2 }
 0xfaf   :  { %v3881_v7 = vpop.eup %3880 }
 0xfb0   :  { %v3883_v1 = vpop.eup %3882  ;;  %v2495_v9 = vmul.f32 %v3881_v7, %v4861_v63 }
 0xfb1   :  { %v3885_v12 = vpop.eup %3884  ;;  %v2496_v11 = vmul.f32 %v3883_v1, %v4870_v13 }
 0xfb2   :  { %v2628_v62 = vadd.f32 1.0, %v3885_v12  ;;  %v3887_v5 = vpop.eup %3886 }
 0xfb3   :  { %v2629_v14 = vadd.f32 1.0, %v3887_v5 }
 0xfb4   :  { %3888 = vrcp.f32 %v2628_v62 }
 0xfb5   :  { %3890 = vrcp.f32 %v2629_v14 }
 0xfc1   :  { %v3889_v44 = vpop.eup %3888 }
 0xfc2   :  { %v3891_v23 = vpop.eup %3890  ;;  %v2636_v26 = vmul.f32 %v3889_v44, %v4883_v29 }
 0xfc3   :  { %v2637_v28 = vmul.f32 %v3891_v23, %v4892_v33 }
 0xfd0   :  { %v2500_v50 = vpop.permute.xlu0 %2499 }
 0xfd1   :  { %v2505_v58 = vmul.f32 %v3881_v7, %v2500_v50 }
 0xfd3   :  { %2509 = vrot.lane.b32.xlu0 %v2505_v58, %s4049_s8  ;;  %v2675_v58 = vld [vmem:[#allocation2 + $0x68] sm:$0xff] }
 0xfd4   :  { %v2502_v4 = vpop.permute.xlu0 %2501 }
 0xfd5   :  { %v2506_v6 = vmul.f32 %v3883_v1, %v2502_v4 }
 0xfd7   :  { %2511 = vrot.lane.b32.xlu0 %v2506_v6, %s4049_s8 }
0x1010   :  { %v2641_v8 = vpop.permute.xlu1 %2640 }
0x1011   :  { %v2646_v0 = vmul.f32 %v3889_v44, %v2641_v8 }
0x1013   :  { %2650 = vrot.lane.b32.xlu1 %v2646_v0, %s4049_s8 }
0x1014   :  { %v2643_v10 = vpop.permute.xlu1 %2642 }
0x1015   :  { %v2647_v56 = vmul.f32 %v3891_v23, %v2643_v10 }
0x1017   :  { %2652 = vrot.lane.b32.xlu1 %v2647_v56, %s4049_s8 }
0x1045   :  { %v2510_v24 = vpop.permute.xlu0 %2509 }
0x1046   :  { %v4864_v20 = vadd.f32 %v2510_v24, %v2495_v9 }
0x1048   :  { %3892 = vtanh.f32 %v4864_v20 }
0x1049   :  { %v2512_v27 = vpop.permute.xlu0 %2511 }
0x104a   :  { %v4874_v15 = vadd.f32 %v2512_v27, %v2496_v11 }
0x104c   :  { %3894 = vtanh.f32 %v4874_v15 }
0x1055   :  { %v3893_v18 = vpop.eup %3892 }
0x1056   :  { %2521 = vrot.lane.b32.xlu0 %v3893_v18, %s4049_s8 }
0x1059   :  { %v3895_v31 = vpop.eup %3894 }
0x105a   :  { %2523 = vrot.lane.b32.xlu0 %v3895_v31, %s4049_s8 }
0x1085   :  { %v2651_v36 = vpop.permute.xlu1 %2650 }
0x1086   :  { %v4886_v19 = vadd.f32 %v2651_v36, %v2636_v26 }
0x1088   :  { %3896 = vtanh.f32 %v4886_v19 }
0x1089   :  { %v2653_v38 = vpop.permute.xlu1 %2652 }
0x108a   :  { %v4896_v17 = vadd.f32 %v2653_v38, %v2637_v28 }
0x108c   :  { %3898 = vtanh.f32 %v4896_v17 }
0x1095   :  { %v3897_v32 = vpop.eup %3896 }
0x1096   :  { %2662 = vrot.lane.b32.xlu1 %v3897_v32, %s4049_s8 }
0x1099   :  { %v3899_v41 = vpop.eup %3898 }
0x109a   :  { %2664 = vrot.lane.b32.xlu1 %v3899_v41, %s4049_s8 }
0x10c8   :  { %v2522_v55 = vpop.permute.xlu0 %2521 }
0x10c9   :  { %v2527_v25 = vmul.f32 %v3881_v7, %v2522_v55  ;;  %v2674_v7 = vld [vmem:[#allocation2 + $0x60] sm:$0xff] }
0x10cb   :  { %v4904_v42 = vsel %vm1671_vm5, %v2527_v25, %v4806_v57 }
0x10cc   :  { %2678 = vrot.lane.b32.xlu0 %v4904_v42, %s4050_s9  ;;  %v2524_v48 = vpop.permute.xlu0 %2523 }
0x10cd   :  { %v2528_v21 = vmul.f32 %v3883_v1, %v2524_v48 }
0x10cf   :  { %v4911_v34 = vsel %vm1672_vm6, %v2528_v21, %v4813_v35 }
0x10d0   :  { %2680 = vrot.lane.b32.xlu0 %v4911_v34, %s4050_s9 }
0x10d4   :  { %260 = vrot.lane.b32.xlu0 %v4279_v54, %s4047_s6 }
0x1108   :  { %v2663_v30 = vpop.permute.xlu1 %2662 }
0x1109   :  { %v2668_v39 = vmul.f32 %v3889_v44, %v2663_v30 }
0x110b   :  { %v4920_v57 = vsel %vm1524_vm3, %v2668_v39, %v4822_v22 }
0x110c   :  { %2819 = vrot.lane.b32.xlu1 %v4920_v57, %s4050_s9  ;;  %v2665_v37 = vpop.permute.xlu1 %2664 }
0x110d   :  { %v2669_v49 = vmul.f32 %v3891_v23, %v2665_v37  ;;  %v4957_v37 = vsel %vm1671_vm5, %v4864_v20, %v4861_v63 }
0x110f   :  { %v4927_v35 = vsel %vm1525_vm4, %v2669_v49, %v4829_v16 }
0x1110   :  { %2821 = vrot.lane.b32.xlu1 %v4927_v35, %s4050_s9 }
0x1114   :  { %262 = vrot.lane.b32.xlu1 %v4275_v53, %s4047_s6 }
0x113e   :  { %v2679_v54 = vpop.permute.xlu0 %2678 }
0x113f   :  { %3652 = vmatprep.mubr.msk.f32.mxu0 %vm954_vm12, %v2679_v54 }
0x1142   :  { %v2681_v22 = vpop.permute.xlu0 %2680 }
0x1143   :  { %3653 = vmatmul.mubr.msk.f32.vlgmr.msra.gmra.mxu0 %vm954_vm12, %v2681_v22 }
0x1144   :  { %3663 = vmatpush3.msra.mxu0 %v4732_v40 }
0x1145   :  { %3664 = vmatprep.subr.mxu0 %v4738_v3 }
0x1146   :  { %v261_v51 = vpop.permute.xlu0 %260  ;;  %3665 = vmatpush3.msra.mxu0 %v4738_v3 }
0x1147   :  { %267 = vst.msk [vmem:[#allocation2 + $0x90] sm:$0xff] %vm148_vm2, %v261_v51  ;;  %v4966_v51 = vsel %vm1672_vm6, %v4874_v15, %v4870_v13  ;;  %v4979_v13 = vsel %vm1524_vm3, %v4886_v19, %v4883_v29 }
0x114e   :  { %v2815_v52 = vld [vmem:[#allocation2 + $0x90] sm:$0xff] }
0x117e   :  { %v2820_v16 = vpop.permute.xlu1 %2819 }
0x117f   :  { %3659 = vmatprep.mubr.msk.f32.mxu1 %vm954_vm12, %v2820_v16 }
0x1182   :  { %v2822_v47 = vpop.permute.xlu1 %2821 }
0x1183   :  { %3660 = vmatmul.mubr.msk.f32.vlgmr.msra.gmra.mxu1 %vm954_vm12, %v2822_v47 }
0x1184   :  { %3670 = vmatpush3.msra.mxu1 %v4630_v43 }
0x1185   :  { %3671 = vmatprep.subr.mxu1 %v4633_v45 }
0x1186   :  { %v263_v53 = vpop.permute.xlu1 %262  ;;  %3672 = vmatpush3.msra.mxu1 %v4633_v45 }
0x1187   :  { %268 = vst.msk [vmem:[#allocation2 + $0x98] sm:$0xff] %vm148_vm2, %v263_v53 }
0x118e   :  { %v2816_v12 = vld [vmem:[#allocation2 + $0x98] sm:$0xff] }
0x1203   :  { %v3654_v40 = vpop.f32.mrf.mxu0 }
0x1204   :  { %v2762_v1 = vadd.f32 %v3654_v40, %v2675_v58 }
0x1205   :  { %v2752_v3 = vpop.f32.mrf.mxu0 }
0x1206   :  { %v2761_v50 = vadd.f32 %v2752_v3, %v2674_v7  ;;  %v3351_v8 = vmul.f32 -1.442695, %v2762_v1  ;;  %v4988_v3 = vsel %vm1525_vm4, %v4896_v17, %v4892_v33 }
0x1208   :  { %3900 = vtanh.f32 %v2761_v50  ;;  %v3350_v44 = vmul.f32 -1.442695, %v2761_v50 }
0x1209   :  { %3902 = vtanh.f32 %v2762_v1 }
0x1215   :  { %v3901_v4 = vpop.eup %3900 }
0x1216   :  { %2781 = vrot.lane.b32.xlu0 %v3901_v4, %s4048_s7  ;;  %v3903_v6 = vpop.eup %3902 }
0x121a   :  { %2783 = vrot.lane.b32.xlu0 %v3903_v6, %s4048_s7 }
0x1243   :  { %v3661_v43 = vpop.f32.mrf.mxu1 }
0x1244   :  { %v2903_v62 = vadd.f32 %v3661_v43, %v2816_v12 }
0x1245   :  { %v2893_v2 = vpop.f32.mrf.mxu1 }
0x1246   :  { %v2902_v45 = vadd.f32 %v2893_v2, %v2815_v52  ;;  %v3355_v36 = vmul.f32 -1.442695, %v2903_v62 }
0x1248   :  { %3904 = vtanh.f32 %v2902_v45  ;;  %v3354_v26 = vmul.f32 -1.442695, %v2902_v45 }
0x1249   :  { %3906 = vtanh.f32 %v2903_v62 }
0x124a   :  { %3908 = vpow2.f32 %v3350_v44 }
0x124b   :  { %3910 = vpow2.f32 %v3351_v8  ;;  %v2957_v8 = vld [vmem:[#allocation2 + $0x78] sm:$0xff] }
0x1255   :  { %v3905_v5 = vpop.eup %3904 }
0x1256   :  { %2922 = vrot.lane.b32.xlu1 %v3905_v5, %s4048_s7  ;;  %v3907_v14 = vpop.eup %3906 }
0x1257   :  { %v3909_v0 = vpop.eup %3908 }
0x1258   :  { %v2769_v23 = vadd.f32 1.0, %v3909_v0  ;;  %v3911_v10 = vpop.eup %3910 }
0x1259   :  { %v2770_v56 = vadd.f32 1.0, %v3911_v10 }
0x125a   :  { %2924 = vrot.lane.b32.xlu1 %v3907_v14, %s4048_s7  ;;  %3912 = vrcp.f32 %v2769_v23  ;;  %v2956_v23 = vld [vmem:[#allocation2 + $0x70] sm:$0xff] }
0x125b   :  { %3914 = vrcp.f32 %v2770_v56 }
0x125c   :  { %3916 = vpow2.f32 %v3354_v26 }
0x125d   :  { %3918 = vpow2.f32 %v3355_v36 }
0x1267   :  { %v3913_v9 = vpop.eup %3912 }
0x1268   :  { %v3915_v27 = vpop.eup %3914  ;;  %v2777_v49 = vmul.f32 %v3913_v9, %v4957_v37 }
0x1269   :  { %v3917_v28 = vpop.eup %3916  ;;  %v2778_v16 = vmul.f32 %v3915_v27, %v4966_v51 }
0x126a   :  { %v2910_v38 = vadd.f32 1.0, %v3917_v28  ;;  %v3919_v32 = vpop.eup %3918 }
0x126b   :  { %v2911_v41 = vadd.f32 1.0, %v3919_v32 }
0x126c   :  { %3920 = vrcp.f32 %v2910_v38 }
0x126d   :  { %3922 = vrcp.f32 %v2911_v41 }
0x1279   :  { %v3921_v55 = vpop.eup %3920 }
0x127a   :  { %v3923_v21 = vpop.eup %3922  ;;  %v2918_v15 = vmul.f32 %v3921_v55, %v4979_v13 }
0x127b   :  { %v2919_v50 = vmul.f32 %v3923_v21, %v4988_v3 }
0x1288   :  { %v2782_v24 = vpop.permute.xlu0 %2781 }
0x1289   :  { %v2787_v11 = vmul.f32 %v3913_v9, %v2782_v24 }
0x128b   :  { %2791 = vrot.lane.b32.xlu0 %v2787_v11, %s4049_s8 }
0x128c   :  { %v2784_v18 = vpop.permute.xlu0 %2783 }
0x128d   :  { %v2788_v31 = vmul.f32 %v3915_v27, %v2784_v18 }
0x128f   :  { %2793 = vrot.lane.b32.xlu0 %v2788_v31, %s4049_s8 }
0x12c8   :  { %v2923_v25 = vpop.permute.xlu1 %2922 }
0x12c9   :  { %v2928_v48 = vmul.f32 %v3921_v55, %v2923_v25 }
0x12cb   :  { %2932 = vrot.lane.b32.xlu1 %v2928_v48, %s4049_s8 }
0x12cc   :  { %v2925_v30 = vpop.permute.xlu1 %2924 }
0x12cd   :  { %v2929_v39 = vmul.f32 %v3923_v21, %v2925_v30 }
0x12cf   :  { %2934 = vrot.lane.b32.xlu1 %v2929_v39, %s4049_s8 }
0x12fd   :  { %v2792_v54 = vpop.permute.xlu0 %2791 }
0x12fe   :  { %v4960_v22 = vadd.f32 %v2792_v54, %v2777_v49 }
0x1300   :  { %3924 = vtanh.f32 %v4960_v22 }
0x1301   :  { %v2794_v47 = vpop.permute.xlu0 %2793 }
0x1302   :  { %v4970_v53 = vadd.f32 %v2794_v47, %v2778_v16 }
0x1304   :  { %3926 = vtanh.f32 %v4970_v53 }
0x130d   :  { %v3925_v63 = vpop.eup %3924 }
0x130e   :  { %2803 = vrot.lane.b32.xlu0 %v3925_v63, %s4049_s8 }
0x1311   :  { %v3927_v20 = vpop.eup %3926 }
0x1312   :  { %2805 = vrot.lane.b32.xlu0 %v3927_v20, %s4049_s8 }
0x133d   :  { %v2933_v40 = vpop.permute.xlu1 %2932 }
0x133e   :  { %v4982_v7 = vadd.f32 %v2933_v40, %v2918_v15 }
0x1340   :  { %3928 = vtanh.f32 %v4982_v7 }
0x1341   :  { %v2935_v58 = vpop.permute.xlu1 %2934 }
0x1342   :  { %v4992_v1 = vadd.f32 %v2935_v58, %v2919_v50 }
0x1344   :  { %3930 = vtanh.f32 %v4992_v1 }
0x134d   :  { %v3929_v29 = vpop.eup %3928 }
0x134e   :  { %2944 = vrot.lane.b32.xlu1 %v3929_v29, %s4049_s8 }
0x1351   :  { %v3931_v19 = vpop.eup %3930 }
0x1352   :  { %2946 = vrot.lane.b32.xlu1 %v3931_v19, %s4049_s8 }
0x1380   :  { %v2804_v4 = vpop.permute.xlu0 %2803 }
0x1381   :  { %v2809_v6 = vmul.f32 %v3913_v9, %v2804_v4 }
0x1383   :  { %v5000_v33 = vsel %vm1377_vm15, %v2809_v6, %v4904_v42 }
0x1384   :  { %2960 = vrot.lane.b32.xlu0 %v5000_v33, %s4050_s9  ;;  %v2806_v17 = vpop.permute.xlu0 %2805 }
0x1385   :  { %v2810_v43 = vmul.f32 %v3915_v27, %v2806_v17 }
0x1387   :  { %v5007_v52 = vsel %vm1378_vm1, %v2810_v43, %v4911_v34 }
0x1388   :  { %2962 = vrot.lane.b32.xlu0 %v5007_v52, %s4050_s9 }
0x138c   :  { %153 = vrot.lane.b32.xlu0 %v4303_v60, %s4047_s6 }
0x13c0   :  { %v2945_v2 = vpop.permute.xlu1 %2944 }
0x13c1   :  { %v2950_v45 = vmul.f32 %v3921_v55, %v2945_v2  ;;  %v2814_v2 = vsel %vm1378_vm1, %v4970_v53, %v4966_v51  ;;  %v2955_v51 = vsel %vm1231_vm14, %v4992_v1, %v4988_v3 }
0x13c3   :  { %v5016_v42 = vsel %vm1230_vm13, %v2950_v45, %v4920_v57 }
0x13c4   :  { %3099 = vrot.lane.b32.xlu1 %v5016_v42, %s4050_s9  ;;  %v2947_v12 = vpop.permute.xlu1 %2946 }
0x13c5   :  { %v2951_v62 = vmul.f32 %v3923_v21, %v2947_v12 }
0x13c7   :  { %v5023_v34 = vsel %vm1231_vm14, %v2951_v62, %v4927_v35 }
0x13c8   :  { %3101 = vrot.lane.b32.xlu1 %v5023_v34, %s4050_s9 }
0x13cc   :  { %155 = vrot.lane.b32.xlu1 %v4299_v59, %s4047_s6 }
0x13f6   :  { %v2961_v60 = vpop.permute.xlu0 %2960 }
0x13f7   :  { %3666 = vmatprep.mubr.msk.f32.mxu0 %vm954_vm12, %v2961_v60  ;;  %v2813_v60 = vsel %vm1377_vm15, %v4960_v22, %v4957_v37  ;;  %v2954_v37 = vsel %vm1230_vm13, %v4982_v7, %v4979_v13 }
0x13fa   :  { %v2963_v57 = vpop.permute.xlu0 %2962 }
0x13fb   :  { %3667 = vmatmul.mubr.msk.f32.vlgmr.msra.gmra.mxu0 %vm954_vm12, %v2963_v57 }
0x13fe   :  { %v154_v5 = vpop.permute.xlu0 %153 }
0x13ff   :  { %160 = vst.msk [vmem:[#allocation2 + $0x80] sm:$0xff] %vm148_vm2, %v154_v5 }
0x1406   :  { %v3095_v31 = vld [vmem:[#allocation2 + $0x80] sm:$0xff] }
0x1436   :  { %v3100_v14 = vpop.permute.xlu1 %3099 }
0x1437   :  { %3673 = vmatprep.mubr.msk.f32.mxu1 %vm954_vm12, %v3100_v14 }
0x143a   :  { %v3102_v35 = vpop.permute.xlu1 %3101 }
0x143b   :  { %3674 = vmatmul.mubr.msk.f32.vlgmr.msra.gmra.mxu1 %vm954_vm12, %v3102_v35 }
0x143e   :  { %v156_v44 = vpop.permute.xlu1 %155 }
0x143f   :  { %161 = vst.msk [vmem:[#allocation2 + $0x88] sm:$0xff] %vm148_vm2, %v156_v44  ;;  %vm5096_vm2 = vcmp.gt.s32.totalorder %v4381_v46, 0 }
0x1446   :  { %v3096_v11 = vld [vmem:[#allocation2 + $0x88] sm:$0xff] }
0x14bb   :  { %v3668_v59 = vpop.f32.mrf.mxu0 }
0x14bc   :  { %v3044_v0 = vadd.f32 %v3668_v59, %v2957_v8 }
0x14bd   :  { %v3034_v10 = vpop.f32.mrf.mxu0 }
0x14be   :  { %3932 = vtanh.f32 %v3044_v0  ;;  %v3043_v56 = vadd.f32 %v3034_v10, %v2956_v23  ;;  %v3359_v32 = vmul.f32 -1.442695, %v3044_v0 }
0x14c0   :  { %3934 = vtanh.f32 %v3043_v56  ;;  %v3358_v41 = vmul.f32 -1.442695, %v3043_v56 }
0x14cb   :  { %v3933_v9 = vpop.eup %3932 }
0x14cc   :  { %3065 = vrot.lane.b32.xlu1 %v3933_v9, %s4048_s7 }
0x14cd   :  { %v3935_v24 = vpop.eup %3934 }
0x14ce   :  { %3063 = vrot.lane.b32.xlu0 %v3935_v24, %s4048_s7 }
0x14fb   :  { %v3675_v27 = vpop.f32.mrf.mxu1 }
0x14fc   :  { %v3183_v18 = vadd.f32 %v3675_v27, %v3096_v11 }
0x14fd   :  { %v3173_v26 = vpop.f32.mrf.mxu1 }
0x14fe   :  { %3936 = vtanh.f32 %v3183_v18  ;;  %v3182_v36 = vadd.f32 %v3173_v26, %v3095_v31  ;;  %v3363_v63 = vmul.f32 -1.442695, %v3183_v18 }
0x1500   :  { %3938 = vtanh.f32 %v3182_v36  ;;  %v3362_v20 = vmul.f32 -1.442695, %v3182_v36 }
0x1501   :  { %3940 = vpow2.f32 %v3359_v32 }
0x1502   :  { %3942 = vpow2.f32 %v3358_v41 }
0x150b   :  { %v3937_v28 = vpop.eup %3936 }
0x150c   :  { %3204 = vrot.lane.b32.xlu1 %v3937_v28, %s4048_s7 }
0x150d   :  { %v3939_v38 = vpop.eup %3938 }
0x150e   :  { %3202 = vrot.lane.b32.xlu0 %v3939_v38, %s4048_s7  ;;  %v3941_v55 = vpop.eup %3940 }
0x150f   :  { %v3943_v25 = vpop.eup %3942  ;;  %v3052_v48 = vadd.f32 1.0, %v3941_v55 }
0x1510   :  { %v3051_v21 = vadd.f32 1.0, %v3943_v25 }
0x1511   :  { %3944 = vrcp.f32 %v3052_v48 }
0x1512   :  { %3946 = vrcp.f32 %v3051_v21 }
0x1513   :  { %3948 = vpow2.f32 %v3363_v63 }
0x1514   :  { %3950 = vpow2.f32 %v3362_v20 }
0x151e   :  { %v3945_v30 = vpop.eup %3944 }
0x151f   :  { %v3947_v54 = vpop.eup %3946  ;;  %v3060_v45 = vmul.f32 %v3945_v30, %v2814_v2 }
0x1520   :  { %v3949_v15 = vpop.eup %3948  ;;  %v3059_v57 = vmul.f32 %v3947_v54, %v2813_v60 }
0x1521   :  { %v3951_v40 = vpop.eup %3950  ;;  %v3191_v50 = vadd.f32 1.0, %v3949_v15 }
0x1522   :  { %v3190_v58 = vadd.f32 1.0, %v3951_v40 }
0x1523   :  { %3952 = vrcp.f32 %v3191_v50 }
0x1524   :  { %3954 = vrcp.f32 %v3190_v58 }
0x1530   :  { %v3953_v29 = vpop.eup %3952 }
0x1531   :  { %v3955_v6 = vpop.eup %3954  ;;  %v3199_v53 = vmul.f32 %v3953_v29, %v2955_v51 }
0x1532   :  { %v3198_v22 = vmul.f32 %v3955_v6, %v2954_v37 }
0x153e   :  { %v3066_v39 = vpop.permute.xlu1 %3065 }
0x153f   :  { %v3070_v49 = vmul.f32 %v3945_v30, %v3066_v39 }
0x1540   :  { %v3064_v16 = vpop.permute.xlu0 %3063 }
0x1541   :  { %3075 = vrot.lane.b32.xlu1 %v3070_v49, %s4049_s8  ;;  %v3069_v47 = vmul.f32 %v3947_v54, %v3064_v16 }
0x1543   :  { %3073 = vrot.lane.b32.xlu0 %v3069_v47, %s4049_s8 }
0x157e   :  { %v3205_v19 = vpop.permute.xlu1 %3204 }
0x157f   :  { %v3209_v4 = vmul.f32 %v3953_v29, %v3205_v19 }
0x1580   :  { %v3203_v17 = vpop.permute.xlu0 %3202 }
0x1581   :  { %3214 = vrot.lane.b32.xlu1 %v3209_v4, %s4049_s8  ;;  %v3208_v43 = vmul.f32 %v3955_v6, %v3203_v17 }
0x1583   :  { %3212 = vrot.lane.b32.xlu0 %v3208_v43, %s4049_s8 }
0x15b3   :  { %v3076_v12 = vpop.permute.xlu1 %3075 }
0x15b4   :  { %v3080_v62 = vadd.f32 %v3076_v12, %v3060_v45 }
0x15b5   :  { %v3074_v5 = vpop.permute.xlu0 %3073 }
0x15b6   :  { %3956 = vtanh.f32 %v3080_v62  ;;  %v3079_v14 = vadd.f32 %v3074_v5, %v3059_v57 }
0x15b8   :  { %3958 = vtanh.f32 %v3079_v14 }
0x15c3   :  { %v3957_v35 = vpop.eup %3956 }
0x15c4   :  { %3087 = vrot.lane.b32.xlu1 %v3957_v35, %s4049_s8 }
0x15c5   :  { %v3959_v44 = vpop.eup %3958 }
0x15c6   :  { %3085 = vrot.lane.b32.xlu0 %v3959_v44, %s4049_s8 }
0x15f3   :  { %v3215_v8 = vpop.permute.xlu1 %3214 }
0x15f4   :  { %v3219_v59 = vadd.f32 %v3215_v8, %v3199_v53 }
0x15f5   :  { %v3213_v0 = vpop.permute.xlu0 %3212 }
0x15f6   :  { %3960 = vtanh.f32 %v3219_v59  ;;  %v3218_v23 = vadd.f32 %v3213_v0, %v3198_v22 }
0x15f8   :  { %3962 = vtanh.f32 %v3218_v23 }
0x1603   :  { %v3961_v10 = vpop.eup %3960 }
0x1604   :  { %3226 = vrot.lane.b32.xlu1 %v3961_v10, %s4049_s8 }
0x1605   :  { %v3963_v56 = vpop.eup %3962 }
0x1606   :  { %3224 = vrot.lane.b32.xlu0 %v3963_v56, %s4049_s8 }
0x1636   :  { %v3088_v3 = vpop.permute.xlu1 %3087 }
0x1637   :  { %v3092_v1 = vmul.f32 %v3945_v30, %v3088_v3 }
0x1638   :  { %v3086_v9 = vpop.permute.xlu0 %3085 }
0x1639   :  { %v3094_v24 = vsel %vm1094_vm11, %v3092_v1, %v5007_v52  ;;  %v3091_v11 = vmul.f32 %v3947_v54, %v3086_v9 }
0x163a   :  { %3238 = vrot.lane.b32.xlu1 %v3094_v24, %s4050_s9 }
0x163b   :  { %v3093_v13 = vsel %vm1093_vm10, %v3091_v11, %v5000_v33 }
0x163c   :  { %3236 = vrot.lane.b32.xlu0 %v3093_v13, %s4050_s9 }
0x1676   :  { %v3227_v7 = vpop.permute.xlu1 %3226 }
0x1677   :  { %v3231_v27 = vmul.f32 %v3953_v29, %v3227_v7 }
0x1678   :  { %v3225_v18 = vpop.permute.xlu0 %3224 }
0x1679   :  { %v3233_v31 = vsel %vm5095_vm0, %v3231_v27, %v5023_v34  ;;  %v3230_v26 = vmul.f32 %v3955_v6, %v3225_v18 }
0x167a   :  { %3246 = vrot.lane.b32.xlu1 %v3233_v31, %s4051_s2 }
0x167b   :  { %v3232_v52 = vsel %vm5096_vm2, %v3230_v26, %v5016_v42 }
0x167c   :  { %3244 = vrot.lane.b32.xlu0 %v3232_v52, %s4051_s2 }
0x16ac   :  { %v3239_v36 = vpop.permute.xlu1 %3238 }
0x16ae   :  { %v3237_v28 = vpop.permute.xlu0 %3236 }
0x16ec   :  { %v3247_v33 = vpop.permute.xlu1 %3246 }
0x16ed   :  { %v3251_v38 = vsel %vm954_vm12, %v3239_v36, %v3247_v33 }
0x16ee   :  { %3253 = vst.msk [vmem:[#allocation8 + $0x8] sm:$0xff] %vm5097_vm7, %v3251_v38  ;;  %v3245_v32 = vpop.permute.xlu0 %3244 }
0x16ef   :  { %v3250_v61 = vsel %vm954_vm12, %v3237_v28, %v3245_v32 }
0x16f0   :  { %3252 = vst.msk [vmem:[#allocation8] sm:$0xff] %vm5098_vm9, %v3250_v61 }
0x16f1   :  { %4019 = shalt.err (!%p4016_p0)
}
0x16f2   :  { %3265 = dma.vmem_to_hbm [thread:$0]  %s3260_s15, 256, %s5091_s4, [#allocation5], %s4035_s18, %s4035_s18, %s4036_s19  }
0x16f3   :  { %4032 = dma.done.wait [#allocation5], 256  }
0x16f4   :  { %4033 = vsyncadd [#allocation5], 4294967040 }
0x16f5   :  { %3269 = vsyncpa [#allocation4], 1 }
0x16f6   :  { %3270 = vsyncpa [#allocation7], 1 }
0x16f7   :  { %3271 = vsyncpa [#allocation5], 1 }

</bundles_post_ra>
